<compile_context>
chip_gen: v5e
topology: v5e:2x2
jax: 0.10.0
libtpu: 0.0.40
codegen_flags: <defaults>
</compile_context>

<pallas_src>
import functools

import jax
import jax.numpy as jnp
from jax import lax
from jax.experimental import pallas as pl
from jax.experimental.pallas import tpu as pltpu

_LANES = 128
_VMEM_LIMIT = 32 * 1024 * 1024  # safe scoped-VMEM cap on v5e / v6e / v7x


def _cparams():
    return pltpu.CompilerParams(
        dimension_semantics=("parallel", "parallel"),
        vmem_limit_bytes=_VMEM_LIMIT)


def _cost(flops, bytes_accessed):
    return pl.CostEstimate(flops=int(flops), transcendentals=0,
                           bytes_accessed=int(bytes_accessed))


def _round_up(n, m):
    return ((n + m - 1) // m) * m


def _pick_tm(m):
    for tm in (512, 256, 128, 64, 32, 16, 8):
        if m % tm == 0:
            return tm
    return m


# --------------------------------------------------------------------------- #
# Kernel 1: tiled matmul + bias + ReLU (all 1x1 convs reading the same input
# packed into one weight matrix, Cout padded to a 128 multiple).
# --------------------------------------------------------------------------- #
def _matmul_bias_relu_kernel(x_ref, w_ref, b_ref, o_ref):
    # x: (TM, K) bf16, w: (K, TN) bf16, b: (1, TN) f32 -> o: (TM, TN) f32
    y = jnp.dot(x_ref[...], w_ref[...], preferred_element_type=jnp.float32)
    o_ref[...] = jnp.maximum(y + b_ref[...], 0.0).astype(o_ref.dtype)


def _matmul_bias_relu(x2d, w2d, b2d):
    m, k = x2d.shape
    _, cp = w2d.shape
    tm, tn = _pick_tm(m), _LANES
    assert m % tm == 0 and cp % tn == 0
    grid = (m // tm, cp // tn)
    return pl.pallas_call(
        _matmul_bias_relu_kernel,
        out_shape=jax.ShapeDtypeStruct((m, cp), jnp.float32),
        grid_spec=pltpu.PrefetchScalarGridSpec(
            num_scalar_prefetch=0, grid=grid,
            in_specs=[
                pl.BlockSpec((tm, k), lambda i, j: (i, 0)),
                pl.BlockSpec((k, tn), lambda i, j: (0, j)),
                pl.BlockSpec((1, tn), lambda i, j: (0, j)),
            ],
            out_specs=pl.BlockSpec((tm, tn), lambda i, j: (i, j))),
        compiler_params=_cparams(),
        cost_estimate=_cost(2 * m * k * cp,
                            2 * (x2d.size + w2d.size) + 4 * (b2d.size + m * cp)),
    )(x2d, w2d, b2d)


# --------------------------------------------------------------------------- #
# Kernel 2: fused 1x7 -> 7x1 conv pair (BN folded, ReLU after each stage).
# Tap reductions happen in-kernel on the MXU; the intermediate lives in a
# zero-padded bf16 VMEM scratch (halo rows for the 7x1 stage).
# --------------------------------------------------------------------------- #
def _conv_1x7_7x1_kernel(xp_ref, w1_ref, b1_ref, w2_ref, b2_ref, o_ref, mid_ref):
    # xp : (1, H, W+6, Cin) f32 (zero-padded along W)
    # w1 : (7, Cin, Cmid) bf16, b1: (1, Cmid) f32   -- 1x7 conv
    # w2 : (7, Cmid, TN)  bf16, b2: (1, TN)   f32   -- 7x1 conv
    # mid: (H+6, W, Cmid) bf16 VMEM scratch
    # o  : (1, H, W, TN)  f32
    _, h, wp, cin = xp_ref.shape
    w = wp - 6
    cmid = w1_ref.shape[2]
    tn = o_ref.shape[3]

    x = xp_ref[0]                                         # (H, W+6, Cin) f32

    # ---- stage 1: 1x7 conv (tap loop along W, f32 accumulation) ------------
    acc1 = jnp.zeros((h * w, cmid), jnp.float32)
    for t in range(7):
        xt = x[:, t:t + w, :].reshape(h * w, cin).astype(jnp.bfloat16)
        acc1 = acc1 + jnp.dot(xt, w1_ref[t], preferred_element_type=jnp.float32)
    mid = jnp.maximum(acc1 + b1_ref[...], 0.0).reshape(h, w, cmid)

    # intermediate stays in VMEM (bf16), zero halo rows for the 7x1 stage
    mid_ref[...] = jnp.zeros_like(mid_ref)
    mid_ref[3:3 + h, :, :] = mid.astype(mid_ref.dtype)
    m_all = mid_ref[...]                                  # (H+6, W, Cmid) bf16

    # ---- stage 2: 7x1 conv (tap loop along H) -------------------------------
    acc2 = jnp.zeros((h * w, tn), jnp.float32)
    for t in range(7):
        mt = m_all[t:t + h, :, :].reshape(h * w, cmid)
        acc2 = acc2 + jnp.dot(mt, w2_ref[t], preferred_element_type=jnp.float32)
    y = jnp.maximum(acc2 + b2_ref[...], 0.0)
    o_ref[...] = y.reshape(1, h, w, tn).astype(o_ref.dtype)


def _conv_pair(x_nhwc, p):
    n, h, w, cin = x_nhwc.shape
    cmid = p["w1"].shape[2]
    cp = p["w2"].shape[2]
    tn = _LANES
    xp = jnp.pad(x_nhwc, ((0, 0), (0, 0), (3, 3), (0, 0))).astype(jnp.float32)
    grid = (n, cp // tn)
    flops = 2 * n * h * w * 7 * (cin * cmid + cmid * cp)
    nbytes = 4 * xp.size + 2 * (p["w1"].size + p["w2"].size) + 4 * n * h * w * cp
    out = pl.pallas_call(
        _conv_1x7_7x1_kernel,
        out_shape=jax.ShapeDtypeStruct((n, h, w, cp), jnp.float32),
        grid_spec=pltpu.PrefetchScalarGridSpec(
            num_scalar_prefetch=0, grid=grid,
            in_specs=[
                pl.BlockSpec((1, h, w + 6, cin), lambda b, j: (b, 0, 0, 0)),
                pl.BlockSpec((7, cin, cmid), lambda b, j: (0, 0, 0)),
                pl.BlockSpec((1, cmid), lambda b, j: (0, 0)),
                pl.BlockSpec((7, cmid, tn), lambda b, j: (0, 0, j)),
                pl.BlockSpec((1, tn), lambda b, j: (0, j)),
            ],
            out_specs=pl.BlockSpec((1, h, w, tn), lambda b, j: (b, 0, 0, j)),
            scratch_shapes=[pltpu.VMEM((h + 6, w, cmid), jnp.bfloat16)]),
        compiler_params=_cparams(),
        cost_estimate=_cost(flops, nbytes),
    )(xp, p["w1"], p["b1"], p["w2"], p["b2"])
    return out[..., :p["cout"]]


# --------------------------------------------------------------------------- #
# Kernel 3: separable 3x3 stride-1 maxpool fused with the following 1x1 conv.
# --------------------------------------------------------------------------- #
def _maxpool3x3_conv1x1_kernel(xp_ref, w_ref, b_ref, o_ref):
    # xp: (1, H+2, W+2, Cin) f32 (-inf halo), w: (Cin, TN) bf16, b: (1, TN) f32
    _, hp, wp, cin = xp_ref.shape
    h, w = hp - 2, wp - 2
    tn = o_ref.shape[3]
    x = xp_ref[0]                                          # (H+2, W+2, Cin)
    rowm = jnp.maximum(jnp.maximum(x[:, 0:w, :], x[:, 1:w + 1, :]),
                       x[:, 2:w + 2, :])                   # (H+2, W, Cin)
    pooled = jnp.maximum(jnp.maximum(rowm[0:h], rowm[1:h + 1]), rowm[2:h + 2])
    p2 = pooled.reshape(h * w, cin).astype(w_ref.dtype)
    y = jnp.dot(p2, w_ref[...], preferred_element_type=jnp.float32)
    y = jnp.maximum(y + b_ref[...], 0.0)
    o_ref[...] = y.reshape(1, h, w, tn).astype(o_ref.dtype)


def _maxpool_conv(x_nhwc, p):
    n, h, w, cin = x_nhwc.shape
    cp = p["w"].shape[1]
    tn = _LANES
    xp = jnp.pad(x_nhwc, ((0, 0), (1, 1), (1, 1), (0, 0)),
                 constant_values=-jnp.inf).astype(jnp.float32)
    grid = (n, cp // tn)
    out = pl.pallas_call(
        _maxpool3x3_conv1x1_kernel,
        out_shape=jax.ShapeDtypeStruct((n, h, w, cp), jnp.float32),
        grid_spec=pltpu.PrefetchScalarGridSpec(
            num_scalar_prefetch=0, grid=grid,
            in_specs=[
                pl.BlockSpec((1, h + 2, w + 2, cin), lambda b, j: (b, 0, 0, 0)),
                pl.BlockSpec((cin, tn), lambda b, j: (0, j)),
                pl.BlockSpec((1, tn), lambda b, j: (0, j)),
            ],
            out_specs=pl.BlockSpec((1, h, w, tn), lambda b, j: (b, 0, 0, j))),
        compiler_params=_cparams(),
        cost_estimate=_cost(2 * n * h * w * cin * cp + 6 * n * h * w * cin,
                            4 * xp.size + 2 * p["w"].size + 4 * n * h * w * cp),
    )(xp, p["w"], p["b"])
    return out[..., :p["cout"]]


# ----------------------------- parameter setup ------------------------------ #

def make_conv_bn_params(key, cin, cout, kh, kw, eps=1e-5):
    k1, k2, k3, k4, k5, k6 = jax.random.split(key, 6)
    fan_in = cin * kh * kw
    bound = 1.0 / float(fan_in) ** 0.5
    # PyTorch conv layout (Cout, Cin, kh, kw), default uniform init.
    w = jax.random.uniform(k1, (cout, cin, kh, kw), jnp.float32, -bound, bound)
    b = jax.random.uniform(k2, (cout,), jnp.float32, -bound, bound)
    gamma = jax.random.uniform(k3, (cout,), jnp.float32, 0.5, 1.5)
    beta = jax.random.normal(k4, (cout,), jnp.float32) * 0.1
    rmean = jax.random.normal(k5, (cout,), jnp.float32) * 0.1
    rvar = jax.random.uniform(k6, (cout,), jnp.float32, 0.5, 1.5)
    scale = gamma / jnp.sqrt(rvar + eps)
    # Fold BN (eval mode): w_eff in HWIO, b_eff per output channel.
    w_eff = jnp.transpose(w, (2, 3, 1, 0)) * scale
    b_eff = beta + scale * (b - rmean)
    return {"w_eff": w_eff, "b_eff": b_eff}


def make_inception_b_params(key, in_channels, out_channels):
    oc = out_channels
    keys = jax.random.split(key, 10)
    return {
        "branch1": [make_conv_bn_params(keys[0], in_channels, oc[0], 1, 1)],
        "branch2": [
            make_conv_bn_params(keys[1], in_channels, oc[1], 1, 1),
            make_conv_bn_params(keys[2], oc[1], oc[1], 1, 7),
            make_conv_bn_params(keys[3], oc[1], oc[2], 7, 1),
        ],
        "branch3": [
            make_conv_bn_params(keys[4], in_channels, oc[3], 1, 1),
            make_conv_bn_params(keys[5], oc[3], oc[3], 1, 7),
            make_conv_bn_params(keys[6], oc[3], oc[3], 7, 1),
            make_conv_bn_params(keys[7], oc[3], oc[3], 1, 7),
            make_conv_bn_params(keys[8], oc[3], oc[4], 7, 1),
        ],
        "branch4": [make_conv_bn_params(keys[9], in_channels, oc[5], 1, 1)],
    }


def _pad_cout(w2d, b):
    cout = w2d.shape[-1]
    cpad = _round_up(cout, _LANES)
    pad = [(0, 0)] * (w2d.ndim - 1) + [(0, cpad - cout)]
    return jnp.pad(w2d, pad), jnp.pad(b, (0, cpad - cout))


def build_kernel_params(ref_params):
    kp = {}

    # Fused 1x1 convs over the shared block input (branch1 + both reducers).
    ws, bs, splits = [], [], []
    for name in ("branch1", "branch2", "branch3"):
        p = ref_params[name][0]
        ws.append(p["w_eff"][0, 0])                        # (Cin, Cout)
        bs.append(p["b_eff"])
        splits.append(int(p["b_eff"].shape[0]))
    wf, bf = _pad_cout(jnp.concatenate(ws, -1), jnp.concatenate(bs, -1))
    kp["fused1x1"] = {"w": wf.astype(jnp.bfloat16),
                      "b": bf.reshape(1, -1).astype(jnp.float32),
                      "splits": splits}

    def pair(p17, p71):
        w1 = p17["w_eff"][0]                               # (7, Cin, Cmid)
        w2, b2 = _pad_cout(p71["w_eff"][:, 0], p71["b_eff"])  # (7, Cmid, Cpad)
        return {"w1": w1.astype(jnp.bfloat16),
                "b1": p17["b_eff"].reshape(1, -1).astype(jnp.float32),
                "w2": w2.astype(jnp.bfloat16),
                "b2": b2.reshape(1, -1).astype(jnp.float32),
                "cout": int(p71["b_eff"].shape[0])}

    kp["branch2_pair"] = pair(ref_params["branch2"][1], ref_params["branch2"][2])
    kp["branch3_pair1"] = pair(ref_params["branch3"][1], ref_params["branch3"][2])
    kp["branch3_pair2"] = pair(ref_params["branch3"][3], ref_params["branch3"][4])

    p4 = ref_params["branch4"][0]
    w4, b4 = _pad_cout(p4["w_eff"][0, 0], p4["b_eff"])
    kp["branch4"] = {"w": w4.astype(jnp.bfloat16),
                     "b": b4.reshape(1, -1).astype(jnp.float32),
                     "cout": int(p4["b_eff"].shape[0])}
    return kp


# ------------------------------ forward pass -------------------------------- #

def inception_block_b_forward(x_nchw, kp):
    x = jnp.transpose(x_nchw, (0, 2, 3, 1)).astype(jnp.float32)  # NCHW -> NHWC
    n, h, w, cin = x.shape

    # One lane-dense matmul for the three 1x1 convs that read x.
    f = kp["fused1x1"]
    y = _matmul_bias_relu(x.reshape(n * h * w, cin).astype(jnp.bfloat16),
                          f["w"], f["b"]).reshape(n, h, w, -1)
    c1, c2, c3 = f["splits"]
    b1 = y[..., :c1]
    r2 = y[..., c1:c1 + c2]
    r3 = y[..., c1 + c2:c1 + c2 + c3]

    # branch 2: fused 1x7 -> 7x1 pair.
    b2 = _conv_pair(r2, kp["branch2_pair"])

    # branch 3: two fused 1x7 -> 7x1 pairs.
    b3 = _conv_pair(_conv_pair(r3, kp["branch3_pair1"]), kp["branch3_pair2"])

    # branch 4: 3x3 maxpool fused with its 1x1 conv.
    b4 = _maxpool_conv(x, kp["branch4"])

    # TODO(synk): the final channel concat + NHWC->NCHW transpose stays in XLA;
    # writing each branch straight into its output channel slice would need
    # shared-output aliasing across separate pallas_calls.
    out = jnp.concatenate([b1, b2, b3, b4], axis=-1)
    return jnp.transpose(out, (0, 3, 1, 2))


# ---------------------------- pure-JAX reference ----------------------------- #
# Uses the same bf16 quantization points (bf16 inputs/weights, f32 accumulation)
# so the comparison isolates kernel correctness.

def _ref_conv_bn_relu(x_nhwc, p):
    kh, kw = p["w_eff"].shape[0], p["w_eff"].shape[1]
    ph, pw = (kh - 1) // 2, (kw - 1) // 2
    y = lax.conv_general_dilated(
        x_nhwc.astype(jnp.bfloat16), p["w_eff"].astype(jnp.bfloat16),
        window_strides=(1, 1), padding=((ph, ph), (pw, pw)),
        dimension_numbers=("NHWC", "HWIO", "NHWC"),
        preferred_element_type=jnp.float32)
    return jnp.maximum(y + p["b_eff"], 0.0)


def _ref_forward(x_nchw, params):
    x = jnp.transpose(x_nchw, (0, 2, 3, 1)).astype(jnp.float32)
    b1 = _ref_conv_bn_relu(x, params["branch1"][0])
    y = x
    for p in params["branch2"]:
        y = _ref_conv_bn_relu(y, p)
    b2 = y
    y = x
    for p in params["branch3"]:
        y = _ref_conv_bn_relu(y, p)
    b3 = y
    y = lax.reduce_window(x, -jnp.inf, lax.max, (1, 3, 3, 1), (1, 1, 1, 1),
                          ((0, 0), (1, 1), (1, 1), (0, 0)))
    b4 = _ref_conv_bn_relu(y, params["branch4"][0])
    out = jnp.concatenate([b1, b2, b3, b4], axis=-1)
    return jnp.transpose(out, (0, 3, 1, 2))


# ----------------------------------- main ------------------------------------ #

if __name__ == "__main__":
    key = jax.random.PRNGKey(0)
    k_x, k_p = jax.random.split(key)

    n, cin, h, w = 2, 4, 16, 16
    out_channels = [8, 6, 8, 6, 8, 8]      # -> output channels = 8 + 8 + 8 + 8

    x = jax.random.normal(k_x, (n, cin, h, w), jnp.float32)
    ref_params = make_inception_b_params(k_p, cin, out_channels)
    kparams = build_kernel_params(ref_params)

    fwd = jax.jit(functools.partial(inception_block_b_forward, kp=kparams))
    out = jax.block_until_ready(fwd(x))
    ref = jax.block_until_ready(_ref_forward(x, ref_params))

    exp_c = out_channels[0] + out_channels[2] + out_channels[4] + out_channels[5]
    assert out.shape == (n, exp_c, h, w), out.shape
    err = float(jnp.max(jnp.abs(out - ref)))
    assert jnp.allclose(out, ref, rtol=1e-3, atol=1e-3), f"max abs err {err}"
    print("KERNEL_OK")
</pallas_src>

<mosaic_0001>
module attributes {stable_mosaic.version = 11 : i64} {
  func.func @_matmul_bias_relu_kernel(%arg0: i32, %arg1: i32, %arg2: memref<512x4xbf16, #tpu.memory_space<vmem>>, %arg3: memref<4x128xbf16, #tpu.memory_space<vmem>>, %arg4: memref<1x128xf32, #tpu.memory_space<vmem>>, %arg5: memref<512x128xf32, #tpu.memory_space<vmem>>) attributes {dimension_semantics = [#tpu.dimension_semantics<parallel>, #tpu.dimension_semantics<parallel>], iteration_bounds = array<i64: 1, 1>, scalar_prefetch = 0 : i64, scratch_operands = 0 : i64, tpu.core_type = #tpu.core_type<tc>, window_params = [{transform_indices = @transform_0, window_bounds = array<i64: 512, 4>}, {transform_indices = @transform_1, window_bounds = array<i64: 4, 128>}, {transform_indices = @transform_2, window_bounds = array<i64: 1, 128>}, {transform_indices = @transform_3, window_bounds = array<i64: 512, 128>}]} {
    %c0 = arith.constant 0 : index
    %c0_0 = arith.constant 0 : index
    %0 = vector.load %arg2[%c0, %c0_0] : memref<512x4xbf16, #tpu.memory_space<vmem>>, vector<512x4xbf16>
    %c0_1 = arith.constant 0 : index
    %c0_2 = arith.constant 0 : index
    %1 = vector.load %arg3[%c0_1, %c0_2] : memref<4x128xbf16, #tpu.memory_space<vmem>>, vector<4x128xbf16>
    %cst = arith.constant dense<0.000000e+00> : vector<512x128xf32>
    %2 = tpu.matmul %0, %1, %cst {dimension_numbers = #tpu.dot_dimension_numbers<[1], [0], [0], [1], [0, 0, 1, 1], [], []>} : vector<512x4xbf16>, vector<4x128xbf16>, vector<512x128xf32> -> vector<512x128xf32>
    %c0_3 = arith.constant 0 : index
    %c0_4 = arith.constant 0 : index
    %3 = vector.load %arg4[%c0_3, %c0_4] : memref<1x128xf32, #tpu.memory_space<vmem>>, vector<1x128xf32>
    %4 = vector.broadcast %3 : vector<1x128xf32> to vector<512x128xf32>
    %5 = arith.addf %2, %4 : vector<512x128xf32>
    %cst_5 = arith.constant 0.000000e+00 : f32
    %6 = vector.broadcast %cst_5 : f32 to vector<512x128xf32>
    %7 = arith.maximumf %5, %6 : vector<512x128xf32>
    %c0_6 = arith.constant 0 : index
    %c0_7 = arith.constant 0 : index
    %8 = vector.load %arg5[%c0_6, %c0_7] : memref<512x128xf32, #tpu.memory_space<vmem>>, vector<512x128xf32>
    tpu.vector_store %arg5[%c0_6, %c0_7], %7 {strides = array<i32>} : memref<512x128xf32, #tpu.memory_space<vmem>>, vector<512x128xf32>,
    return
  }
  func.func @transform_0(%arg0: i32, %arg1: i32) -> (i32, i32) {
    %c0_i32 = arith.constant 0 : i32
    %c0_i32_0 = arith.constant 0 : i32
    return %arg0, %c0_i32 : i32, i32
  }
  func.func @transform_1(%arg0: i32, %arg1: i32) -> (i32, i32) {
    %c0_i32 = arith.constant 0 : i32
    %c0_i32_0 = arith.constant 0 : i32
    return %c0_i32, %arg1 : i32, i32
  }
  func.func @transform_2(%arg0: i32, %arg1: i32) -> (i32, i32) {
    %c0_i32 = arith.constant 0 : i32
    %c0_i32_0 = arith.constant 0 : i32
    return %c0_i32, %arg1 : i32, i32
  }
  func.func @transform_3(%arg0: i32, %arg1: i32) -> (i32, i32) {
    %c0_i32 = arith.constant 0 : i32
    return %arg0, %arg1 : i32, i32
  }
}

module attributes {stable_mosaic.version = 11 : i64} {
  func.func @_maxpool3x3_conv1x1_kernel(%arg0: i32, %arg1: i32, %arg2: memref<1x18x18x4xf32, #tpu.memory_space<vmem>>, %arg3: memref<4x128xbf16, #tpu.memory_space<vmem>>, %arg4: memref<1x128xf32, #tpu.memory_space<vmem>>, %arg5: memref<1x16x16x128xf32, #tpu.memory_space<vmem>>) attributes {dimension_semantics = [#tpu.dimension_semantics<parallel>, #tpu.dimension_semantics<parallel>], iteration_bounds = array<i64: 2, 1>, scalar_prefetch = 0 : i64, scratch_operands = 0 : i64, tpu.core_type = #tpu.core_type<tc>, window_params = [{transform_indices = @transform_0, window_bounds = array<i64: 1, 18, 18, 4>}, {transform_indices = @transform_1, window_bounds = array<i64: 4, 128>}, {transform_indices = @transform_2, window_bounds = array<i64: 1, 128>}, {transform_indices = @transform_3, window_bounds = array<i64: 1, 16, 16, 128>}]} {
    %c0 = arith.constant 0 : index
    %c0_0 = arith.constant 0 : index
    %c0_1 = arith.constant 0 : index
    %c0_2 = arith.constant 0 : index
    %0 = vector.load %arg2[%c0, %c0_0, %c0_1, %c0_2] : memref<1x18x18x4xf32, #tpu.memory_space<vmem>>, vector<1x18x18x4xf32>
    %1 = vector.shape_cast %0 : vector<1x18x18x4xf32> to vector<18x18x4xf32>
    %2 = vector.extract_strided_slice %1 {offsets = [0, 0, 0], sizes = [18, 16, 4], strides = [1, 1, 1]} : vector<18x18x4xf32> to vector<18x16x4xf32>
    %3 = vector.extract_strided_slice %1 {offsets = [0, 1, 0], sizes = [18, 16, 4], strides = [1, 1, 1]} : vector<18x18x4xf32> to vector<18x16x4xf32>
    %4 = arith.maximumf %2, %3 : vector<18x16x4xf32>
    %5 = vector.extract_strided_slice %1 {offsets = [0, 2, 0], sizes = [18, 16, 4], strides = [1, 1, 1]} : vector<18x18x4xf32> to vector<18x16x4xf32>
    %6 = arith.maximumf %4, %5 : vector<18x16x4xf32>
    %7 = vector.extract_strided_slice %6 {offsets = [0, 0, 0], sizes = [16, 16, 4], strides = [1, 1, 1]} : vector<18x16x4xf32> to vector<16x16x4xf32>
    %8 = vector.extract_strided_slice %6 {offsets = [1, 0, 0], sizes = [16, 16, 4], strides = [1, 1, 1]} : vector<18x16x4xf32> to vector<16x16x4xf32>
    %9 = arith.maximumf %7, %8 : vector<16x16x4xf32>
    %10 = vector.extract_strided_slice %6 {offsets = [2, 0, 0], sizes = [16, 16, 4], strides = [1, 1, 1]} : vector<18x16x4xf32> to vector<16x16x4xf32>
    %11 = arith.maximumf %9, %10 : vector<16x16x4xf32>
    %12 = vector.shape_cast %11 : vector<16x16x4xf32> to vector<256x4xf32>
    %13 = arith.truncf %12 : vector<256x4xf32> to vector<256x4xbf16>
    %c0_3 = arith.constant 0 : index
    %c0_4 = arith.constant 0 : index
    %14 = vector.load %arg3[%c0_3, %c0_4] : memref<4x128xbf16, #tpu.memory_space<vmem>>, vector<4x128xbf16>
    %cst = arith.constant dense<0.000000e+00> : vector<256x128xf32>
    %15 = tpu.matmul %13, %14, %cst {dimension_numbers = #tpu.dot_dimension_numbers<[1], [0], [0], [1], [0, 0, 1, 1], [], []>} : vector<256x4xbf16>, vector<4x128xbf16>, vector<256x128xf32> -> vector<256x128xf32>
    %c0_5 = arith.constant 0 : index
    %c0_6 = arith.constant 0 : index
    %16 = vector.load %arg4[%c0_5, %c0_6] : memref<1x128xf32, #tpu.memory_space<vmem>>, vector<1x128xf32>
    %17 = vector.broadcast %16 : vector<1x128xf32> to vector<256x128xf32>
    %18 = arith.addf %15, %17 : vector<256x128xf32>
    %cst_7 = arith.constant 0.000000e+00 : f32
    %19 = vector.broadcast %cst_7 : f32 to vector<256x128xf32>
    %20 = arith.maximumf %18, %19 : vector<256x128xf32>
    %21 = vector.shape_cast %20 : vector<256x128xf32> to vector<1x16x16x128xf32>
    %c0_8 = arith.constant 0 : index
    %c0_9 = arith.constant 0 : index
    %c0_10 = arith.constant 0 : index
    %c0_11 = arith.constant 0 : index
    %22 = vector.load %arg5[%c0_8, %c0_9, %c0_10, %c0_11] : memref<1x16x16x128xf32, #tpu.memory_space<vmem>>, vector<1x16x16x128xf32>
    tpu.vector_store %arg5[%c0_8, %c0_9, %c0_10, %c0_11], %21 {strides = array<i32>} : memref<1x16x16x128xf32, #tpu.memory_space<vmem>>, vector<1x16x16x128xf32>,
    return
  }
  func.func @transform_0(%arg0: i32, %arg1: i32) -> (i32, i32, i32, i32) {
    %c0_i32 = arith.constant 0 : i32
    %c0_i32_0 = arith.constant 0 : i32
    %c0_i32_1 = arith.constant 0 : i32
    %c0_i32_2 = arith.constant 0 : i32
    return %arg0, %c0_i32, %c0_i32_0, %c0_i32_1 : i32, i32, i32, i32
  }
  func.func @transform_1(%arg0: i32, %arg1: i32) -> (i32, i32) {
    %c0_i32 = arith.constant 0 : i32
    %c0_i32_0 = arith.constant 0 : i32
    return %c0_i32, %arg1 : i32, i32
  }
  func.func @transform_2(%arg0: i32, %arg1: i32) -> (i32, i32) {
    %c0_i32 = arith.constant 0 : i32
    %c0_i32_0 = arith.constant 0 : i32
    return %c0_i32, %arg1 : i32, i32
  }
  func.func @transform_3(%arg0: i32, %arg1: i32) -> (i32, i32, i32, i32) {
    %c0_i32 = arith.constant 0 : i32
    %c0_i32_0 = arith.constant 0 : i32
    %c0_i32_1 = arith.constant 0 : i32
    return %arg0, %c0_i32, %c0_i32_0, %arg1 : i32, i32, i32, i32
  }
}

module attributes {stable_mosaic.version = 11 : i64} {
  func.func @_conv_1x7_7x1_kernel(%arg0: i32, %arg1: i32, %arg2: memref<1x16x22x6xf32, #tpu.memory_space<vmem>>, %arg3: memref<7x6x6xbf16, #tpu.memory_space<vmem>>, %arg4: memref<1x6xf32, #tpu.memory_space<vmem>>, %arg5: memref<7x6x128xbf16, #tpu.memory_space<vmem>>, %arg6: memref<1x128xf32, #tpu.memory_space<vmem>>, %arg7: memref<1x16x16x128xf32, #tpu.memory_space<vmem>>, %arg8: memref<22x16x6xbf16, #tpu.memory_space<vmem>>) attributes {dimension_semantics = [#tpu.dimension_semantics<parallel>, #tpu.dimension_semantics<parallel>], iteration_bounds = array<i64: 2, 1>, scalar_prefetch = 0 : i64, scratch_operands = 1 : i64, tpu.core_type = #tpu.core_type<tc>, window_params = [{transform_indices = @transform_0, window_bounds = array<i64: 1, 16, 22, 6>}, {pipeline_mode = #tpu.pipeline_mode<synchronous>, transform_indices = @transform_1, window_bounds = array<i64: 7, 6, 6>}, {pipeline_mode = #tpu.pipeline_mode<synchronous>, transform_indices = @transform_2, window_bounds = array<i64: 1, 6>}, {transform_indices = @transform_3, window_bounds = array<i64: 7, 6, 128>}, {transform_indices = @transform_4, window_bounds = array<i64: 1, 128>}, {transform_indices = @transform_5, window_bounds = array<i64: 1, 16, 16, 128>}]} {
    %c0 = arith.constant 0 : index
    %c0_0 = arith.constant 0 : index
    %c0_1 = arith.constant 0 : index
    %c0_2 = arith.constant 0 : index
    %0 = vector.load %arg2[%c0, %c0_0, %c0_1, %c0_2] : memref<1x16x22x6xf32, #tpu.memory_space<vmem>>, vector<1x16x22x6xf32>
    %1 = vector.shape_cast %0 : vector<1x16x22x6xf32> to vector<16x22x6xf32>
    %cst = arith.constant 0.000000e+00 : f32
    %2 = vector.broadcast %cst : f32 to vector<256x6xf32>
    %3 = vector.extract_strided_slice %1 {offsets = [0, 0, 0], sizes = [16, 16, 6], strides = [1, 1, 1]} : vector<16x22x6xf32> to vector<16x16x6xf32>
    %4 = vector.shape_cast %3 : vector<16x16x6xf32> to vector<256x6xf32>
    %5 = arith.truncf %4 : vector<256x6xf32> to vector<256x6xbf16>
    %c0_3 = arith.constant 0 : index
    %c0_4 = arith.constant 0 : index
    %c0_5 = arith.constant 0 : index
    %6 = vector.load %arg3[%c0_3, %c0_4, %c0_5] : memref<7x6x6xbf16, #tpu.memory_space<vmem>>, vector<1x6x6xbf16>
    %7 = vector.shape_cast %6 : vector<1x6x6xbf16> to vector<6x6xbf16>
    %cst_6 = arith.constant dense<0.000000e+00> : vector<256x6xf32>
    %8 = tpu.matmul %5, %7, %cst_6 {dimension_numbers = #tpu.dot_dimension_numbers<[1], [0], [0], [1], [0, 0, 1, 1], [], []>} : vector<256x6xbf16>, vector<6x6xbf16>, vector<256x6xf32> -> vector<256x6xf32>
    %9 = arith.addf %2, %8 : vector<256x6xf32>
    %10 = vector.extract_strided_slice %1 {offsets = [0, 1, 0], sizes = [16, 16, 6], strides = [1, 1, 1]} : vector<16x22x6xf32> to vector<16x16x6xf32>
    %11 = vector.shape_cast %10 : vector<16x16x6xf32> to vector<256x6xf32>
    %12 = arith.truncf %11 : vector<256x6xf32> to vector<256x6xbf16>
    %c1 = arith.constant 1 : index
    %c0_7 = arith.constant 0 : index
    %c0_8 = arith.constant 0 : index
    %13 = vector.load %arg3[%c1, %c0_7, %c0_8] : memref<7x6x6xbf16, #tpu.memory_space<vmem>>, vector<1x6x6xbf16>
    %14 = vector.shape_cast %13 : vector<1x6x6xbf16> to vector<6x6xbf16>
    %cst_9 = arith.constant dense<0.000000e+00> : vector<256x6xf32>
    %15 = tpu.matmul %12, %14, %cst_9 {dimension_numbers = #tpu.dot_dimension_numbers<[1], [0], [0], [1], [0, 0, 1, 1], [], []>} : vector<256x6xbf16>, vector<6x6xbf16>, vector<256x6xf32> -> vector<256x6xf32>
    %16 = arith.addf %9, %15 : vector<256x6xf32>
    %17 = vector.extract_strided_slice %1 {offsets = [0, 2, 0], sizes = [16, 16, 6], strides = [1, 1, 1]} : vector<16x22x6xf32> to vector<16x16x6xf32>
    %18 = vector.shape_cast %17 : vector<16x16x6xf32> to vector<256x6xf32>
    %19 = arith.truncf %18 : vector<256x6xf32> to vector<256x6xbf16>
    %c2 = arith.constant 2 : index
    %c0_10 = arith.constant 0 : index
    %c0_11 = arith.constant 0 : index
    %20 = vector.load %arg3[%c2, %c0_10, %c0_11] : memref<7x6x6xbf16, #tpu.memory_space<vmem>>, vector<1x6x6xbf16>
    %21 = vector.shape_cast %20 : vector<1x6x6xbf16> to vector<6x6xbf16>
    %cst_12 = arith.constant dense<0.000000e+00> : vector<256x6xf32>
    %22 = tpu.matmul %19, %21, %cst_12 {dimension_numbers = #tpu.dot_dimension_numbers<[1], [0], [0], [1], [0, 0, 1, 1], [], []>} : vector<256x6xbf16>, vector<6x6xbf16>, vector<256x6xf32> -> vector<256x6xf32>
    %23 = arith.addf %16, %22 : vector<256x6xf32>
    %24 = vector.extract_strided_slice %1 {offsets = [0, 3, 0], sizes = [16, 16, 6], strides = [1, 1, 1]} : vector<16x22x6xf32> to vector<16x16x6xf32>
    %25 = vector.shape_cast %24 : vector<16x16x6xf32> to vector<256x6xf32>
    %26 = arith.truncf %25 : vector<256x6xf32> to vector<256x6xbf16>
    %c3 = arith.constant 3 : index
    %c0_13 = arith.constant 0 : index
    %c0_14 = arith.constant 0 : index
    %27 = vector.load %arg3[%c3, %c0_13, %c0_14] : memref<7x6x6xbf16, #tpu.memory_space<vmem>>, vector<1x6x6xbf16>
    %28 = vector.shape_cast %27 : vector<1x6x6xbf16> to vector<6x6xbf16>
    %cst_15 = arith.constant dense<0.000000e+00> : vector<256x6xf32>
    %29 = tpu.matmul %26, %28, %cst_15 {dimension_numbers = #tpu.dot_dimension_numbers<[1], [0], [0], [1], [0, 0, 1, 1], [], []>} : vector<256x6xbf16>, vector<6x6xbf16>, vector<256x6xf32> -> vector<256x6xf32>
    %30 = arith.addf %23, %29 : vector<256x6xf32>
    %31 = vector.extract_strided_slice %1 {offsets = [0, 4, 0], sizes = [16, 16, 6], strides = [1, 1, 1]} : vector<16x22x6xf32> to vector<16x16x6xf32>
    %32 = vector.shape_cast %31 : vector<16x16x6xf32> to vector<256x6xf32>
    %33 = arith.truncf %32 : vector<256x6xf32> to vector<256x6xbf16>
    %c4 = arith.constant 4 : index
    %c0_16 = arith.constant 0 : index
    %c0_17 = arith.constant 0 : index
    %34 = vector.load %arg3[%c4, %c0_16, %c0_17] : memref<7x6x6xbf16, #tpu.memory_space<vmem>>, vector<1x6x6xbf16>
    %35 = vector.shape_cast %34 : vector<1x6x6xbf16> to vector<6x6xbf16>
    %cst_18 = arith.constant dense<0.000000e+00> : vector<256x6xf32>
    %36 = tpu.matmul %33, %35, %cst_18 {dimension_numbers = #tpu.dot_dimension_numbers<[1], [0], [0], [1], [0, 0, 1, 1], [], []>} : vector<256x6xbf16>, vector<6x6xbf16>, vector<256x6xf32> -> vector<256x6xf32>
    %37 = arith.addf %30, %36 : vector<256x6xf32>
    %38 = vector.extract_strided_slice %1 {offsets = [0, 5, 0], sizes = [16, 16, 6], strides = [1, 1, 1]} : vector<16x22x6xf32> to vector<16x16x6xf32>
    %39 = vector.shape_cast %38 : vector<16x16x6xf32> to vector<256x6xf32>
    %40 = arith.truncf %39 : vector<256x6xf32> to vector<256x6xbf16>
    %c5 = arith.constant 5 : index
    %c0_19 = arith.constant 0 : index
    %c0_20 = arith.constant 0 : index
    %41 = vector.load %arg3[%c5, %c0_19, %c0_20] : memref<7x6x6xbf16, #tpu.memory_space<vmem>>, vector<1x6x6xbf16>
    %42 = vector.shape_cast %41 : vector<1x6x6xbf16> to vector<6x6xbf16>
    %cst_21 = arith.constant dense<0.000000e+00> : vector<256x6xf32>
    %43 = tpu.matmul %40, %42, %cst_21 {dimension_numbers = #tpu.dot_dimension_numbers<[1], [0], [0], [1], [0, 0, 1, 1], [], []>} : vector<256x6xbf16>, vector<6x6xbf16>, vector<256x6xf32> -> vector<256x6xf32>
    %44 = arith.addf %37, %43 : vector<256x6xf32>
    %45 = vector.extract_strided_slice %1 {offsets = [0, 6, 0], sizes = [16, 16, 6], strides = [1, 1, 1]} : vector<16x22x6xf32> to vector<16x16x6xf32>
    %46 = vector.shape_cast %45 : vector<16x16x6xf32> to vector<256x6xf32>
    %47 = arith.truncf %46 : vector<256x6xf32> to vector<256x6xbf16>
    %c6 = arith.constant 6 : index
    %c0_22 = arith.constant 0 : index
    %c0_23 = arith.constant 0 : index
    %48 = vector.load %arg3[%c6, %c0_22, %c0_23] : memref<7x6x6xbf16, #tpu.memory_space<vmem>>, vector<1x6x6xbf16>
    %49 = vector.shape_cast %48 : vector<1x6x6xbf16> to vector<6x6xbf16>
    %cst_24 = arith.constant dense<0.000000e+00> : vector<256x6xf32>
    %50 = tpu.matmul %47, %49, %cst_24 {dimension_numbers = #tpu.dot_dimension_numbers<[1], [0], [0], [1], [0, 0, 1, 1], [], []>} : vector<256x6xbf16>, vector<6x6xbf16>, vector<256x6xf32> -> vector<256x6xf32>
    %51 = arith.addf %44, %50 : vector<256x6xf32>
    %c0_25 = arith.constant 0 : index
    %c0_26 = arith.constant 0 : index
    %52 = vector.load %arg4[%c0_25, %c0_26] : memref<1x6xf32, #tpu.memory_space<vmem>>, vector<1x6xf32>
    %53 = vector.broadcast %52 : vector<1x6xf32> to vector<256x6xf32>
    %54 = arith.addf %51, %53 : vector<256x6xf32>
    %cst_27 = arith.constant 0.000000e+00 : f32
    %55 = vector.broadcast %cst_27 : f32 to vector<256x6xf32>
    %56 = arith.maximumf %54, %55 : vector<256x6xf32>
    %57 = vector.shape_cast %56 : vector<256x6xf32> to vector<16x16x6xf32>
    %cst_28 = arith.constant 0.000000e+00 : bf16
    %58 = vector.broadcast %cst_28 : bf16 to vector<22x16x6xbf16>
    %c0_29 = arith.constant 0 : index
    %c0_30 = arith.constant 0 : index
    %c0_31 = arith.constant 0 : index
    %59 = vector.load %arg8[%c0_29, %c0_30, %c0_31] : memref<22x16x6xbf16, #tpu.memory_space<vmem>>, vector<22x16x6xbf16>
    tpu.vector_store %arg8[%c0_29, %c0_30, %c0_31], %58 {strides = array<i32>} : memref<22x16x6xbf16, #tpu.memory_space<vmem>>, vector<22x16x6xbf16>,
    %60 = arith.truncf %57 : vector<16x16x6xf32> to vector<16x16x6xbf16>
    %c3_32 = arith.constant 3 : index
    %c0_33 = arith.constant 0 : index
    %c0_34 = arith.constant 0 : index
    %61 = vector.load %arg8[%c3_32, %c0_33, %c0_34] : memref<22x16x6xbf16, #tpu.memory_space<vmem>>, vector<16x16x6xbf16>
    tpu.vector_store %arg8[%c3_32, %c0_33, %c0_34], %60 {strides = array<i32>} : memref<22x16x6xbf16, #tpu.memory_space<vmem>>, vector<16x16x6xbf16>,
    %c0_35 = arith.constant 0 : index
    %c0_36 = arith.constant 0 : index
    %c0_37 = arith.constant 0 : index
    %62 = vector.load %arg8[%c0_35, %c0_36, %c0_37] : memref<22x16x6xbf16, #tpu.memory_space<vmem>>, vector<22x16x6xbf16>
    %cst_38 = arith.constant 0.000000e+00 : f32
    %63 = vector.broadcast %cst_38 : f32 to vector<256x128xf32>
    %64 = vector.extract_strided_slice %62 {offsets = [0, 0, 0], sizes = [16, 16, 6], strides = [1, 1, 1]} : vector<22x16x6xbf16> to vector<16x16x6xbf16>
    %65 = vector.shape_cast %64 : vector<16x16x6xbf16> to vector<256x6xbf16>
    %c0_39 = arith.constant 0 : index
    %c0_40 = arith.constant 0 : index
    %c0_41 = arith.constant 0 : index
    %66 = vector.load %arg5[%c0_39, %c0_40, %c0_41] : memref<7x6x128xbf16, #tpu.memory_space<vmem>>, vector<1x6x128xbf16>
    %67 = vector.shape_cast %66 : vector<1x6x128xbf16> to vector<6x128xbf16>
    %cst_42 = arith.constant dense<0.000000e+00> : vector<256x128xf32>
    %68 = tpu.matmul %65, %67, %cst_42 {dimension_numbers = #tpu.dot_dimension_numbers<[1], [0], [0], [1], [0, 0, 1, 1], [], []>} : vector<256x6xbf16>, vector<6x128xbf16>, vector<256x128xf32> -> vector<256x128xf32>
    %69 = arith.addf %63, %68 : vector<256x128xf32>
    %70 = vector.extract_strided_slice %62 {offsets = [1, 0, 0], sizes = [16, 16, 6], strides = [1, 1, 1]} : vector<22x16x6xbf16> to vector<16x16x6xbf16>
    %71 = vector.shape_cast %70 : vector<16x16x6xbf16> to vector<256x6xbf16>
    %c1_43 = arith.constant 1 : index
    %c0_44 = arith.constant 0 : index
    %c0_45 = arith.constant 0 : index
    %72 = vector.load %arg5[%c1_43, %c0_44, %c0_45] : memref<7x6x128xbf16, #tpu.memory_space<vmem>>, vector<1x6x128xbf16>
    %73 = vector.shape_cast %72 : vector<1x6x128xbf16> to vector<6x128xbf16>
    %cst_46 = arith.constant dense<0.000000e+00> : vector<256x128xf32>
    %74 = tpu.matmul %71, %73, %cst_46 {dimension_numbers = #tpu.dot_dimension_numbers<[1], [0], [0], [1], [0, 0, 1, 1], [], []>} : vector<256x6xbf16>, vector<6x128xbf16>, vector<256x128xf32> -> vector<256x128xf32>
    %75 = arith.addf %69, %74 : vector<256x128xf32>
    %76 = vector.extract_strided_slice %62 {offsets = [2, 0, 0], sizes = [16, 16, 6], strides = [1, 1, 1]} : vector<22x16x6xbf16> to vector<16x16x6xbf16>
    %77 = vector.shape_cast %76 : vector<16x16x6xbf16> to vector<256x6xbf16>
    %c2_47 = arith.constant 2 : index
    %c0_48 = arith.constant 0 : index
    %c0_49 = arith.constant 0 : index
    %78 = vector.load %arg5[%c2_47, %c0_48, %c0_49] : memref<7x6x128xbf16, #tpu.memory_space<vmem>>, vector<1x6x128xbf16>
    %79 = vector.shape_cast %78 : vector<1x6x128xbf16> to vector<6x128xbf16>
    %cst_50 = arith.constant dense<0.000000e+00> : vector<256x128xf32>
    %80 = tpu.matmul %77, %79, %cst_50 {dimension_numbers = #tpu.dot_dimension_numbers<[1], [0], [0], [1], [0, 0, 1, 1], [], []>} : vector<256x6xbf16>, vector<6x128xbf16>, vector<256x128xf32> -> vector<256x128xf32>
    %81 = arith.addf %75, %80 : vector<256x128xf32>
    %82 = vector.extract_strided_slice %62 {offsets = [3, 0, 0], sizes = [16, 16, 6], strides = [1, 1, 1]} : vector<22x16x6xbf16> to vector<16x16x6xbf16>
    %83 = vector.shape_cast %82 : vector<16x16x6xbf16> to vector<256x6xbf16>
    %c3_51 = arith.constant 3 : index
    %c0_52 = arith.constant 0 : index
    %c0_53 = arith.constant 0 : index
    %84 = vector.load %arg5[%c3_51, %c0_52, %c0_53] : memref<7x6x128xbf16, #tpu.memory_space<vmem>>, vector<1x6x128xbf16>
    %85 = vector.shape_cast %84 : vector<1x6x128xbf16> to vector<6x128xbf16>
    %cst_54 = arith.constant dense<0.000000e+00> : vector<256x128xf32>
    %86 = tpu.matmul %83, %85, %cst_54 {dimension_numbers = #tpu.dot_dimension_numbers<[1], [0], [0], [1], [0, 0, 1, 1], [], []>} : vector<256x6xbf16>, vector<6x128xbf16>, vector<256x128xf32> -> vector<256x128xf32>
    %87 = arith.addf %81, %86 : vector<256x128xf32>
    %88 = vector.extract_strided_slice %62 {offsets = [4, 0, 0], sizes = [16, 16, 6], strides = [1, 1, 1]} : vector<22x16x6xbf16> to vector<16x16x6xbf16>
    %89 = vector.shape_cast %88 : vector<16x16x6xbf16> to vector<256x6xbf16>
    %c4_55 = arith.constant 4 : index
    %c0_56 = arith.constant 0 : index
    %c0_57 = arith.constant 0 : index
    %90 = vector.load %arg5[%c4_55, %c0_56, %c0_57] : memref<7x6x128xbf16, #tpu.memory_space<vmem>>, vector<1x6x128xbf16>
    %91 = vector.shape_cast %90 : vector<1x6x128xbf16> to vector<6x128xbf16>
    %cst_58 = arith.constant dense<0.000000e+00> : vector<256x128xf32>
    %92 = tpu.matmul %89, %91, %cst_58 {dimension_numbers = #tpu.dot_dimension_numbers<[1], [0], [0], [1], [0, 0, 1, 1], [], []>} : vector<256x6xbf16>, vector<6x128xbf16>, vector<256x128xf32> -> vector<256x128xf32>
    %93 = arith.addf %87, %92 : vector<256x128xf32>
    %94 = vector.extract_strided_slice %62 {offsets = [5, 0, 0], sizes = [16, 16, 6], strides = [1, 1, 1]} : vector<22x16x6xbf16> to vector<16x16x6xbf16>
    %95 = vector.shape_cast %94 : vector<16x16x6xbf16> to vector<256x6xbf16>
    %c5_59 = arith.constant 5 : index
    %c0_60 = arith.constant 0 : index
    %c0_61 = arith.constant 0 : index
    %96 = vector.load %arg5[%c5_59, %c0_60, %c0_61] : memref<7x6x128xbf16, #tpu.memory_space<vmem>>, vector<1x6x128xbf16>
    %97 = vector.shape_cast %96 : vector<1x6x128xbf16> to vector<6x128xbf16>
    %cst_62 = arith.constant dense<0.000000e+00> : vector<256x128xf32>
    %98 = tpu.matmul %95, %97, %cst_62 {dimension_numbers = #tpu.dot_dimension_numbers<[1], [0], [0], [1], [0, 0, 1, 1], [], []>} : vector<256x6xbf16>, vector<6x128xbf16>, vector<256x128xf32> -> vector<256x128xf32>
    %99 = arith.addf %93, %98 : vector<256x128xf32>
    %100 = vector.extract_strided_slice %62 {offsets = [6, 0, 0], sizes = [16, 16, 6], strides = [1, 1, 1]} : vector<22x16x6xbf16> to vector<16x16x6xbf16>
    %101 = vector.shape_cast %100 : vector<16x16x6xbf16> to vector<256x6xbf16>
    %c6_63 = arith.constant 6 : index
    %c0_64 = arith.constant 0 : index
    %c0_65 = arith.constant 0 : index
    %102 = vector.load %arg5[%c6_63, %c0_64, %c0_65] : memref<7x6x128xbf16, #tpu.memory_space<vmem>>, vector<1x6x128xbf16>
    %103 = vector.shape_cast %102 : vector<1x6x128xbf16> to vector<6x128xbf16>
    %cst_66 = arith.constant dense<0.000000e+00> : vector<256x128xf32>
    %104 = tpu.matmul %101, %103, %cst_66 {dimension_numbers = #tpu.dot_dimension_numbers<[1], [0], [0], [1], [0, 0, 1, 1], [], []>} : vector<256x6xbf16>, vector<6x128xbf16>, vector<256x128xf32> -> vector<256x128xf32>
    %105 = arith.addf %99, %104 : vector<256x128xf32>
    %c0_67 = arith.constant 0 : index
    %c0_68 = arith.constant 0 : index
    %106 = vector.load %arg6[%c0_67, %c0_68] : memref<1x128xf32, #tpu.memory_space<vmem>>, vector<1x128xf32>
    %107 = vector.broadcast %106 : vector<1x128xf32> to vector<256x128xf32>
    %108 = arith.addf %105, %107 : vector<256x128xf32>
    %cst_69 = arith.constant 0.000000e+00 : f32
    %109 = vector.broadcast %cst_69 : f32 to vector<256x128xf32>
    %110 = arith.maximumf %108, %109 : vector<256x128xf32>
    %111 = vector.shape_cast %110 : vector<256x128xf32> to vector<1x16x16x128xf32>
    %c0_70 = arith.constant 0 : index
    %c0_71 = arith.constant 0 : index
    %c0_72 = arith.constant 0 : index
    %c0_73 = arith.constant 0 : index
    %112 = vector.load %arg7[%c0_70, %c0_71, %c0_72, %c0_73] : memref<1x16x16x128xf32, #tpu.memory_space<vmem>>, vector<1x16x16x128xf32>
    tpu.vector_store %arg7[%c0_70, %c0_71, %c0_72, %c0_73], %111 {strides = array<i32>} : memref<1x16x16x128xf32, #tpu.memory_space<vmem>>, vector<1x16x16x128xf32>,
    return
  }
  func.func @transform_0(%arg0: i32, %arg1: i32) -> (i32, i32, i32, i32) {
    %c0_i32 = arith.constant 0 : i32
    %c0_i32_0 = arith.constant 0 : i32
    %c0_i32_1 = arith.constant 0 : i32
    %c0_i32_2 = arith.constant 0 : i32
    return %arg0, %c0_i32, %c0_i32_0, %c0_i32_1 : i32, i32, i32, i32
  }
  func.func @transform_1(%arg0: i32, %arg1: i32) -> (i32, i32, i32) {
    %c0_i32 = arith.constant 0 : i32
    %c0_i32_0 = arith.constant 0 : i32
    %c0_i32_1 = arith.constant 0 : i32
    %c0_i32_2 = arith.constant 0 : i32
    return %c0_i32, %c0_i32_0, %c0_i32_1 : i32, i32, i32
  }
  func.func @transform_2(%arg0: i32, %arg1: i32) -> (i32, i32) {
    %c0_i32 = arith.constant 0 : i32
    %c0_i32_0 = arith.constant 0 : i32
    %c0_i32_1 = arith.constant 0 : i32
    return %c0_i32, %c0_i32_0 : i32, i32
  }
  func.func @transform_3(%arg0: i32, %arg1: i32) -> (i32, i32, i32) {
    %c0_i32 = arith.constant 0 : i32
    %c0_i32_0 = arith.constant 0 : i32
    %c0_i32_1 = arith.constant 0 : i32
    return %c0_i32, %c0_i32_0, %arg1 : i32, i32, i32
  }
  func.func @transform_4(%arg0: i32, %arg1: i32) -> (i32, i32) {
    %c0_i32 = arith.constant 0 : i32
    %c0_i32_0 = arith.constant 0 : i32
    return %c0_i32, %arg1 : i32, i32
  }
  func.func @transform_5(%arg0: i32, %arg1: i32) -> (i32, i32, i32, i32) {
    %c0_i32 = arith.constant 0 : i32
    %c0_i32_0 = arith.constant 0 : i32
    %c0_i32_1 = arith.constant 0 : i32
    return %arg0, %c0_i32, %c0_i32_0, %arg1 : i32, i32, i32, i32
  }
}

</mosaic_0001>

<bundles_post_ra>
// kernel: inception_block_b_forward.5
= control target key start
LH: loop header
LB: loop body
LE: loop exit
PB: predicated region body
PF: predicated region fallthrough
CT: control target
= control target key end

     0   :  { %vm341_vm0 = vcmask 1041408   ;;  %vm244_vm1 = vcmask 31744   ;;  %s1254_s1 = inlined_call_operand.vmem [shape: bf16[4,128], index: 1, kind: input, shape index: {}]   ;;  %s1255_s0 = inlined_call_operand.vmem [shape: bf16[512,4], index: 0, kind: input, shape index: {}]   ;;  %s1256_s2 = inlined_call_operand.vmem [shape: f32[1,128], index: 2, kind: input, shape index: {}]   ;;  %s1257_s3 = inlined_call_operand.vmem [shape: f32[512,128], index: 3, kind: output, shape index: {}]  }
   0x1   :  { %v79_v0 = vld [vmem:[%s1254_s1] sm:$0x3]  ;;  %v807_v6 = vld [vmem:[%s1255_s0 + $0x8] sm:$0xff]  ;;  %v808_v10 = vld [vmem:[%s1255_s0 + $0x10] sm:$0xff] }
   0x2   :  { %v343_v1 = vsel %vm341_vm0, %v79_v0, 0  ;;  %v806_v2 = vld [vmem:[%s1255_s0] sm:$0xff]  ;;  %v815_v7 = vld [vmem:[%s1255_s0 + $0x48] sm:$0xff]  ;;  %v816_v11 = vld [vmem:[%s1255_s0 + $0x50] sm:$0xff] }
   0x3   :  { %v814_v3 = vld [vmem:[%s1255_s0 + $0x40] sm:$0xff]  ;;  %352 = vmatpush.bf16.msra.mxu0 %v343_v1  ;;  %838 = vmatpush.bf16.msra.mxu1 %v343_v1  ;;  %v823_v8 = vld [vmem:[%s1255_s0 + $0x88] sm:$0xff]  ;;  %v824_v12 = vld [vmem:[%s1255_s0 + $0x90] sm:$0xff] }
   0x4   :  { %v822_v4 = vld [vmem:[%s1255_s0 + $0x80] sm:$0xff]  ;;  %839 = vmatpush.bf16.msra.mxu2 %v343_v1  ;;  %840 = vmatpush.bf16.msra.mxu3 %v343_v1  ;;  %v831_v9 = vld [vmem:[%s1255_s0 + $0xc8] sm:$0xff]  ;;  %v832_v13 = vld [vmem:[%s1255_s0 + $0xd0] sm:$0xff] }
   0x5   :  { %v830_v5 = vld [vmem:[%s1255_s0 + $0xc0] sm:$0xff]  ;;  %v809_v14 = vld [vmem:[%s1255_s0 + $0x18] sm:$0xff]  ;;  %v811_v22 = vld [vmem:[%s1255_s0 + $0x28] sm:$0xff] }
   0x6   :  { %774 = vmatmul.msk.bf16.vlgmr.msra.gmra.mxu0 %vm244_vm1, %v806_v2  ;;  %782 = vmatmul.msk.bf16.vlgmr.msra.gmra.mxu1 %vm244_vm1, %v814_v3  ;;  %v817_v15 = vld [vmem:[%s1255_s0 + $0x58] sm:$0xff]  ;;  %v810_v18 = vld [vmem:[%s1255_s0 + $0x20] sm:$0xff]  ;;  %v819_v23 = vld [vmem:[%s1255_s0 + $0x68] sm:$0xff] }
   0x7   :  { %790 = vmatmul.msk.bf16.vlgmr.msra.gmra.mxu2 %vm244_vm1, %v822_v4  ;;  %798 = vmatmul.msk.bf16.vlgmr.msra.gmra.mxu3 %vm244_vm1, %v830_v5  ;;  %v825_v16 = vld [vmem:[%s1255_s0 + $0x98] sm:$0xff]  ;;  %v818_v19 = vld [vmem:[%s1255_s0 + $0x60] sm:$0xff]  ;;  %v827_v24 = vld [vmem:[%s1255_s0 + $0xa8] sm:$0xff] }
   0x8   :  { %v833_v17 = vld [vmem:[%s1255_s0 + $0xd8] sm:$0xff]  ;;  %v826_v20 = vld [vmem:[%s1255_s0 + $0xa0] sm:$0xff]  ;;  %v835_v25 = vld [vmem:[%s1255_s0 + $0xe8] sm:$0xff] }
   0x9   :  { %v834_v21 = vld [vmem:[%s1255_s0 + $0xe0] sm:$0xff]  ;;  %v812_v26 = vld [vmem:[%s1255_s0 + $0x30] sm:$0xff]  ;;  %v813_v30 = vld [vmem:[%s1255_s0 + $0x38] sm:$0xff] }
   0xa   :  { %v820_v27 = vld [vmem:[%s1255_s0 + $0x70] sm:$0xff]  ;;  %v821_v31 = vld [vmem:[%s1255_s0 + $0x78] sm:$0xff]  ;;  %v996_v34 = vld [vmem:[%s1256_s2] ss:$0 sm:$0xff] }
   0xb   :  { %v828_v28 = vld [vmem:[%s1255_s0 + $0xb0] sm:$0xff]  ;;  %v829_v32 = vld [vmem:[%s1255_s0 + $0xb8] sm:$0xff] }
   0xc   :  { %v836_v29 = vld [vmem:[%s1255_s0 + $0xf0] sm:$0xff]  ;;  %v837_v33 = vld [vmem:[%s1255_s0 + $0xf8] sm:$0xff] }
  0x16   :  { %775 = vmatmul.msk.bf16.gmra.mxu0 %vm244_vm1, %v807_v6  ;;  %783 = vmatmul.msk.bf16.gmra.mxu1 %vm244_vm1, %v815_v7 }
  0x17   :  { %791 = vmatmul.msk.bf16.gmra.mxu2 %vm244_vm1, %v823_v8  ;;  %799 = vmatmul.msk.bf16.gmra.mxu3 %vm244_vm1, %v831_v9 }
  0x26   :  { %776 = vmatmul.msk.bf16.gmra.mxu0 %vm244_vm1, %v808_v10  ;;  %784 = vmatmul.msk.bf16.gmra.mxu1 %vm244_vm1, %v816_v11 }
  0x27   :  { %792 = vmatmul.msk.bf16.gmra.mxu2 %vm244_vm1, %v824_v12  ;;  %800 = vmatmul.msk.bf16.gmra.mxu3 %vm244_vm1, %v832_v13 }
  0x36   :  { %777 = vmatmul.msk.bf16.gmra.mxu0 %vm244_vm1, %v809_v14  ;;  %785 = vmatmul.msk.bf16.gmra.mxu1 %vm244_vm1, %v817_v15 }
  0x37   :  { %793 = vmatmul.msk.bf16.gmra.mxu2 %vm244_vm1, %v825_v16  ;;  %801 = vmatmul.msk.bf16.gmra.mxu3 %vm244_vm1, %v833_v17 }
  0x46   :  { %778 = vmatmul.msk.bf16.gmra.mxu0 %vm244_vm1, %v810_v18  ;;  %786 = vmatmul.msk.bf16.gmra.mxu1 %vm244_vm1, %v818_v19 }
  0x47   :  { %794 = vmatmul.msk.bf16.gmra.mxu2 %vm244_vm1, %v826_v20  ;;  %802 = vmatmul.msk.bf16.gmra.mxu3 %vm244_vm1, %v834_v21 }
  0x56   :  { %779 = vmatmul.msk.bf16.gmra.mxu0 %vm244_vm1, %v811_v22  ;;  %787 = vmatmul.msk.bf16.gmra.mxu1 %vm244_vm1, %v819_v23 }
  0x57   :  { %795 = vmatmul.msk.bf16.gmra.mxu2 %vm244_vm1, %v827_v24  ;;  %803 = vmatmul.msk.bf16.gmra.mxu3 %vm244_vm1, %v835_v25 }
  0x66   :  { %780 = vmatmul.msk.bf16.gmra.mxu0 %vm244_vm1, %v812_v26  ;;  %788 = vmatmul.msk.bf16.gmra.mxu1 %vm244_vm1, %v820_v27 }
  0x67   :  { %796 = vmatmul.msk.bf16.gmra.mxu2 %vm244_vm1, %v828_v28  ;;  %804 = vmatmul.msk.bf16.gmra.mxu3 %vm244_vm1, %v836_v29 }
  0x76   :  { %781 = vmatmul.msk.bf16.gmra.mxu0 %vm244_vm1, %v813_v30  ;;  %789 = vmatmul.msk.bf16.gmra.mxu1 %vm244_vm1, %v821_v31 }
  0x77   :  { %797 = vmatmul.msk.bf16.gmra.mxu2 %vm244_vm1, %v829_v32  ;;  %805 = vmatmul.msk.bf16.gmra.mxu3 %vm244_vm1, %v837_v33 }
  0x83   :  { %v354_v35 = vpop.f32.mrf.mxu0  ;;  %v394_v36 = vpop.f32.mrf.mxu1 }
  0x84   :  { %v355_v37 = vadd.f32 %v996_v34, %v354_v35  ;;  %v395_v38 = vadd.f32 %v996_v34, %v394_v36 }
  0x86   :  { %v514_v39 = vmax.f32 %v355_v37, 0.0  ;;  %v530_v40 = vmax.f32 %v395_v38, 0.0 }
  0x88   :  { %578 = vst [vmem:[%s1257_s3] sm:$0xff] %v514_v39 }
  0x89   :  { %594 = vst [vmem:[%s1257_s3 + $0x80] sm:$0xff] %v530_v40 }
  0x8a   :  { %v434_v41 = vpop.f32.mrf.mxu2  ;;  %v474_v42 = vpop.f32.mrf.mxu3 }
  0x8b   :  { %v435_v43 = vadd.f32 %v996_v34, %v434_v41  ;;  %v475_v44 = vadd.f32 %v996_v34, %v474_v42  ;;  %v356_v45 = vpop.f32.mrf.mxu0  ;;  %v396_v46 = vpop.f32.mrf.mxu1 }
  0x8c   :  { %v357_v47 = vadd.f32 %v996_v34, %v356_v45  ;;  %v397_v48 = vadd.f32 %v996_v34, %v396_v46 }
  0x8d   :  { %v546_v49 = vmax.f32 %v435_v43, 0.0  ;;  %v562_v50 = vmax.f32 %v475_v44, 0.0 }
  0x8e   :  { %v515_v51 = vmax.f32 %v357_v47, 0.0  ;;  %v531_v52 = vmax.f32 %v397_v48, 0.0 }
  0x8f   :  { %610 = vst [vmem:[%s1257_s3 + $0x100] sm:$0xff] %v546_v49 }
  0x90   :  { %626 = vst [vmem:[%s1257_s3 + $0x180] sm:$0xff] %v562_v50 }
  0x91   :  { %579 = vst [vmem:[%s1257_s3 + $0x8] sm:$0xff] %v515_v51 }
  0x92   :  { %595 = vst [vmem:[%s1257_s3 + $0x88] sm:$0xff] %v531_v52  ;;  %v436_v53 = vpop.f32.mrf.mxu2  ;;  %v476_v54 = vpop.f32.mrf.mxu3 }
  0x93   :  { %v437_v55 = vadd.f32 %v996_v34, %v436_v53  ;;  %v477_v56 = vadd.f32 %v996_v34, %v476_v54  ;;  %v359_v57 = vpop.f32.mrf.mxu0  ;;  %v399_v58 = vpop.f32.mrf.mxu1 }
  0x94   :  { %v360_v59 = vadd.f32 %v996_v34, %v359_v57  ;;  %v400_v60 = vadd.f32 %v996_v34, %v399_v58 }
  0x95   :  { %v547_v61 = vmax.f32 %v437_v55, 0.0  ;;  %v563_v62 = vmax.f32 %v477_v56, 0.0 }
  0x96   :  { %v516_v63 = vmax.f32 %v360_v59, 0.0  ;;  %v532_v0 = vmax.f32 %v400_v60, 0.0 }
  0x97   :  { %611 = vst [vmem:[%s1257_s3 + $0x108] sm:$0xff] %v547_v61 }
  0x98   :  { %627 = vst [vmem:[%s1257_s3 + $0x188] sm:$0xff] %v563_v62 }
  0x99   :  { %580 = vst [vmem:[%s1257_s3 + $0x10] sm:$0xff] %v516_v63 }
  0x9a   :  { %596 = vst [vmem:[%s1257_s3 + $0x90] sm:$0xff] %v532_v0  ;;  %v439_v1 = vpop.f32.mrf.mxu2  ;;  %v479_v2 = vpop.f32.mrf.mxu3 }
  0x9b   :  { %v440_v3 = vadd.f32 %v996_v34, %v439_v1  ;;  %v480_v4 = vadd.f32 %v996_v34, %v479_v2  ;;  %v361_v5 = vpop.f32.mrf.mxu0  ;;  %v401_v6 = vpop.f32.mrf.mxu1 }
  0x9c   :  { %v362_v7 = vadd.f32 %v996_v34, %v361_v5  ;;  %v402_v8 = vadd.f32 %v996_v34, %v401_v6 }
  0x9d   :  { %v548_v9 = vmax.f32 %v440_v3, 0.0  ;;  %v564_v10 = vmax.f32 %v480_v4, 0.0 }
  0x9e   :  { %v517_v11 = vmax.f32 %v362_v7, 0.0  ;;  %v533_v12 = vmax.f32 %v402_v8, 0.0 }
  0x9f   :  { %612 = vst [vmem:[%s1257_s3 + $0x110] sm:$0xff] %v548_v9 }
  0xa0   :  { %628 = vst [vmem:[%s1257_s3 + $0x190] sm:$0xff] %v564_v10 }
  0xa1   :  { %581 = vst [vmem:[%s1257_s3 + $0x18] sm:$0xff] %v517_v11 }
  0xa2   :  { %597 = vst [vmem:[%s1257_s3 + $0x98] sm:$0xff] %v533_v12  ;;  %v441_v13 = vpop.f32.mrf.mxu2  ;;  %v481_v14 = vpop.f32.mrf.mxu3 }
  0xa3   :  { %v442_v15 = vadd.f32 %v996_v34, %v441_v13  ;;  %v482_v16 = vadd.f32 %v996_v34, %v481_v14  ;;  %v364_v17 = vpop.f32.mrf.mxu0  ;;  %v404_v18 = vpop.f32.mrf.mxu1 }
  0xa4   :  { %v365_v19 = vadd.f32 %v996_v34, %v364_v17  ;;  %v405_v20 = vadd.f32 %v996_v34, %v404_v18 }
  0xa5   :  { %v549_v21 = vmax.f32 %v442_v15, 0.0  ;;  %v565_v22 = vmax.f32 %v482_v16, 0.0 }
  0xa6   :  { %v518_v23 = vmax.f32 %v365_v19, 0.0  ;;  %v534_v24 = vmax.f32 %v405_v20, 0.0 }
  0xa7   :  { %613 = vst [vmem:[%s1257_s3 + $0x118] sm:$0xff] %v549_v21 }
  0xa8   :  { %629 = vst [vmem:[%s1257_s3 + $0x198] sm:$0xff] %v565_v22 }
  0xa9   :  { %582 = vst [vmem:[%s1257_s3 + $0x20] sm:$0xff] %v518_v23 }
  0xaa   :  { %598 = vst [vmem:[%s1257_s3 + $0xa0] sm:$0xff] %v534_v24  ;;  %v444_v25 = vpop.f32.mrf.mxu2  ;;  %v484_v26 = vpop.f32.mrf.mxu3 }
  0xab   :  { %v445_v27 = vadd.f32 %v996_v34, %v444_v25  ;;  %v485_v28 = vadd.f32 %v996_v34, %v484_v26  ;;  %v366_v29 = vpop.f32.mrf.mxu0  ;;  %v406_v30 = vpop.f32.mrf.mxu1 }
  0xac   :  { %v367_v31 = vadd.f32 %v996_v34, %v366_v29  ;;  %v407_v32 = vadd.f32 %v996_v34, %v406_v30 }
  0xad   :  { %v550_v33 = vmax.f32 %v445_v27, 0.0  ;;  %v566_v35 = vmax.f32 %v485_v28, 0.0 }
  0xae   :  { %v519_v36 = vmax.f32 %v367_v31, 0.0  ;;  %v535_v37 = vmax.f32 %v407_v32, 0.0 }
  0xaf   :  { %614 = vst [vmem:[%s1257_s3 + $0x120] sm:$0xff] %v550_v33 }
  0xb0   :  { %630 = vst [vmem:[%s1257_s3 + $0x1a0] sm:$0xff] %v566_v35 }
  0xb1   :  { %583 = vst [vmem:[%s1257_s3 + $0x28] sm:$0xff] %v519_v36 }
  0xb2   :  { %599 = vst [vmem:[%s1257_s3 + $0xa8] sm:$0xff] %v535_v37  ;;  %v446_v38 = vpop.f32.mrf.mxu2  ;;  %v486_v39 = vpop.f32.mrf.mxu3 }
  0xb3   :  { %v447_v40 = vadd.f32 %v996_v34, %v446_v38  ;;  %v487_v41 = vadd.f32 %v996_v34, %v486_v39  ;;  %v369_v42 = vpop.f32.mrf.mxu0  ;;  %v409_v43 = vpop.f32.mrf.mxu1 }
  0xb4   :  { %v370_v44 = vadd.f32 %v996_v34, %v369_v42  ;;  %v410_v45 = vadd.f32 %v996_v34, %v409_v43 }
  0xb5   :  { %v551_v46 = vmax.f32 %v447_v40, 0.0  ;;  %v567_v47 = vmax.f32 %v487_v41, 0.0 }
  0xb6   :  { %v520_v48 = vmax.f32 %v370_v44, 0.0  ;;  %v536_v49 = vmax.f32 %v410_v45, 0.0 }
  0xb7   :  { %615 = vst [vmem:[%s1257_s3 + $0x128] sm:$0xff] %v551_v46 }
  0xb8   :  { %631 = vst [vmem:[%s1257_s3 + $0x1a8] sm:$0xff] %v567_v47 }
  0xb9   :  { %584 = vst [vmem:[%s1257_s3 + $0x30] sm:$0xff] %v520_v48 }
  0xba   :  { %600 = vst [vmem:[%s1257_s3 + $0xb0] sm:$0xff] %v536_v49  ;;  %v449_v50 = vpop.f32.mrf.mxu2  ;;  %v489_v51 = vpop.f32.mrf.mxu3 }
  0xbb   :  { %v450_v52 = vadd.f32 %v996_v34, %v449_v50  ;;  %v490_v53 = vadd.f32 %v996_v34, %v489_v51  ;;  %v371_v54 = vpop.f32.mrf.mxu0  ;;  %v411_v55 = vpop.f32.mrf.mxu1 }
  0xbc   :  { %v372_v56 = vadd.f32 %v996_v34, %v371_v54  ;;  %v412_v57 = vadd.f32 %v996_v34, %v411_v55 }
  0xbd   :  { %v552_v58 = vmax.f32 %v450_v52, 0.0  ;;  %v568_v59 = vmax.f32 %v490_v53, 0.0 }
  0xbe   :  { %v521_v60 = vmax.f32 %v372_v56, 0.0  ;;  %v537_v61 = vmax.f32 %v412_v57, 0.0 }
  0xbf   :  { %616 = vst [vmem:[%s1257_s3 + $0x130] sm:$0xff] %v552_v58 }
  0xc0   :  { %632 = vst [vmem:[%s1257_s3 + $0x1b0] sm:$0xff] %v568_v59 }
  0xc1   :  { %585 = vst [vmem:[%s1257_s3 + $0x38] sm:$0xff] %v521_v60 }
  0xc2   :  { %601 = vst [vmem:[%s1257_s3 + $0xb8] sm:$0xff] %v537_v61  ;;  %v451_v62 = vpop.f32.mrf.mxu2  ;;  %v491_v63 = vpop.f32.mrf.mxu3 }
  0xc3   :  { %v452_v0 = vadd.f32 %v996_v34, %v451_v62  ;;  %v492_v1 = vadd.f32 %v996_v34, %v491_v63  ;;  %v374_v2 = vpop.f32.mrf.mxu0  ;;  %v414_v3 = vpop.f32.mrf.mxu1 }
  0xc4   :  { %v375_v4 = vadd.f32 %v996_v34, %v374_v2  ;;  %v415_v5 = vadd.f32 %v996_v34, %v414_v3 }
  0xc5   :  { %v553_v6 = vmax.f32 %v452_v0, 0.0  ;;  %v569_v7 = vmax.f32 %v492_v1, 0.0 }
  0xc6   :  { %v522_v8 = vmax.f32 %v375_v4, 0.0  ;;  %v538_v9 = vmax.f32 %v415_v5, 0.0 }
  0xc7   :  { %617 = vst [vmem:[%s1257_s3 + $0x138] sm:$0xff] %v553_v6 }
  0xc8   :  { %633 = vst [vmem:[%s1257_s3 + $0x1b8] sm:$0xff] %v569_v7 }
  0xc9   :  { %586 = vst [vmem:[%s1257_s3 + $0x40] sm:$0xff] %v522_v8 }
  0xca   :  { %602 = vst [vmem:[%s1257_s3 + $0xc0] sm:$0xff] %v538_v9  ;;  %v454_v10 = vpop.f32.mrf.mxu2  ;;  %v494_v11 = vpop.f32.mrf.mxu3 }
  0xcb   :  { %v455_v12 = vadd.f32 %v996_v34, %v454_v10  ;;  %v495_v13 = vadd.f32 %v996_v34, %v494_v11  ;;  %v376_v14 = vpop.f32.mrf.mxu0  ;;  %v416_v15 = vpop.f32.mrf.mxu1 }
  0xcc   :  { %v377_v16 = vadd.f32 %v996_v34, %v376_v14  ;;  %v417_v17 = vadd.f32 %v996_v34, %v416_v15 }
  0xcd   :  { %v554_v18 = vmax.f32 %v455_v12, 0.0  ;;  %v570_v19 = vmax.f32 %v495_v13, 0.0 }
  0xce   :  { %v523_v20 = vmax.f32 %v377_v16, 0.0  ;;  %v539_v21 = vmax.f32 %v417_v17, 0.0 }
  0xcf   :  { %618 = vst [vmem:[%s1257_s3 + $0x140] sm:$0xff] %v554_v18 }
  0xd0   :  { %634 = vst [vmem:[%s1257_s3 + $0x1c0] sm:$0xff] %v570_v19 }
  0xd1   :  { %587 = vst [vmem:[%s1257_s3 + $0x48] sm:$0xff] %v523_v20 }
  0xd2   :  { %603 = vst [vmem:[%s1257_s3 + $0xc8] sm:$0xff] %v539_v21  ;;  %v456_v22 = vpop.f32.mrf.mxu2  ;;  %v496_v23 = vpop.f32.mrf.mxu3 }
  0xd3   :  { %v457_v24 = vadd.f32 %v996_v34, %v456_v22  ;;  %v497_v25 = vadd.f32 %v996_v34, %v496_v23  ;;  %v379_v26 = vpop.f32.mrf.mxu0  ;;  %v419_v27 = vpop.f32.mrf.mxu1 }
  0xd4   :  { %v380_v28 = vadd.f32 %v996_v34, %v379_v26  ;;  %v420_v29 = vadd.f32 %v996_v34, %v419_v27 }
  0xd5   :  { %v555_v30 = vmax.f32 %v457_v24, 0.0  ;;  %v571_v31 = vmax.f32 %v497_v25, 0.0 }
  0xd6   :  { %v524_v32 = vmax.f32 %v380_v28, 0.0  ;;  %v540_v33 = vmax.f32 %v420_v29, 0.0 }
  0xd7   :  { %619 = vst [vmem:[%s1257_s3 + $0x148] sm:$0xff] %v555_v30 }
  0xd8   :  { %635 = vst [vmem:[%s1257_s3 + $0x1c8] sm:$0xff] %v571_v31 }
  0xd9   :  { %588 = vst [vmem:[%s1257_s3 + $0x50] sm:$0xff] %v524_v32 }
  0xda   :  { %604 = vst [vmem:[%s1257_s3 + $0xd0] sm:$0xff] %v540_v33  ;;  %v459_v35 = vpop.f32.mrf.mxu2  ;;  %v499_v36 = vpop.f32.mrf.mxu3 }
  0xdb   :  { %v460_v37 = vadd.f32 %v996_v34, %v459_v35  ;;  %v500_v38 = vadd.f32 %v996_v34, %v499_v36  ;;  %v381_v39 = vpop.f32.mrf.mxu0  ;;  %v421_v40 = vpop.f32.mrf.mxu1 }
  0xdc   :  { %v382_v41 = vadd.f32 %v996_v34, %v381_v39  ;;  %v422_v42 = vadd.f32 %v996_v34, %v421_v40 }
  0xdd   :  { %v556_v43 = vmax.f32 %v460_v37, 0.0  ;;  %v572_v44 = vmax.f32 %v500_v38, 0.0 }
  0xde   :  { %v525_v45 = vmax.f32 %v382_v41, 0.0  ;;  %v541_v46 = vmax.f32 %v422_v42, 0.0 }
  0xdf   :  { %620 = vst [vmem:[%s1257_s3 + $0x150] sm:$0xff] %v556_v43 }
  0xe0   :  { %636 = vst [vmem:[%s1257_s3 + $0x1d0] sm:$0xff] %v572_v44 }
  0xe1   :  { %589 = vst [vmem:[%s1257_s3 + $0x58] sm:$0xff] %v525_v45 }
  0xe2   :  { %605 = vst [vmem:[%s1257_s3 + $0xd8] sm:$0xff] %v541_v46  ;;  %v461_v47 = vpop.f32.mrf.mxu2  ;;  %v501_v48 = vpop.f32.mrf.mxu3 }
  0xe3   :  { %v462_v49 = vadd.f32 %v996_v34, %v461_v47  ;;  %v502_v50 = vadd.f32 %v996_v34, %v501_v48  ;;  %v384_v51 = vpop.f32.mrf.mxu0  ;;  %v424_v52 = vpop.f32.mrf.mxu1 }
  0xe4   :  { %v385_v53 = vadd.f32 %v996_v34, %v384_v51  ;;  %v425_v54 = vadd.f32 %v996_v34, %v424_v52 }
  0xe5   :  { %v557_v55 = vmax.f32 %v462_v49, 0.0  ;;  %v573_v56 = vmax.f32 %v502_v50, 0.0 }
  0xe6   :  { %v526_v57 = vmax.f32 %v385_v53, 0.0  ;;  %v542_v58 = vmax.f32 %v425_v54, 0.0 }
  0xe7   :  { %621 = vst [vmem:[%s1257_s3 + $0x158] sm:$0xff] %v557_v55 }
  0xe8   :  { %637 = vst [vmem:[%s1257_s3 + $0x1d8] sm:$0xff] %v573_v56 }
  0xe9   :  { %590 = vst [vmem:[%s1257_s3 + $0x60] sm:$0xff] %v526_v57 }
  0xea   :  { %606 = vst [vmem:[%s1257_s3 + $0xe0] sm:$0xff] %v542_v58  ;;  %v464_v59 = vpop.f32.mrf.mxu2  ;;  %v504_v60 = vpop.f32.mrf.mxu3 }
  0xeb   :  { %v465_v61 = vadd.f32 %v996_v34, %v464_v59  ;;  %v505_v62 = vadd.f32 %v996_v34, %v504_v60  ;;  %v386_v63 = vpop.f32.mrf.mxu0  ;;  %v426_v0 = vpop.f32.mrf.mxu1 }
  0xec   :  { %v387_v1 = vadd.f32 %v996_v34, %v386_v63  ;;  %v427_v2 = vadd.f32 %v996_v34, %v426_v0 }
  0xed   :  { %v558_v3 = vmax.f32 %v465_v61, 0.0  ;;  %v574_v4 = vmax.f32 %v505_v62, 0.0 }
  0xee   :  { %v527_v5 = vmax.f32 %v387_v1, 0.0  ;;  %v543_v6 = vmax.f32 %v427_v2, 0.0 }
  0xef   :  { %622 = vst [vmem:[%s1257_s3 + $0x160] sm:$0xff] %v558_v3 }
  0xf0   :  { %638 = vst [vmem:[%s1257_s3 + $0x1e0] sm:$0xff] %v574_v4 }
  0xf1   :  { %591 = vst [vmem:[%s1257_s3 + $0x68] sm:$0xff] %v527_v5 }
  0xf2   :  { %607 = vst [vmem:[%s1257_s3 + $0xe8] sm:$0xff] %v543_v6  ;;  %v466_v7 = vpop.f32.mrf.mxu2  ;;  %v506_v8 = vpop.f32.mrf.mxu3 }
  0xf3   :  { %v467_v9 = vadd.f32 %v996_v34, %v466_v7  ;;  %v507_v10 = vadd.f32 %v996_v34, %v506_v8  ;;  %v389_v11 = vpop.f32.mrf.mxu0  ;;  %v429_v12 = vpop.f32.mrf.mxu1 }
  0xf4   :  { %v390_v13 = vadd.f32 %v996_v34, %v389_v11  ;;  %v430_v14 = vadd.f32 %v996_v34, %v429_v12 }
  0xf5   :  { %v559_v15 = vmax.f32 %v467_v9, 0.0  ;;  %v575_v16 = vmax.f32 %v507_v10, 0.0 }
  0xf6   :  { %v528_v17 = vmax.f32 %v390_v13, 0.0  ;;  %v544_v18 = vmax.f32 %v430_v14, 0.0 }
  0xf7   :  { %623 = vst [vmem:[%s1257_s3 + $0x168] sm:$0xff] %v559_v15 }
  0xf8   :  { %639 = vst [vmem:[%s1257_s3 + $0x1e8] sm:$0xff] %v575_v16 }
  0xf9   :  { %592 = vst [vmem:[%s1257_s3 + $0x70] sm:$0xff] %v528_v17 }
  0xfa   :  { %608 = vst [vmem:[%s1257_s3 + $0xf0] sm:$0xff] %v544_v18  ;;  %v469_v19 = vpop.f32.mrf.mxu2  ;;  %v509_v20 = vpop.f32.mrf.mxu3 }
  0xfb   :  { %v470_v21 = vadd.f32 %v996_v34, %v469_v19  ;;  %v510_v22 = vadd.f32 %v996_v34, %v509_v20  ;;  %v391_v23 = vpop.f32.mrf.mxu0  ;;  %v431_v24 = vpop.f32.mrf.mxu1 }
  0xfc   :  { %v392_v25 = vadd.f32 %v996_v34, %v391_v23  ;;  %v432_v26 = vadd.f32 %v996_v34, %v431_v24 }
  0xfd   :  { %v560_v27 = vmax.f32 %v470_v21, 0.0  ;;  %v576_v28 = vmax.f32 %v510_v22, 0.0 }
  0xfe   :  { %v529_v29 = vmax.f32 %v392_v25, 0.0  ;;  %v545_v30 = vmax.f32 %v432_v26, 0.0 }
  0xff   :  { %624 = vst [vmem:[%s1257_s3 + $0x170] sm:$0xff] %v560_v27 }
 0x100   :  { %640 = vst [vmem:[%s1257_s3 + $0x1f0] sm:$0xff] %v576_v28 }
 0x101   :  { %593 = vst [vmem:[%s1257_s3 + $0x78] sm:$0xff] %v529_v29 }
 0x102   :  { %609 = vst [vmem:[%s1257_s3 + $0xf8] sm:$0xff] %v545_v30  ;;  %v471_v31 = vpop.f32.mrf.mxu2  ;;  %v511_v32 = vpop.f32.mrf.mxu3 }
 0x103   :  { %v472_v33 = vadd.f32 %v996_v34, %v471_v31  ;;  %v512_v35 = vadd.f32 %v996_v34, %v511_v32 }
 0x105   :  { %v561_v36 = vmax.f32 %v472_v33, 0.0  ;;  %v577_v37 = vmax.f32 %v512_v35, 0.0 }
 0x107   :  { %625 = vst [vmem:[%s1257_s3 + $0x178] sm:$0xff] %v561_v36 }
 0x108   :  { %641 = vst [vmem:[%s1257_s3 + $0x1f8] sm:$0xff] %v577_v37 }

// kernel: inception_block_b_forward.9
= control target key start
LH: loop header
LB: loop body
LE: loop exit
PB: predicated region body
PF: predicated region fallthrough
CT: control target
= control target key end

     0   :  { %s1155_s12 = smov 0   ;;  %s1157_s13 = smov 0   ;;  %s1588_s0 = inlined_call_operand.vmem [shape: f32[2,18,18,4], index: 0, kind: input, shape index: {}]   ;;  %s1589_s1 = inlined_call_operand.vmem [shape: bf16[4,128], index: 1, kind: input, shape index: {}]   ;;  %s1590_s2 = inlined_call_operand.vmem [shape: f32[1,128], index: 2, kind: input, shape index: {}]   ;;  %s1591_s3 = inlined_call_operand.vmem [shape: f32[2,16,16,128], index: 3, kind: output, shape index: {}]  }
   0x1   :  { %s1159_s14 = smov 0  }
   0x2 LB: > { %s25_s15 = sadd.s32 1, %s1129_s13  ;;  %p1059_p0 = scmp.ge.s32.totalorder %s1133_s14, 1  ;;  %s1133_s14 = sphi %s1159_s14, %s13_s14   ;;  %s1129_s13 = sphi %s1157_s13, %s1593_s13   ;;  %s1125_s12 = sphi %s1155_s12, %s1592_s12  }
   0x3   : > { %p27_p1 = scmp.ge.s32.totalorder %s25_s15, 2  ;;  %p168_p2 = scmp.lt.s32.totalorder %s1133_s14, 3 }
   0x5   : > { %s1595_s15 = smov (%p27_p1, %s25_s15), 0  ;;  %p169_p3 = pnand %p1059_p0, %p168_p2 }
   0x6   : > { %p202_p4 = scmp.lt.s32.totalorder (!%p169_p3), %s1125_s12, 1 }
   0x7   : > { %172 = sbr.rel (%p169_p3) target bundleno = 267 (0x10b), region = 32 }
   0xc   : > { %v737_v0 = vld [vmem:[%s1589_s1] sm:$0x3]  ;;  %vm791_vm0 = vcmask 1041408   ;;  %s1597_s12 = smov (!%p202_p4, %s1125_s12), 1  ;;  %vm331_vm1 = vcmask 1046528   ;;  %vm494_vm2 = vcmask 1045504  }
   0xd   : > { %v793_v1 = vsel %vm791_vm0, %v737_v0, 0  ;;  %s1085_s18 = smul.u32 432, %s1597_s12  ;;  %vm742_vm3 = vcmask 31744   ;;  %s1081_s24 = sshll.u32 %s1597_s12, 8 }
   0xe   : > { %802 = vmatpush.bf16.msra.mxu0 %v793_v1  ;;  %1082 = vmatpush.bf16.msra.mxu1 %v793_v1  ;;  %s1514_s27 = scalar_lea.vmem %s1591_s3, %s1081_s24 }
   0xf   : > { %1083 = vmatpush.bf16.msra.mxu2 %v793_v1  ;;  %1084 = vmatpush.bf16.msra.mxu3 %v793_v1  ;;  %s1182_s21 = scalar_lea.vmem %s1588_s0, %s1085_s18 }
  0x10   : > { %v223_v2 = vld [vmem:[%s1182_s21] sm:$0xff]  ;;  %v224_v3 = vld [vmem:[%s1182_s21 + $0x8] sm:$0xff]  ;;  %v225_v4 = vld [vmem:[%s1182_s21 + $0x10] sm:$0x3] }
  0x11   : > { %v226_v5 = vld [vmem:[%s1182_s21 + $0x18] sm:$0xff]  ;;  %v227_v6 = vld [vmem:[%s1182_s21 + $0x20] sm:$0xff]  ;;  %v228_v7 = vld [vmem:[%s1182_s21 + $0x28] sm:$0x3]  ;;  %v332_v8 = vrot.slane %v223_v2, 1  ;;  %v333_v9 = vrot.slane %v224_v3, 1 }
  0x12   : > { %v229_v10 = vld [vmem:[%s1182_s21 + $0x30] sm:$0xff]  ;;  %v230_v11 = vld [vmem:[%s1182_s21 + $0x38] sm:$0xff]  ;;  %v231_v12 = vld [vmem:[%s1182_s21 + $0x40] sm:$0x3]  ;;  %v335_v13 = vrot.slane %v225_v4, 1  ;;  %v337_v14 = vrot.slane %v226_v5, 1 }
  0x13   : > { %v334_v15 = vsel %vm331_vm1, %v332_v8, %v333_v9  ;;  %v338_v16 = vrot.slane %v227_v6, 1  ;;  %v340_v17 = vrot.slane %v228_v7, 1  ;;  %v342_v18 = vrot.slane %v229_v10, 1  ;;  %v1202_v43 = vld [vmem:[%s1182_s21 + $0x60] sm:$0xff]  ;;  %v1205_v44 = vld [vmem:[%s1182_s21 + $0x68] sm:$0xff]  ;;  %v1211_v50 = vld [vmem:[%s1182_s21 + $0x78] sm:$0xff] }
  0x14   : > { %v336_v19 = vsel %vm331_vm1, %v333_v9, %v335_v13  ;;  %v343_v20 = vrot.slane %v230_v11, 1  ;;  %v345_v21 = vrot.slane %v231_v12, 1  ;;  %v458_v22 = vmax.f32 %v223_v2, %v334_v15  ;;  %v237_v49 = vld [vmem:[%s1182_s21 + $0x70] sm:$0x3]  ;;  %v239_v55 = vld [vmem:[%s1182_s21 + $0x80] sm:$0xff]  ;;  %v242_v60 = vld [vmem:[%s1182_s21 + $0x98] sm:$0xff] }
  0x15   : > { %v339_v23 = vsel %vm331_vm1, %v337_v14, %v338_v16  ;;  %v341_v24 = vsel %vm331_vm1, %v338_v16, %v340_v17  ;;  %v459_v25 = vmax.f32 %v224_v3, %v336_v19  ;;  %v495_v26 = vrot.slane %v223_v2, 2  ;;  %v240_v56 = vld [vmem:[%s1182_s21 + $0x88] sm:$0x3]  ;;  %v241_v57 = vld [vmem:[%s1182_s21 + $0x90] sm:$0xff]  ;;  %v243_v1 = vld [vmem:[%s1182_s21 + $0xa0] sm:$0x3] }
  0x16   : > { %v344_v27 = vsel %vm331_vm1, %v342_v18, %v343_v20  ;;  %v346_v28 = vsel %vm331_vm1, %v343_v20, %v345_v21  ;;  %v460_v29 = vmax.f32 %v226_v5, %v339_v23  ;;  %v461_v30 = vmax.f32 %v227_v6, %v341_v24  ;;  %v1246_v24 = vld [vmem:[%s1182_s21 + $0xc0] sm:$0xff] }
  0x17   : > { %v462_v31 = vmax.f32 %v229_v10, %v344_v27  ;;  %v463_v32 = vmax.f32 %v230_v11, %v346_v28  ;;  %v496_v33 = vrot.slane %v224_v3, 2  ;;  %v498_v34 = vrot.slane %v225_v4, 2 }
  0x18   : > { %v500_v35 = vrot.slane %v226_v5, 2  ;;  %v501_v36 = vrot.slane %v227_v6, 2  ;;  %v503_v37 = vrot.slane %v228_v7, 2  ;;  %v505_v38 = vrot.slane %v229_v10, 2 }
  0x19   : > { %v497_v39 = vsel %vm494_vm2, %v495_v26, %v496_v33  ;;  %v499_v40 = vsel %vm494_vm2, %v496_v33, %v498_v34  ;;  %v506_v41 = vrot.slane %v230_v11, 2  ;;  %v508_v42 = vrot.slane %v231_v12, 2 }
  0x1a   : > { %v502_v45 = vsel %vm494_vm2, %v500_v35, %v501_v36  ;;  %v504_v46 = vsel %vm494_vm2, %v501_v36, %v503_v37  ;;  %v621_v47 = vmax.f32 %v458_v22, %v497_v39  ;;  %v622_v48 = vmax.f32 %v459_v25, %v499_v40  ;;  %v1254_v36 = vld [vmem:[%s1182_s21 + $0xc8] sm:$0xff]  ;;  %v249_v37 = vld [vmem:[%s1182_s21 + $0xd0] sm:$0x3] }
  0x1b   : > { %v507_v51 = vsel %vm494_vm2, %v505_v38, %v506_v41  ;;  %v509_v52 = vsel %vm494_vm2, %v506_v41, %v508_v42  ;;  %v1215_v53 = vmax.f32 %v460_v29, %v502_v45  ;;  %v1217_v54 = vmax.f32 %v461_v30, %v504_v46 }
  0x1c   : > { %v1222_v58 = vmax.f32 %v462_v31, %v507_v51  ;;  %v1224_v59 = vmax.f32 %v463_v32, %v509_v52  ;;  %v352_v61 = vrot.slane %v1202_v43, 1  ;;  %v353_v62 = vrot.slane %v1205_v44, 1 }
  0x1d   : > { %v657_v63 = vmax.f32 %v621_v47, %v1215_v53  ;;  %v658_v0 = vmax.f32 %v622_v48, %v1217_v54  ;;  %v355_v2 = vrot.slane %v237_v49, 1  ;;  %v357_v3 = vrot.slane %v1211_v50, 1 }
  0x1e   : > { %v354_v4 = vsel %vm331_vm1, %v352_v61, %v353_v62  ;;  %v358_v5 = vrot.slane %v239_v55, 1  ;;  %v360_v6 = vrot.slane %v240_v56, 1  ;;  %v362_v7 = vrot.slane %v241_v57, 1 }
  0x1f   : > { %v689_v8 = vmax.f32 %v657_v63, %v1222_v58  ;;  %v690_v9 = vmax.f32 %v658_v0, %v1224_v59  ;;  %v356_v10 = vsel %vm331_vm1, %v353_v62, %v355_v2  ;;  %v363_v11 = vrot.slane %v242_v60, 1  ;;  %v255_v62 = vld [vmem:[%s1182_s21 + $0x100] sm:$0x3] }
  0x20   : > { %v359_v12 = vsel %vm331_vm1, %v357_v3, %v358_v5  ;;  %v361_v13 = vsel %vm331_vm1, %v358_v5, %v360_v6  ;;  %v365_v14 = vrot.slane %v243_v1, 1  ;;  %v466_v15 = vmax.f32 %v1202_v43, %v354_v4 }
  0x21   : > { %v721_v16 = vpack.c.bf16 %v690_v9, %v689_v8  ;;  %v364_v17 = vsel %vm331_vm1, %v362_v7, %v363_v11  ;;  %v467_v18 = vmax.f32 %v1205_v44, %v356_v10  ;;  %v468_v19 = vmax.f32 %v1211_v50, %v359_v12 }
  0x22   : > { %v366_v20 = vsel %vm331_vm1, %v363_v11, %v365_v14  ;;  %v469_v21 = vmax.f32 %v239_v55, %v361_v13  ;;  %v470_v22 = vmax.f32 %v241_v57, %v364_v17  ;;  %v515_v23 = vrot.slane %v1202_v43, 2  ;;  %v250_v43 = vld [vmem:[%s1182_s21 + $0xd8] sm:$0xff] }
  0x23   : > { %1063 = vmatmul.msk.bf16.vlgmr.msra.gmra.mxu0 %vm742_vm3, %v721_v16  ;;  %v471_v25 = vmax.f32 %v242_v60, %v366_v20  ;;  %v516_v26 = vrot.slane %v1205_v44, 2  ;;  %v518_v27 = vrot.slane %v237_v49, 2  ;;  %v520_v28 = vrot.slane %v1211_v50, 2  ;;  %v251_v44 = vld [vmem:[%s1182_s21 + $0xe0] sm:$0xff]  ;;  %v252_v49 = vld [vmem:[%s1182_s21 + $0xe8] sm:$0x3] }
  0x24   : > { %v521_v29 = vrot.slane %v239_v55, 2  ;;  %v523_v30 = vrot.slane %v240_v56, 2  ;;  %v525_v31 = vrot.slane %v241_v57, 2  ;;  %v526_v32 = vrot.slane %v242_v60, 2  ;;  %v253_v50 = vld [vmem:[%s1182_s21 + $0xf0] sm:$0xff]  ;;  %v254_v55 = vld [vmem:[%s1182_s21 + $0xf8] sm:$0xff] }
  0x25   : > { %v517_v33 = vsel %vm494_vm2, %v515_v23, %v516_v26  ;;  %v519_v34 = vsel %vm494_vm2, %v516_v26, %v518_v27  ;;  %v528_v35 = vrot.slane %v243_v1, 2  ;;  %v372_v38 = vrot.slane %v1246_v24, 1 }
  0x26   : > { %v522_v39 = vsel %vm494_vm2, %v520_v28, %v521_v29  ;;  %v524_v40 = vsel %vm494_vm2, %v521_v29, %v523_v30  ;;  %v527_v41 = vsel %vm494_vm2, %v525_v31, %v526_v32  ;;  %v1261_v42 = vmax.f32 %v466_v15, %v517_v33  ;;  %v1300_v30 = vld [vmem:[%s1182_s21 + $0x120] sm:$0xff] }
  0x27   : > { %v529_v45 = vsel %vm494_vm2, %v526_v32, %v528_v35  ;;  %v1266_v46 = vmax.f32 %v467_v18, %v519_v34  ;;  %v1268_v47 = vmax.f32 %v468_v19, %v522_v39  ;;  %v1270_v48 = vmax.f32 %v469_v21, %v524_v40  ;;  %v260_v34 = vld [vmem:[%s1182_s21 + $0x128] sm:$0xff]  ;;  %v261_v35 = vld [vmem:[%s1182_s21 + $0x130] sm:$0x3]  ;;  %v262_v40 = vld [vmem:[%s1182_s21 + $0x138] sm:$0xff] }
  0x28   : > { %v1274_v51 = vmax.f32 %v470_v22, %v527_v41  ;;  %v1276_v52 = vmax.f32 %v471_v25, %v529_v45  ;;  %v373_v56 = vrot.slane %v1254_v36, 1  ;;  %v375_v57 = vrot.slane %v249_v37, 1  ;;  %v263_v41 = vld [vmem:[%s1182_s21 + $0x140] sm:$0xff] }
  0x29   : > { %v665_v60 = vmax.f32 %v1261_v42, %v1268_v47  ;;  %v666_v61 = vmax.f32 %v1266_v46, %v1270_v48  ;;  %v377_v63 = vrot.slane %v250_v43, 1  ;;  %v378_v0 = vrot.slane %v251_v44, 1 }
  0x2a   : > { %v374_v1 = vsel %vm331_vm1, %v372_v38, %v373_v56  ;;  %v376_v2 = vsel %vm331_vm1, %v373_v56, %v375_v57  ;;  %v380_v3 = vrot.slane %v252_v49, 1  ;;  %v382_v4 = vrot.slane %v253_v50, 1 }
  0x2b   : > { %v697_v5 = vmax.f32 %v665_v60, %v1274_v51  ;;  %v698_v6 = vmax.f32 %v666_v61, %v1276_v52  ;;  %v379_v7 = vsel %vm331_vm1, %v377_v63, %v378_v0  ;;  %v383_v8 = vrot.slane %v254_v55, 1  ;;  %v266_v60 = vld [vmem:[%s1182_s21 + $0x158] sm:$0xff] }
  0x2c   : > { %v381_v9 = vsel %vm331_vm1, %v378_v0, %v380_v3  ;;  %v385_v10 = vrot.slane %v255_v62, 1  ;;  %v474_v11 = vmax.f32 %v1246_v24, %v374_v1  ;;  %v475_v12 = vmax.f32 %v1254_v36, %v376_v2  ;;  %v267_v0 = vld [vmem:[%s1182_s21 + $0x160] sm:$0x3] }
  0x2d   : > { %v725_v13 = vpack.c.bf16 %v698_v6, %v697_v5  ;;  %v384_v14 = vsel %vm331_vm1, %v382_v4, %v383_v8  ;;  %v476_v15 = vmax.f32 %v250_v43, %v379_v7  ;;  %v477_v16 = vmax.f32 %v251_v44, %v381_v9 }
  0x2e   : > { %v386_v17 = vsel %vm331_vm1, %v383_v8, %v385_v10  ;;  %v478_v18 = vmax.f32 %v253_v50, %v384_v14  ;;  %v535_v19 = vrot.slane %v1246_v24, 2  ;;  %v536_v20 = vrot.slane %v1254_v36, 2 }
  0x2f   : > { %1067 = vmatmul.msk.bf16.vlgmr.msra.gmra.mxu1 %vm742_vm3, %v725_v13  ;;  %v479_v21 = vmax.f32 %v254_v55, %v386_v17  ;;  %v538_v22 = vrot.slane %v249_v37, 2  ;;  %v540_v23 = vrot.slane %v250_v43, 2  ;;  %v541_v25 = vrot.slane %v251_v44, 2  ;;  %v264_v43 = vld [vmem:[%s1182_s21 + $0x148] sm:$0x3] }
  0x30   : > { %v537_v26 = vsel %vm494_vm2, %v535_v19, %v536_v20  ;;  %v543_v27 = vrot.slane %v252_v49, 2  ;;  %v545_v28 = vrot.slane %v253_v50, 2  ;;  %v546_v29 = vrot.slane %v254_v55, 2  ;;  %v265_v50 = vld [vmem:[%s1182_s21 + $0x150] sm:$0xff] }
  0x31   : > { %v539_v24 = vsel %vm494_vm2, %v536_v20, %v538_v22  ;;  %v542_v31 = vsel %vm494_vm2, %v540_v23, %v541_v25  ;;  %v548_v32 = vrot.slane %v255_v62, 2  ;;  %v1304_v33 = vmax.f32 %v474_v11, %v537_v26 }
  0x32   : > { %v544_v36 = vsel %vm494_vm2, %v541_v25, %v543_v27  ;;  %v547_v37 = vsel %vm494_vm2, %v545_v28, %v546_v29  ;;  %v1310_v38 = vmax.f32 %v475_v12, %v539_v24  ;;  %v1312_v39 = vmax.f32 %v476_v15, %v542_v31 }
  0x33   : > { %v549_v44 = vsel %vm494_vm2, %v546_v29, %v548_v32  ;;  %v1318_v45 = vmax.f32 %v477_v16, %v544_v36  ;;  %v1320_v49 = vmax.f32 %v478_v18, %v547_v37  ;;  %v392_v55 = vrot.slane %v1300_v30, 1  ;;  %v232_v36 = vld [vmem:[%s1182_s21 + $0x48] sm:$0xff] }
  0x34   : > { %v1324_v56 = vmax.f32 %v479_v21, %v549_v44  ;;  %v673_v57 = vmax.f32 %v1304_v33, %v1312_v39  ;;  %v393_v61 = vrot.slane %v260_v34, 1  ;;  %v395_v62 = vrot.slane %v261_v35, 1 }
  0x35   : > { %v674_v63 = vmax.f32 %v1310_v38, %v1318_v45  ;;  %v397_v1 = vrot.slane %v262_v40, 1  ;;  %v398_v2 = vrot.slane %v263_v41, 1  ;;  %v400_v3 = vrot.slane %v264_v43, 1 }
  0x36   : > { %v705_v4 = vmax.f32 %v673_v57, %v1320_v49  ;;  %v394_v5 = vsel %vm331_vm1, %v392_v55, %v393_v61  ;;  %v396_v6 = vsel %vm331_vm1, %v393_v61, %v395_v62  ;;  %v402_v7 = vrot.slane %v265_v50, 1  ;;  %v234_v55 = vld [vmem:[%s1182_s21 + $0x58] sm:$0x3] }
  0x37   : > { %v706_v8 = vmax.f32 %v674_v63, %v1324_v56  ;;  %v399_v9 = vsel %vm331_vm1, %v397_v1, %v398_v2  ;;  %v401_v10 = vsel %vm331_vm1, %v398_v2, %v400_v3  ;;  %v403_v11 = vrot.slane %v266_v60, 1 }
  0x38   : > { %v405_v12 = vrot.slane %v267_v0, 1  ;;  %v482_v13 = vmax.f32 %v1300_v30, %v394_v5  ;;  %v483_v14 = vmax.f32 %v260_v34, %v396_v6  ;;  %v484_v15 = vmax.f32 %v262_v40, %v399_v9 }
  0x39   : > { %v729_v16 = vpack.c.bf16 %v706_v8, %v705_v4  ;;  %v404_v17 = vsel %vm331_vm1, %v402_v7, %v403_v11  ;;  %v485_v18 = vmax.f32 %v263_v41, %v401_v10  ;;  %v555_v19 = vrot.slane %v1300_v30, 2  ;;  %v233_v30 = vld [vmem:[%s1182_s21 + $0x50] sm:$0xff]  ;;  %v244_v7 = vld [vmem:[%s1182_s21 + $0xa8] sm:$0xff] }
  0x3a   : > { %v406_v20 = vsel %vm331_vm1, %v403_v11, %v405_v12  ;;  %v486_v21 = vmax.f32 %v265_v50, %v404_v17  ;;  %v556_v22 = vrot.slane %v260_v34, 2  ;;  %v558_v23 = vrot.slane %v261_v35, 2  ;;  %v245_v12 = vld [vmem:[%s1182_s21 + $0xb0] sm:$0xff] }
  0x3b   : > { %1071 = vmatmul.msk.bf16.vlgmr.msra.gmra.mxu2 %vm742_vm3, %v729_v16  ;;  %v487_v25 = vmax.f32 %v266_v60, %v406_v20  ;;  %v560_v26 = vrot.slane %v262_v40, 2  ;;  %v561_v27 = vrot.slane %v263_v41, 2  ;;  %v563_v28 = vrot.slane %v264_v43, 2 }
  0x3c   : > { %v557_v29 = vsel %vm494_vm2, %v555_v19, %v556_v22  ;;  %v559_v24 = vsel %vm494_vm2, %v556_v22, %v558_v23  ;;  %v565_v31 = vrot.slane %v265_v50, 2  ;;  %v566_v32 = vrot.slane %v266_v60, 2 }
  0x3d   : > { %v562_v37 = vsel %vm494_vm2, %v560_v26, %v561_v27  ;;  %v564_v34 = vsel %vm494_vm2, %v561_v27, %v563_v28  ;;  %v568_v35 = vrot.slane %v267_v0, 2  ;;  %v1349_v44 = vmax.f32 %v482_v13, %v557_v29  ;;  %v246_v13 = vld [vmem:[%s1182_s21 + $0xb8] sm:$0x3] }
  0x3e   : > { %v567_v40 = vsel %vm494_vm2, %v565_v31, %v566_v32  ;;  %v1353_v41 = vmax.f32 %v483_v14, %v559_v24  ;;  %v1355_v43 = vmax.f32 %v484_v15, %v562_v37  ;;  %v1357_v57 = vmax.f32 %v485_v18, %v564_v34  ;;  %v256_v24 = vld [vmem:[%s1182_s21 + $0x108] sm:$0xff]  ;;  %v257_v31 = vld [vmem:[%s1182_s21 + $0x110] sm:$0xff] }
  0x3f   : > { %v569_v50 = vsel %vm494_vm2, %v566_v32, %v568_v35  ;;  %v1360_v60 = vmax.f32 %v486_v21, %v567_v40  ;;  %v347_v61 = vrot.slane %v232_v36, 1  ;;  %v348_v62 = vrot.slane %v233_v30, 1  ;;  %v258_v32 = vld [vmem:[%s1182_s21 + $0x118] sm:$0x3] }
  0x40   : > { %v1362_v63 = vmax.f32 %v487_v25, %v569_v50  ;;  %v681_v0 = vmax.f32 %v1349_v44, %v1355_v43  ;;  %v682_v1 = vmax.f32 %v1353_v41, %v1357_v57  ;;  %v350_v2 = vrot.slane %v234_v55, 1 }
  0x41   : > { %v349_v3 = vsel %vm331_vm1, %v347_v61, %v348_v62  ;;  %v510_v4 = vrot.slane %v232_v36, 2  ;;  %v511_v5 = vrot.slane %v233_v30, 2  ;;  %v513_v6 = vrot.slane %v234_v55, 2 }
  0x42   : > { %v713_v8 = vmax.f32 %v681_v0, %v1360_v60  ;;  %v714_v9 = vmax.f32 %v682_v1, %v1362_v63  ;;  %v351_v10 = vsel %vm331_vm1, %v348_v62, %v350_v2  ;;  %v464_v11 = vmax.f32 %v232_v36, %v349_v3 }
  0x43   : > { %v465_v14 = vmax.f32 %v233_v30, %v351_v10  ;;  %v512_v15 = vsel %vm494_vm2, %v510_v4, %v511_v5  ;;  %v514_v16 = vsel %vm494_vm2, %v511_v5, %v513_v6  ;;  %v659_v17 = vmax.f32 %v1215_v53, %v1222_v58  ;;  %v268_v5 = vld [vmem:[%s1182_s21 + $0x168] sm:$0xff]  ;;  %v269_v10 = vld [vmem:[%s1182_s21 + $0x170] sm:$0xff] }
  0x44   : > { %v733_v18 = vpack.c.bf16 %v714_v9, %v713_v8  ;;  %v1379_v19 = vmax.f32 %v464_v11, %v512_v15  ;;  %v660_v20 = vmax.f32 %v1217_v54, %v1224_v59  ;;  %v367_v21 = vrot.slane %v244_v7, 1  ;;  %v270_v15 = vld [vmem:[%s1182_s21 + $0x178] sm:$0x3] }
  0x45   : > { %v1383_v22 = vmax.f32 %v465_v14, %v514_v16  ;;  %v368_v23 = vrot.slane %v245_v12, 1  ;;  %v370_v25 = vrot.slane %v246_v13, 1  ;;  %v530_v26 = vrot.slane %v244_v7, 2 }
  0x46   : > { %1075 = vmatmul.msk.bf16.vlgmr.msra.gmra.mxu3 %vm742_vm3, %v733_v18  ;;  %v691_v27 = vmax.f32 %v659_v17, %v1379_v19  ;;  %v531_v28 = vrot.slane %v245_v12, 2  ;;  %v533_v29 = vrot.slane %v246_v13, 2  ;;  %v667_v53 = vmax.f32 %v1268_v47, %v1274_v51 }
  0x47   : > { %v692_v54 = vmax.f32 %v660_v20, %v1383_v22  ;;  %v369_v36 = vsel %vm331_vm1, %v367_v21, %v368_v23  ;;  %v371_v30 = vsel %vm331_vm1, %v368_v23, %v370_v25  ;;  %v668_v37 = vmax.f32 %v1270_v48, %v1276_v52 }
  0x48   : > { %v472_v34 = vmax.f32 %v244_v7, %v369_v36  ;;  %v473_v35 = vmax.f32 %v245_v12, %v371_v30  ;;  %v532_v55 = vsel %vm494_vm2, %v530_v26, %v531_v28  ;;  %v534_v40 = vsel %vm494_vm2, %v531_v28, %v533_v29 }
  0x49   : > { %v722_v50 = vpack.c.bf16 %v692_v54, %v691_v27  ;;  %v387_v61 = vrot.slane %v256_v24, 1  ;;  %v388_v62 = vrot.slane %v257_v31, 1  ;;  %v390_v0 = vrot.slane %v258_v32, 1 }
  0x4a   : > { %v1399_v1 = vmax.f32 %v472_v34, %v532_v55  ;;  %v1401_v2 = vmax.f32 %v473_v35, %v534_v40  ;;  %v550_v3 = vrot.slane %v256_v24, 2  ;;  %v551_v4 = vrot.slane %v257_v31, 2 }
  0x4b   : > { %1064 = vmatmul.msk.bf16.gmra.mxu0 %vm742_vm3, %v722_v50  ;;  %v389_v6 = vsel %vm331_vm1, %v387_v61, %v388_v62  ;;  %v391_v7 = vsel %vm331_vm1, %v388_v62, %v390_v0  ;;  %v553_v8 = vrot.slane %v258_v32, 2  ;;  %v675_v9 = vmax.f32 %v1312_v39, %v1320_v49 }
  0x4c   : > { %v699_v11 = vmax.f32 %v667_v53, %v1399_v1  ;;  %v700_v12 = vmax.f32 %v668_v37, %v1401_v2  ;;  %v480_v13 = vmax.f32 %v256_v24, %v389_v6  ;;  %v481_v14 = vmax.f32 %v257_v31, %v391_v7  ;;  %v272_v7 = vld [vmem:[%s1182_s21 + $0x188] sm:$0xff] }
  0x4d   : > { %v552_v16 = vsel %vm494_vm2, %v550_v3, %v551_v4  ;;  %v554_v17 = vsel %vm494_vm2, %v551_v4, %v553_v8  ;;  %v676_v18 = vmax.f32 %v1318_v45, %v1324_v56  ;;  %v407_v20 = vrot.slane %v268_v5, 1  ;;  %v271_v3 = vld [vmem:[%s1182_s21 + $0x180] sm:$0xff] }
  0x4e   : > { %v726_v21 = vpack.c.bf16 %v700_v12, %v699_v11  ;;  %v1417_v23 = vmax.f32 %v480_v13, %v552_v16  ;;  %v1419_v25 = vmax.f32 %v481_v14, %v554_v17  ;;  %v408_v26 = vrot.slane %v269_v10, 1 }
  0x4f   : > { %v410_v27 = vrot.slane %v270_v15, 1  ;;  %v570_v28 = vrot.slane %v268_v5, 2  ;;  %v571_v29 = vrot.slane %v269_v10, 2  ;;  %v573_v53 = vrot.slane %v270_v15, 2 }
  0x50   : > { %1068 = vmatmul.msk.bf16.gmra.mxu1 %vm742_vm3, %v726_v21  ;;  %v707_v24 = vmax.f32 %v675_v9, %v1417_v23  ;;  %v708_v31 = vmax.f32 %v676_v18, %v1419_v25  ;;  %v409_v32 = vsel %vm331_vm1, %v407_v20, %v408_v26  ;;  %v683_v54 = vmax.f32 %v1355_v43, %v1360_v60 }
  0x51   : > { %v411_v36 = vsel %vm331_vm1, %v408_v26, %v410_v27  ;;  %v488_v30 = vmax.f32 %v268_v5, %v409_v32  ;;  %v572_v37 = vsel %vm494_vm2, %v570_v28, %v571_v29  ;;  %v574_v34 = vsel %vm494_vm2, %v571_v29, %v573_v53 }
  0x52   : > { %v730_v35 = vpack.c.bf16 %v708_v31, %v707_v24  ;;  %v489_v55 = vmax.f32 %v269_v10, %v411_v36  ;;  %v684_v40 = vmax.f32 %v1357_v57, %v1362_v63  ;;  %v661_v50 = vmax.f32 %v1222_v58, %v1379_v19  ;;  %v273_v58 = vld [vmem:[%s1182_s21 + $0x190] sm:$0x3] }
  0x53   : > { %v1434_v61 = vmax.f32 %v488_v30, %v572_v37  ;;  %v662_v62 = vmax.f32 %v1224_v59, %v1383_v22  ;;  %v669_v0 = vmax.f32 %v1274_v51, %v1399_v1  ;;  %v670_v6 = vmax.f32 %v1276_v52, %v1401_v2 }
  0x54   : > { %1072 = vmatmul.msk.bf16.gmra.mxu2 %vm742_vm3, %v730_v35  ;;  %v1442_v4 = vmax.f32 %v489_v55, %v574_v34  ;;  %v693_v5 = vmax.f32 %v661_v50, %v1261_v42  ;;  %v677_v51 = vmax.f32 %v1320_v49, %v1417_v23  ;;  %v678_v10 = vmax.f32 %v1324_v56, %v1419_v25  ;;  %v274_v35 = vld [vmem:[%s1182_s21 + $0x198] sm:$0xff]  ;;  %v275_v55 = vld [vmem:[%s1182_s21 + $0x1a0] sm:$0xff] }
  0x55   : > { %v715_v8 = vmax.f32 %v683_v54, %v1434_v61  ;;  %v694_v9 = vmax.f32 %v662_v62, %v1266_v46  ;;  %v412_v11 = vrot.slane %v271_v3, 1  ;;  %v701_v13 = vmax.f32 %v669_v0, %v1304_v33 }
  0x56   : > { %v716_v59 = vmax.f32 %v684_v40, %v1442_v4  ;;  %v413_v14 = vrot.slane %v272_v7, 1  ;;  %v415_v52 = vrot.slane %v273_v58, 1  ;;  %v702_v16 = vmax.f32 %v670_v6, %v1310_v38  ;;  %v276_v40 = vld [vmem:[%s1182_s21 + $0x1a8] sm:$0x3] }
  0x57   : > { %v723_v12 = vpack.c.bf16 %v694_v9, %v693_v5  ;;  %v575_v17 = vrot.slane %v271_v3, 2  ;;  %v576_v18 = vrot.slane %v272_v7, 2  ;;  %v578_v26 = vrot.slane %v273_v58, 2 }
  0x58   : > { %v734_v15 = vpack.c.bf16 %v716_v59, %v715_v8  ;;  %v414_v20 = vsel %vm331_vm1, %v412_v11, %v413_v14  ;;  %v416_v21 = vsel %vm331_vm1, %v413_v14, %v415_v52  ;;  %v727_v29 = vpack.c.bf16 %v702_v16, %v701_v13 }
  0x59   : > { %v490_v49 = vmax.f32 %v271_v3, %v414_v20  ;;  %v491_v56 = vmax.f32 %v272_v7, %v416_v21  ;;  %v577_v27 = vsel %vm494_vm2, %v575_v17, %v576_v18  ;;  %v579_v28 = vsel %vm494_vm2, %v576_v18, %v578_v26 }
  0x5a   : > { %1076 = vmatmul.msk.bf16.gmra.mxu3 %vm742_vm3, %v734_v15  ;;  %v709_v53 = vmax.f32 %v677_v51, %v1349_v44  ;;  %v710_v24 = vmax.f32 %v678_v10, %v1353_v41  ;;  %v685_v31 = vmax.f32 %v1360_v60, %v1434_v61  ;;  %v686_v32 = vmax.f32 %v1362_v63, %v1442_v4 }
  0x5b   : > { %1065 = vmatmul.msk.bf16.gmra.mxu0 %vm742_vm3, %v723_v12  ;;  %v653_v54 = vmax.f32 %v490_v49, %v577_v27  ;;  %v654_v36 = vmax.f32 %v491_v56, %v579_v28  ;;  %v663_v30 = vmax.f32 %v1379_v19, %v1261_v42  ;;  %v664_v37 = vmax.f32 %v1383_v22, %v1266_v46 }
  0x5c   : > { %v731_v34 = vpack.c.bf16 %v710_v24, %v709_v53  ;;  %v417_v0 = vrot.slane %v274_v35, 1  ;;  %v418_v3 = vrot.slane %v275_v55, 1  ;;  %v420_v5 = vrot.slane %v276_v40, 1 }
  0x5d   : > { %v717_v50 = vmax.f32 %v685_v31, %v653_v54  ;;  %v718_v62 = vmax.f32 %v686_v32, %v654_v36  ;;  %v695_v60 = vmax.f32 %v663_v30, %v1268_v47  ;;  %v696_v63 = vmax.f32 %v664_v37, %v1270_v48 }
  0x5e   : > { %v671_v42 = vmax.f32 %v1399_v1, %v1304_v33  ;;  %v672_v46 = vmax.f32 %v1401_v2, %v1310_v38  ;;  %v580_v6 = vrot.slane %v274_v35, 2  ;;  %v419_v7 = vsel %vm331_vm1, %v417_v0, %v418_v3 }
  0x5f   : > { %v735_v19 = vpack.c.bf16 %v718_v62, %v717_v50  ;;  %v724_v22 = vpack.c.bf16 %v696_v63, %v695_v60  ;;  %v421_v47 = vsel %vm331_vm1, %v418_v3, %v420_v5  ;;  %v581_v58 = vrot.slane %v275_v55, 2 }
  0x60   : > { %1069 = vmatmul.msk.bf16.gmra.mxu1 %vm742_vm3, %v727_v29  ;;  %v583_v48 = vrot.slane %v276_v40, 2  ;;  %v703_v8 = vmax.f32 %v671_v42, %v1312_v39  ;;  %v704_v9 = vmax.f32 %v672_v46, %v1318_v45  ;;  %v679_v59 = vmax.f32 %v1417_v23, %v1349_v44 }
  0x61   : > { %v680_v33 = vmax.f32 %v1419_v25, %v1353_v41  ;;  %v492_v38 = vmax.f32 %v274_v35, %v419_v7  ;;  %v493_v1 = vmax.f32 %v275_v55, %v421_v47  ;;  %v582_v2 = vsel %vm494_vm2, %v580_v6, %v581_v58 }
  0x62   : > { %v584_v51 = vsel %vm494_vm2, %v581_v58, %v583_v48  ;;  %v728_v39 = vpack.c.bf16 %v704_v9, %v703_v8  ;;  %v711_v45 = vmax.f32 %v679_v59, %v1355_v43  ;;  %v687_v41 = vmax.f32 %v1434_v61, %v653_v54  ;;  %v1507_v43 = vld [vmem:[%s1590_s2] ss:$0 sm:$0xff] }
  0x63   : > { %v712_v10 = vmax.f32 %v680_v33, %v1357_v57  ;;  %v655_v44 = vmax.f32 %v492_v38, %v582_v2  ;;  %v656_v23 = vmax.f32 %v493_v1, %v584_v51  ;;  %v688_v25 = vmax.f32 %v1442_v4, %v654_v36 }
  0x64   : > { %1073 = vmatmul.msk.bf16.gmra.mxu2 %vm742_vm3, %v731_v34 }
  0x65   : > { %v732_v11 = vpack.c.bf16 %v712_v10, %v711_v45  ;;  %v719_v12 = vmax.f32 %v687_v41, %v655_v44  ;;  %v720_v13 = vmax.f32 %v688_v25, %v656_v23 }
  0x67   : > { %v736_v14 = vpack.c.bf16 %v720_v13, %v719_v12 }
  0x6a   : > { %1077 = vmatmul.msk.bf16.gmra.mxu3 %vm742_vm3, %v735_v19 }
  0x6b   : > { %1066 = vmatmul.msk.bf16.gmra.mxu0 %vm742_vm3, %v724_v22 }
  0x70   : > { %1070 = vmatmul.msk.bf16.gmra.mxu1 %vm742_vm3, %v728_v39 }
  0x74   : > { %1074 = vmatmul.msk.bf16.gmra.mxu2 %vm742_vm3, %v732_v11 }
  0x7a   : > { %1078 = vmatmul.msk.bf16.gmra.mxu3 %vm742_vm3, %v736_v14 }
  0xa0   : > { %v804_v57 = vpop.f32.mrf.mxu0 }
  0xa1   : > { %v805_v61 = vadd.f32 %v1507_v43, %v804_v57 }
  0xa3   : > { %v884_v4 = vmax.f32 %v805_v61, 0.0 }
  0xa5   : > { %916 = vst [vmem:[%s1514_s27] sm:$0xff] %v884_v4 }
  0xa8   : > { %v806_v16 = vpop.f32.mrf.mxu0 }
  0xa9   : > { %v807_v18 = vadd.f32 %v1507_v43, %v806_v16 }
  0xab   : > { %v885_v20 = vmax.f32 %v807_v18, 0.0 }
  0xac   : > { %v824_v52 = vpop.f32.mrf.mxu1 }
  0xad   : > { %v825_v15 = vadd.f32 %v1507_v43, %v824_v52  ;;  %917 = vst [vmem:[%s1514_s27 + $0x8] sm:$0xff] %v885_v20 }
  0xaf   : > { %v892_v17 = vmax.f32 %v825_v15, 0.0 }
  0xb1   : > { %924 = vst [vmem:[%s1514_s27 + $0x40] sm:$0xff] %v892_v17 }
  0xb4   : > { %v826_v21 = vpop.f32.mrf.mxu1 }
  0xb5   : > { %v827_v26 = vadd.f32 %v1507_v43, %v826_v21 }
  0xb7   : > { %v893_v49 = vmax.f32 %v827_v26, 0.0 }
  0xb9   : > { %925 = vst [vmem:[%s1514_s27 + $0x48] sm:$0xff] %v893_v49 }
  0xbe   : > { %v844_v56 = vpop.f32.mrf.mxu2 }
  0xbf   : > { %v845_v27 = vadd.f32 %v1507_v43, %v844_v56 }
  0xc1   : > { %v900_v28 = vmax.f32 %v845_v27, 0.0 }
  0xc3   : > { %932 = vst [vmem:[%s1514_s27 + $0x80] sm:$0xff] %v900_v28 }
  0xc6   : > { %v846_v29 = vpop.f32.mrf.mxu2 }
  0xc7   : > { %v847_v53 = vadd.f32 %v1507_v43, %v846_v29 }
  0xc8   : > { %v809_v24 = vpop.f32.mrf.mxu0 }
  0xc9   : > { %v864_v31 = vpop.f32.mrf.mxu3  ;;  %v901_v32 = vmax.f32 %v847_v53, 0.0  ;;  %v810_v54 = vadd.f32 %v1507_v43, %v809_v24 }
  0xca   : > { %v865_v36 = vadd.f32 %v1507_v43, %v864_v31 }
  0xcb   : > { %933 = vst [vmem:[%s1514_s27 + $0x88] sm:$0xff] %v901_v32  ;;  %v886_v30 = vmax.f32 %v810_v54, 0.0 }
  0xcc   : > { %v908_v37 = vmax.f32 %v865_v36, 0.0 }
  0xcd   : > { %918 = vst [vmem:[%s1514_s27 + $0x10] sm:$0xff] %v886_v30  ;;  %v829_v34 = vpop.f32.mrf.mxu1 }
  0xce   : > { %940 = vst [vmem:[%s1514_s27 + $0xc0] sm:$0xff] %v908_v37  ;;  %v830_v35 = vadd.f32 %v1507_v43, %v829_v34 }
  0xd0   : > { %v894_v55 = vmax.f32 %v830_v35, 0.0  ;;  %v811_v40 = vpop.f32.mrf.mxu0 }
  0xd1   : > { %v866_v50 = vpop.f32.mrf.mxu3  ;;  %v812_v62 = vadd.f32 %v1507_v43, %v811_v40 }
  0xd2   : > { %v867_v60 = vadd.f32 %v1507_v43, %v866_v50  ;;  %926 = vst [vmem:[%s1514_s27 + $0x50] sm:$0xff] %v894_v55 }
  0xd3   : > { %v887_v63 = vmax.f32 %v812_v62, 0.0 }
  0xd4   : > { %v909_v0 = vmax.f32 %v867_v60, 0.0 }
  0xd5   : > { %919 = vst [vmem:[%s1514_s27 + $0x18] sm:$0xff] %v887_v63  ;;  %v831_v3 = vpop.f32.mrf.mxu1 }
  0xd6   : > { %941 = vst [vmem:[%s1514_s27 + $0xc8] sm:$0xff] %v909_v0  ;;  %v832_v5 = vadd.f32 %v1507_v43, %v831_v3 }
  0xd7   : > { %v849_v42 = vpop.f32.mrf.mxu2 }
  0xd8   : > { %v850_v46 = vadd.f32 %v1507_v43, %v849_v42  ;;  %v895_v19 = vmax.f32 %v832_v5, 0.0  ;;  %v814_v22 = vpop.f32.mrf.mxu0 }
  0xd9   : > { %v815_v6 = vadd.f32 %v1507_v43, %v814_v22 }
  0xda   : > { %v902_v7 = vmax.f32 %v850_v46, 0.0  ;;  %927 = vst [vmem:[%s1514_s27 + $0x58] sm:$0xff] %v895_v19 }
  0xdb   : > { %v888_v47 = vmax.f32 %v815_v6, 0.0 }
  0xdc   : > { %934 = vst [vmem:[%s1514_s27 + $0x90] sm:$0xff] %v902_v7 }
  0xdd   : > { %v869_v58 = vpop.f32.mrf.mxu3  ;;  %920 = vst [vmem:[%s1514_s27 + $0x20] sm:$0xff] %v888_v47  ;;  %v834_v48 = vpop.f32.mrf.mxu1 }
  0xde   : > { %v870_v8 = vadd.f32 %v1507_v43, %v869_v58  ;;  %v835_v9 = vadd.f32 %v1507_v43, %v834_v48 }
  0xdf   : > { %v851_v59 = vpop.f32.mrf.mxu2 }
  0xe0   : > { %v910_v33 = vmax.f32 %v870_v8, 0.0  ;;  %v852_v38 = vadd.f32 %v1507_v43, %v851_v59  ;;  %v896_v1 = vmax.f32 %v835_v9, 0.0  ;;  %v816_v2 = vpop.f32.mrf.mxu0 }
  0xe1   : > { %v817_v51 = vadd.f32 %v1507_v43, %v816_v2 }
  0xe2   : > { %942 = vst [vmem:[%s1514_s27 + $0xd0] sm:$0xff] %v910_v33  ;;  %v903_v39 = vmax.f32 %v852_v38, 0.0 }
  0xe3   : > { %928 = vst [vmem:[%s1514_s27 + $0x60] sm:$0xff] %v896_v1  ;;  %v889_v45 = vmax.f32 %v817_v51, 0.0 }
  0xe4   : > { %935 = vst [vmem:[%s1514_s27 + $0x98] sm:$0xff] %v903_v39 }
  0xe5   : > { %v871_v10 = vpop.f32.mrf.mxu3  ;;  %921 = vst [vmem:[%s1514_s27 + $0x28] sm:$0xff] %v889_v45  ;;  %v836_v44 = vpop.f32.mrf.mxu1 }
  0xe6   : > { %v872_v23 = vadd.f32 %v1507_v43, %v871_v10  ;;  %v837_v41 = vadd.f32 %v1507_v43, %v836_v44 }
  0xe7   : > { %v854_v25 = vpop.f32.mrf.mxu2 }
  0xe8   : > { %v911_v11 = vmax.f32 %v872_v23, 0.0  ;;  %v855_v12 = vadd.f32 %v1507_v43, %v854_v25  ;;  %v897_v13 = vmax.f32 %v837_v41, 0.0  ;;  %v819_v14 = vpop.f32.mrf.mxu0 }
  0xe9   : > { %v820_v57 = vadd.f32 %v1507_v43, %v819_v14 }
  0xea   : > { %943 = vst [vmem:[%s1514_s27 + $0xd8] sm:$0xff] %v911_v11  ;;  %v904_v61 = vmax.f32 %v855_v12, 0.0 }
  0xeb   : > { %929 = vst [vmem:[%s1514_s27 + $0x68] sm:$0xff] %v897_v13  ;;  %v890_v4 = vmax.f32 %v820_v57, 0.0 }
  0xec   : > { %936 = vst [vmem:[%s1514_s27 + $0xa0] sm:$0xff] %v904_v61 }
  0xed   : > { %v874_v52 = vpop.f32.mrf.mxu3  ;;  %922 = vst [vmem:[%s1514_s27 + $0x30] sm:$0xff] %v890_v4  ;;  %v839_v15 = vpop.f32.mrf.mxu1 }
  0xee   : > { %v875_v16 = vadd.f32 %v1507_v43, %v874_v52  ;;  %v840_v17 = vadd.f32 %v1507_v43, %v839_v15 }
  0xef   : > { %v856_v18 = vpop.f32.mrf.mxu2 }
  0xf0   : > { %v912_v20 = vmax.f32 %v875_v16, 0.0  ;;  %v857_v21 = vadd.f32 %v1507_v43, %v856_v18  ;;  %v898_v26 = vmax.f32 %v840_v17, 0.0  ;;  %v821_v49 = vpop.f32.mrf.mxu0 }
  0xf1   : > { %v822_v56 = vadd.f32 %v1507_v43, %v821_v49 }
  0xf2   : > { %944 = vst [vmem:[%s1514_s27 + $0xe0] sm:$0xff] %v912_v20  ;;  %v905_v27 = vmax.f32 %v857_v21, 0.0 }
  0xf3   : > { %930 = vst [vmem:[%s1514_s27 + $0x70] sm:$0xff] %v898_v26  ;;  %v891_v28 = vmax.f32 %v822_v56, 0.0 }
  0xf4   : > { %937 = vst [vmem:[%s1514_s27 + $0xa8] sm:$0xff] %v905_v27 }
  0xf5   : > { %v876_v29 = vpop.f32.mrf.mxu3  ;;  %923 = vst [vmem:[%s1514_s27 + $0x38] sm:$0xff] %v891_v28  ;;  %v841_v53 = vpop.f32.mrf.mxu1 }
  0xf6   : > { %v877_v24 = vadd.f32 %v1507_v43, %v876_v29  ;;  %v842_v31 = vadd.f32 %v1507_v43, %v841_v53 }
  0xf7   : > { %v859_v32 = vpop.f32.mrf.mxu2 }
  0xf8   : > { %v913_v54 = vmax.f32 %v877_v24, 0.0  ;;  %v860_v36 = vadd.f32 %v1507_v43, %v859_v32  ;;  %v899_v30 = vmax.f32 %v842_v31, 0.0 }
  0xfa   : > { %945 = vst [vmem:[%s1514_s27 + $0xe8] sm:$0xff] %v913_v54  ;;  %v906_v37 = vmax.f32 %v860_v36, 0.0 }
  0xfb   : > { %931 = vst [vmem:[%s1514_s27 + $0x78] sm:$0xff] %v899_v30 }
  0xfc   : > { %938 = vst [vmem:[%s1514_s27 + $0xb0] sm:$0xff] %v906_v37 }
  0xfd   : > { %v879_v34 = vpop.f32.mrf.mxu3 }
  0xfe   : > { %v880_v35 = vadd.f32 %v1507_v43, %v879_v34 }
  0xff   : > { %v861_v55 = vpop.f32.mrf.mxu2 }
 0x100   : > { %v914_v40 = vmax.f32 %v880_v35, 0.0  ;;  %v862_v50 = vadd.f32 %v1507_v43, %v861_v55 }
 0x102   : > { %946 = vst [vmem:[%s1514_s27 + $0xf0] sm:$0xff] %v914_v40  ;;  %v907_v62 = vmax.f32 %v862_v50, 0.0 }
 0x104   : > { %939 = vst [vmem:[%s1514_s27 + $0xb8] sm:$0xff] %v907_v62 }
 0x105   : > { %v881_v60 = vpop.f32.mrf.mxu3 }
 0x106   : > { %v882_v63 = vadd.f32 %v1507_v43, %v881_v60 }
 0x108   : > { %v915_v0 = vmax.f32 %v882_v63, 0.0 }
 0x10a   : > { %947 = vst [vmem:[%s1514_s27 + $0xf8] sm:$0xff] %v915_v0 }
 0x10b PF: > { %s13_s14 = sadd.s32 1, %s1133_s14   ;;  %s1592_s12 = smov %s1129_s13 }
 0x10c   : > { %p10_p5 = scmp.ge.s32.totalorder %s13_s14, 4   ;;  %s1593_s13 = smov %s1595_s15 }
 0x10e   :  { %12 = sbr.rel (!%p10_p5) target bundleno = 2 (0x2), region = 68 }

// kernel: inception_block_b_forward.6
= control target key start
LH: loop header
LB: loop body
LE: loop exit
PB: predicated region body
PF: predicated region fallthrough
CT: control target
= control target key end

     0   :  { %s4238_s18 = smov 0   ;;  %s4240_s19 = smov 0   ;;  %s5950_s0 = inlined_call_operand.vmem [shape: f32[2,16,22,6], index: 0, kind: input, shape index: {}]   ;;  %s5951_s1 = inlined_call_operand.vmem [shape: bf16[7,6,6], index: 1, kind: input, shape index: {}]   ;;  %s5952_s2 = inlined_call_operand.vmem [shape: f32[1,6], index: 2, kind: input, shape index: {}]   ;;  %s5953_s3 = inlined_call_operand.vmem [shape: bf16[7,6,128], index: 3, kind: input, shape index: {}]   ;;  %s5954_s4 = inlined_call_operand.vmem [shape: f32[1,128], index: 4, kind: input, shape index: {}]   ;;  %s5955_s5 = inlined_call_operand.vmem [shape: f32[2,16,16,128], index: 5, kind: output, shape index: {}]  }
   0x1   :  { %s4242_s20 = smov 0  }
   0x2 LB: > { %s27_s21 = sadd.s32 1, %s4201_s19  ;;  %p3743_p0 = scmp.ge.s32.totalorder %s4205_s20, 1  ;;  %s4205_s20 = sphi %s4242_s20, %s15_s20   ;;  %s4201_s19 = sphi %s4240_s19, %s6032_s19   ;;  %s4197_s18 = sphi %s4238_s18, %s6031_s18  }
   0x3   : > { %p29_p1 = scmp.ge.s32.totalorder %s27_s21, 2  ;;  %p218_p2 = scmp.lt.s32.totalorder %s4205_s20, 3 }
   0x5   : > { %s6034_s21 = smov (%p29_p1, %s27_s21), 0  ;;  %p219_p3 = pnand %p3743_p0, %p218_p2 }
   0x7   : > { %222 = sbr.rel (%p219_p3) target bundleno = 1186 (0x4a2), region = 40 }
   0xc   : > { %v3747_v0 = vld [vmem:[%s5951_s1 + $0x4] sm:$0x7]  ;;  %vm570_vm0 = vcmask 1042432   ;;  %v341_v1 = vld [vmem:[%s5951_s1] sm:$0x7]  ;;  %p256_p4 = scmp.lt.s32.totalorder %s4197_s18, 1 }
   0xd   : > { %v572_v2 = vsel %vm570_vm0, %v3747_v0, 0  ;;  %v712_v3 = vsel %vm570_vm0, %v341_v1, 0  ;;  %v3780_v4 = vld [vmem:[%s5951_s1 + $0x8] sm:$0x7]  ;;  %vm390_vm1 = vcmask 1046528   ;;  %vm521_vm2 = vcmask 48128  }
   0xe   : > { %4096 = vmatpush.bf16.msra.mxu2 %v572_v2  ;;  %4097 = vmatpush.bf16.msra.mxu3 %v712_v3  ;;  %s6036_s18 = smov (!%p256_p4, %s4197_s18), 1  ;;  %v983_v5 = vsel %vm570_vm0, %v3780_v4, 0  ;;  %vm1106_vm3 = vcmask 1044480   ;;  %vm803_vm4 = vcmask 1045504   ;;  %vm1409_vm5 = vcmask 1043456  }
   0xf   : > { %581 = vmatpush.bf16.msra.mxu0 %v572_v2  ;;  %s4098_s28 = smul.u32 384, %s6036_s18  ;;  %721 = vmatpush.bf16.msra.mxu1 %v712_v3  ;;  %vm2014_vm6 = vcmask 1041408   ;;  %vm2385_vm7 = vcmask 44032   ;;  %s4073_s12 = sshll.u32 %s6036_s18, 8 }
  0x10   : > { %s5801_s15 = scalar_lea.vmem %s5955_s5, %s4073_s12 }
  0x11   : > { %s4274_s6 = scalar_lea.vmem %s5950_s0, %s4098_s28 }
  0x12   : > { %992 = vmatpush.bf16.msrb.mxu2 %v983_v5  ;;  %v301_v6 = vld [vmem:[%s4274_s6 + $0xc0] sm:$0xff]  ;;  %v302_v7 = vld [vmem:[%s4274_s6 + $0xc8] sm:$0xff]  ;;  %v303_v8 = vld [vmem:[%s4274_s6 + $0xd0] sm:$0x3f] }
  0x13   : > { %v431_v9 = vrot.slane %v301_v6, 1  ;;  %v432_v10 = vrot.slane %v302_v7, 1  ;;  %v434_v11 = vrot.slane %v303_v8, 1  ;;  %v333_v12 = vpack.c.bf16 %v302_v7, %v301_v6  ;;  %v4280_v13 = vld [vmem:[%s4274_s6] sm:$0xff]  ;;  %v4283_v14 = vld [vmem:[%s4274_s6 + $0x8] sm:$0xff]  ;;  %v304_v26 = vld [vmem:[%s4274_s6 + $0xd8] sm:$0xff] }
  0x14   : > { %v4286_v15 = vld [vmem:[%s4274_s6 + $0x10] sm:$0x3f]  ;;  %v391_v16 = vrot.slane %v4280_v13, 1  ;;  %v392_v17 = vrot.slane %v4283_v14, 1  ;;  %v325_v18 = vpack.c.bf16 %v4283_v14, %v4280_v13  ;;  %v305_v27 = vld [vmem:[%s4274_s6 + $0xe0] sm:$0xff]  ;;  %v4305_v29 = vld [vmem:[%s4274_s6 + $0x18] sm:$0xff] }
  0x15   : > { %v433_v19 = vsel %vm390_vm1, %v431_v9, %v432_v10  ;;  %v435_v20 = vsel %vm390_vm1, %v432_v10, %v434_v11  ;;  %3772 = vmatmul.msk.bf16.vlgmr.msra.gmra.mxu3 %vm521_vm2, %v333_v12  ;;  %v394_v21 = vrot.slane %v4286_v15, 1  ;;  %v306_v28 = vld [vmem:[%s4274_s6 + $0xe8] sm:$0x3f]  ;;  %v4308_v30 = vld [vmem:[%s4274_s6 + $0x20] sm:$0xff]  ;;  %v436_v32 = vrot.slane %v304_v26, 1  ;;  %v307_v46 = vld [vmem:[%s4274_s6 + $0xf0] sm:$0xff] }
  0x16   : > { %v511_v22 = vpack.c.bf16 %v435_v20, %v433_v19  ;;  %v393_v23 = vsel %vm390_vm1, %v391_v16, %v392_v17  ;;  %3764 = vmatmul.msk.bf16.vlgmr.msra.gmra.mxu1 %vm521_vm2, %v325_v18  ;;  %v4311_v31 = vld [vmem:[%s4274_s6 + $0x28] sm:$0x3f]  ;;  %v437_v33 = vrot.slane %v305_v27, 1  ;;  %v439_v34 = vrot.slane %v306_v28, 1  ;;  %v308_v47 = vld [vmem:[%s4274_s6 + $0xf8] sm:$0xff]  ;;  %v4330_v49 = vld [vmem:[%s4274_s6 + $0x30] sm:$0xff] }
  0x17   : > { %v395_v24 = vsel %vm390_vm1, %v392_v17, %v394_v21  ;;  %v396_v35 = vrot.slane %v4305_v29, 1  ;;  %v397_v36 = vrot.slane %v4308_v30, 1  ;;  %v399_v37 = vrot.slane %v4311_v31, 1  ;;  %v309_v48 = vld [vmem:[%s4274_s6 + $0x100] sm:$0x3f]  ;;  %v4333_v50 = vld [vmem:[%s4274_s6 + $0x38] sm:$0xff] }
  0x18   : > { %3756 = vmatmul.msk.bf16.vlgmr.msra.gmra.mxu2 %vm521_vm2, %v511_v22  ;;  %v503_v25 = vpack.c.bf16 %v395_v24, %v393_v23  ;;  %v438_v38 = vsel %vm390_vm1, %v436_v32, %v437_v33  ;;  %v440_v39 = vsel %vm390_vm1, %v437_v33, %v439_v34  ;;  %v334_v40 = vpack.c.bf16 %v305_v27, %v304_v26  ;;  %v4336_v51 = vld [vmem:[%s4274_s6 + $0x40] sm:$0x3f]  ;;  %v310_v2 = vld [vmem:[%s4274_s6 + $0x108] sm:$0xff]  ;;  %v311_v3 = vld [vmem:[%s4274_s6 + $0x110] sm:$0xff] }
  0x19   : > { %v326_v41 = vpack.c.bf16 %v4308_v30, %v4305_v29  ;;  %v398_v42 = vsel %vm390_vm1, %v396_v35, %v397_v36  ;;  %v400_v43 = vsel %vm390_vm1, %v397_v36, %v399_v37  ;;  %v512_v44 = vpack.c.bf16 %v440_v39, %v438_v38  ;;  %v312_v4 = vld [vmem:[%s4274_s6 + $0x118] sm:$0x3f]  ;;  %v4355_v5 = vld [vmem:[%s4274_s6 + $0x48] sm:$0xff]  ;;  %v4358_v6 = vld [vmem:[%s4274_s6 + $0x50] sm:$0xff] }
  0x1a   : > { %3748 = vmatmul.msk.bf16.vlgmr.msra.gmra.mxu0 %vm521_vm2, %v503_v25  ;;  %v504_v45 = vpack.c.bf16 %v400_v43, %v398_v42  ;;  %v441_v52 = vrot.slane %v307_v46, 1  ;;  %v442_v53 = vrot.slane %v308_v47, 1  ;;  %v444_v54 = vrot.slane %v309_v48, 1  ;;  %v4361_v7 = vld [vmem:[%s4274_s6 + $0x58] sm:$0x3f]  ;;  %v313_v25 = vld [vmem:[%s4274_s6 + $0x120] sm:$0xff] }
  0x1b   : > { %v401_v55 = vrot.slane %v4330_v49, 1  ;;  %v402_v56 = vrot.slane %v4333_v50, 1  ;;  %v404_v57 = vrot.slane %v4336_v51, 1  ;;  %v335_v60 = vpack.c.bf16 %v308_v47, %v307_v46  ;;  %v314_v26 = vld [vmem:[%s4274_s6 + $0x128] sm:$0xff]  ;;  %v315_v27 = vld [vmem:[%s4274_s6 + $0x130] sm:$0x3f] }
  0x1c   : > { %v443_v58 = vsel %vm390_vm1, %v441_v52, %v442_v53  ;;  %v445_v59 = vsel %vm390_vm1, %v442_v53, %v444_v54  ;;  %v327_v61 = vpack.c.bf16 %v4333_v50, %v4330_v49  ;;  %v446_v8 = vrot.slane %v310_v2, 1  ;;  %v4380_v28 = vld [vmem:[%s4274_s6 + $0x60] sm:$0xff]  ;;  %v4383_v32 = vld [vmem:[%s4274_s6 + $0x68] sm:$0xff]  ;;  %v4386_v33 = vld [vmem:[%s4274_s6 + $0x70] sm:$0x3f] }
  0x1d   : > { %v403_v62 = vsel %vm390_vm1, %v401_v55, %v402_v56  ;;  %v405_v63 = vsel %vm390_vm1, %v402_v56, %v404_v57  ;;  %v513_v0 = vpack.c.bf16 %v445_v59, %v443_v58  ;;  %v447_v9 = vrot.slane %v311_v3, 1  ;;  %v316_v48 = vld [vmem:[%s4274_s6 + $0x138] sm:$0xff]  ;;  %v317_v52 = vld [vmem:[%s4274_s6 + $0x140] sm:$0xff]  ;;  %v318_v53 = vld [vmem:[%s4274_s6 + $0x148] sm:$0x3f] }
  0x1e   : > { %v505_v1 = vpack.c.bf16 %v405_v63, %v403_v62  ;;  %v449_v10 = vrot.slane %v312_v4, 1  ;;  %v406_v11 = vrot.slane %v4355_v5, 1  ;;  %v407_v12 = vrot.slane %v4358_v6, 1  ;;  %v4405_v54 = vld [vmem:[%s4274_s6 + $0x78] sm:$0xff]  ;;  %v4408_v55 = vld [vmem:[%s4274_s6 + $0x80] sm:$0xff] }
  0x1f   : > { %v409_v16 = vrot.slane %v4361_v7, 1  ;;  %v448_v17 = vsel %vm390_vm1, %v446_v8, %v447_v9  ;;  %v336_v19 = vpack.c.bf16 %v311_v3, %v310_v2  ;;  %v328_v20 = vpack.c.bf16 %v4358_v6, %v4355_v5  ;;  %v4411_v56 = vld [vmem:[%s4274_s6 + $0x88] sm:$0x3f] }
  0x20   : > { %v450_v18 = vsel %vm390_vm1, %v447_v9, %v449_v10  ;;  %v408_v21 = vsel %vm390_vm1, %v406_v11, %v407_v12  ;;  %v451_v34 = vrot.slane %v313_v25, 1  ;;  %v452_v35 = vrot.slane %v314_v26, 1  ;;  %v319_v10 = vld [vmem:[%s4274_s6 + $0x150] sm:$0xff]  ;;  %v320_v11 = vld [vmem:[%s4274_s6 + $0x158] sm:$0xff] }
  0x21   : > { %v410_v22 = vsel %vm390_vm1, %v407_v12, %v409_v16  ;;  %v514_v23 = vpack.c.bf16 %v450_v18, %v448_v17  ;;  %v454_v36 = vrot.slane %v315_v27, 1  ;;  %v411_v37 = vrot.slane %v4380_v28, 1  ;;  %v321_v12 = vld [vmem:[%s4274_s6 + $0x160] sm:$0x3f]  ;;  %v3797_v16 = vld [vmem:[%s5951_s1 + $0xc] sm:$0x7] }
  0x22   : > { %v506_v24 = vpack.c.bf16 %v410_v22, %v408_v21  ;;  %v412_v38 = vrot.slane %v4383_v32, 1  ;;  %v414_v39 = vrot.slane %v4386_v33, 1  ;;  %v337_v42 = vpack.c.bf16 %v314_v26, %v313_v25  ;;  %v4434_v18 = vld [vmem:[%s4274_s6 + $0x90] sm:$0xff] }
  0x23   : > { %v329_v43 = vpack.c.bf16 %v4383_v32, %v4380_v28  ;;  %v456_v57 = vrot.slane %v316_v48, 1  ;;  %v457_v58 = vrot.slane %v317_v52, 1  ;;  %v459_v59 = vrot.slane %v318_v53, 1  ;;  %v3814_v53 = vld [vmem:[%s5951_s1 + $0x10] sm:$0x7] }
  0x24   : > { %v419_v62 = vrot.slane %v4411_v56, 1  ;;  %v330_v2 = vpack.c.bf16 %v4408_v55, %v4405_v54  ;;  %v1286_v17 = vsel %vm570_vm0, %v3797_v16, 0  ;;  %v461_v21 = vrot.slane %v319_v10, 1 }
  0x25   : > { %3773 = vmatmul.msk.bf16.gmra.mxu3 %vm521_vm2, %v334_v40  ;;  %v453_v40 = vsel %vm390_vm1, %v451_v34, %v452_v35  ;;  %v458_v63 = vsel %vm390_vm1, %v456_v57, %v457_v58  ;;  %v462_v22 = vrot.slane %v320_v11, 1  ;;  %v3831_v57 = vld [vmem:[%s5951_s1 + $0x14] sm:$0x7]  ;;  %v1108_v16 = vrot.slane %v4283_v14, 3 }
  0x26   : > { %3765 = vmatmul.msk.bf16.gmra.mxu1 %vm521_vm2, %v326_v41  ;;  %v455_v41 = vsel %vm390_vm1, %v452_v35, %v454_v36  ;;  %1295 = vmatpush.bf16.msrb.mxu3 %v1286_v17  ;;  %v339_v35 = vpack.c.bf16 %v320_v11, %v319_v10  ;;  %v1110_v17 = vrot.slane %v4286_v15, 3 }
  0x27   : > { %v515_v46 = vpack.c.bf16 %v455_v41, %v453_v40  ;;  %v463_v27 = vsel %vm390_vm1, %v461_v21, %v462_v22  ;;  %v322_v41 = vld [vmem:[%s4274_s6 + $0x168] sm:$0xff]  ;;  %v1712_v21 = vrot.slane %v4280_v13, 5 }
  0x28   : > { %3757 = vmatmul.msk.bf16.gmra.mxu2 %vm521_vm2, %v512_v44  ;;  %v413_v44 = vsel %vm390_vm1, %v411_v37, %v412_v38 }
  0x2a   : > { %3749 = vmatmul.msk.bf16.gmra.mxu0 %vm521_vm2, %v504_v45  ;;  %v415_v45 = vsel %vm390_vm1, %v412_v38, %v414_v39 }
  0x2b   : > { %v507_v47 = vpack.c.bf16 %v415_v45, %v413_v44  ;;  %v323_v44 = vld [vmem:[%s4274_s6 + $0x170] sm:$0xff]  ;;  %v324_v45 = vld [vmem:[%s4274_s6 + $0x178] sm:$0x3f] }
  0x35   : > { %3774 = vmatmul.msk.bf16.gmra.mxu3 %vm521_vm2, %v335_v60  ;;  %v416_v60 = vrot.slane %v4405_v54, 1 }
  0x36   : > { %3766 = vmatmul.msk.bf16.gmra.mxu1 %vm521_vm2, %v327_v61  ;;  %v417_v61 = vrot.slane %v4408_v55, 1 }
  0x38   : > { %3758 = vmatmul.msk.bf16.gmra.mxu2 %vm521_vm2, %v513_v0  ;;  %v460_v0 = vsel %vm390_vm1, %v457_v58, %v459_v59  ;;  %v418_v3 = vsel %vm390_vm1, %v416_v60, %v417_v61  ;;  %v420_v4 = vsel %vm390_vm1, %v417_v61, %v419_v62  ;;  %v467_v58 = vrot.slane %v323_v44, 1 }
  0x39   : > { %v516_v8 = vpack.c.bf16 %v460_v0, %v458_v63  ;;  %v508_v9 = vpack.c.bf16 %v420_v4, %v418_v3  ;;  %v469_v59 = vrot.slane %v324_v45, 1  ;;  %v1589_v60 = vsel %vm570_vm0, %v3814_v53, 0 }
  0x3a   : > { %3750 = vmatmul.msk.bf16.gmra.mxu0 %vm521_vm2, %v505_v1  ;;  %v338_v1 = vpack.c.bf16 %v317_v52, %v316_v48  ;;  %v4466_v48 = vld [vmem:[%s4274_s6 + $0xb0] sm:$0xff]  ;;  %v4469_v52 = vld [vmem:[%s4274_s6 + $0xb8] sm:$0x3f]  ;;  %v1891_v61 = vsel %vm570_vm0, %v3831_v57, 0  ;;  %v340_v3 = vpack.c.bf16 %v323_v44, %v322_v41 }
  0x3b   : > { %1598 = vmatpush.bf16.msrb.mxu0 %v1589_v60  ;;  %1900 = vmatpush.bf16.msrb.mxu1 %v1891_v61  ;;  %v427_v63 = vrot.slane %v4466_v48, 1  ;;  %v429_v0 = vrot.slane %v4469_v52, 1  ;;  %v1115_v60 = vrot.slane %v4311_v31, 3 }
  0x45   : > { %3775 = vmatmul.msk.bf16.gmra.mxu3 %vm521_vm2, %v336_v19  ;;  %v4437_v19 = vld [vmem:[%s4274_s6 + $0x98] sm:$0xff] }
  0x46   : > { %3767 = vmatmul.msk.bf16.gmra.mxu1 %vm521_vm2, %v328_v20  ;;  %v4440_v20 = vld [vmem:[%s4274_s6 + $0xa0] sm:$0x3f]  ;;  %v422_v25 = vrot.slane %v4437_v19, 1  ;;  %v331_v36 = vpack.c.bf16 %v4437_v19, %v4434_v18 }
  0x47   : > { %v424_v26 = vrot.slane %v4440_v20, 1 }
  0x48   : > { %3759 = vmatmul.msk.bf16.gmra.mxu2 %vm521_vm2, %v514_v23  ;;  %v464_v23 = vrot.slane %v321_v12, 1  ;;  %v1107_v12 = vrot.slane %v4280_v13, 3 }
  0x49   : > { %v425_v38 = vsel %vm390_vm1, %v422_v25, %v424_v26  ;;  %v807_v26 = vrot.slane %v4286_v15, 2 }
  0x4a   : > { %3751 = vmatmul.msk.bf16.gmra.mxu0 %vm521_vm2, %v506_v24  ;;  %v421_v24 = vrot.slane %v4434_v18, 1  ;;  %v465_v34 = vsel %vm390_vm1, %v462_v22, %v464_v23  ;;  %v1713_v22 = vrot.slane %v4283_v14, 5  ;;  %v1715_v23 = vrot.slane %v4286_v15, 5 }
  0x4b   : > { %v517_v39 = vpack.c.bf16 %v465_v34, %v463_v27  ;;  %v1109_v27 = vsel %vm1106_vm3, %v1107_v12, %v1108_v16  ;;  %v1111_v34 = vsel %vm1106_vm3, %v1108_v16, %v1110_v17  ;;  %v1416_v16 = vrot.slane %v4308_v30, 4 }
  0x4c   : > { %v423_v37 = vsel %vm390_vm1, %v421_v24, %v422_v25  ;;  %v804_v24 = vrot.slane %v4280_v13, 2  ;;  %v805_v25 = vrot.slane %v4283_v14, 2  ;;  %v1418_v17 = vrot.slane %v4311_v31, 4 }
  0x4d   : > { %v509_v40 = vpack.c.bf16 %v425_v38, %v423_v37  ;;  %v1413_v37 = vrot.slane %v4286_v15, 4  ;;  %v1714_v38 = vsel %vm570_vm0, %v1712_v21, %v1713_v22 }
  0x55   : > { %3776 = vmatmul.msk.bf16.gmra.mxu3 %vm521_vm2, %v337_v42  ;;  %v3848_v42 = vld [vmem:[%s5951_s1 + $0x18] sm:$0x7] }
  0x56   : > { %3768 = vmatmul.msk.bf16.gmra.mxu1 %vm521_vm2, %v329_v43  ;;  %v2194_v43 = vsel %vm570_vm0, %v3848_v42, 0  ;;  %v1219_v42 = vpack.c.bf16 %v1111_v34, %v1109_v27 }
  0x57   : > { %2203 = vmatpush.bf16.msra.mxu2 %v2194_v43 }
  0x58   : > { %3760 = vmatmul.msk.bf16.gmra.mxu2 %vm521_vm2, %v515_v46  ;;  %v466_v46 = vrot.slane %v322_v41, 1  ;;  %v808_v41 = vsel %vm803_vm4, %v805_v25, %v807_v26 }
  0x5a   : > { %3752 = vmatmul.msk.bf16.gmra.mxu0 %vm521_vm2, %v507_v47  ;;  %v4463_v47 = vld [vmem:[%s4274_s6 + $0xa8] sm:$0xff] }
  0x5b   : > { %v426_v62 = vrot.slane %v4463_v47, 1  ;;  %v332_v4 = vpack.c.bf16 %v4466_v48, %v4463_v47 }
  0x65   : > { %3777 = vmatmul.msk.bf16.gmra.mxu3 %vm521_vm2, %v338_v1  ;;  %v468_v1 = vsel %vm390_vm1, %v466_v46, %v467_v58 }
  0x66   : > { %3769 = vmatmul.msk.bf16.gmra.mxu1 %vm521_vm2, %v330_v2  ;;  %v470_v2 = vsel %vm390_vm1, %v467_v58, %v469_v59  ;;  %v1112_v58 = vrot.slane %v4305_v29, 3  ;;  %v1113_v59 = vrot.slane %v4308_v30, 3 }
  0x67   : > { %v518_v10 = vpack.c.bf16 %v470_v2, %v468_v1  ;;  %v1720_v1 = vrot.slane %v4311_v31, 5 }
  0x68   : > { %3761 = vmatmul.msk.bf16.gmra.mxu2 %vm521_vm2, %v516_v8  ;;  %v428_v8 = vsel %vm390_vm1, %v426_v62, %v427_v63 }
  0x6a   : > { %3753 = vmatmul.msk.bf16.gmra.mxu0 %vm521_vm2, %v508_v9  ;;  %v430_v9 = vsel %vm390_vm1, %v427_v63, %v429_v0  ;;  %v1717_v63 = vrot.slane %v4305_v29, 5  ;;  %v1718_v0 = vrot.slane %v4308_v30, 5 }
  0x6b   : > { %v510_v11 = vpack.c.bf16 %v430_v9, %v428_v8  ;;  %v812_v8 = vrot.slane %v4311_v31, 2  ;;  %v1114_v9 = vsel %vm1106_vm3, %v1112_v58, %v1113_v59  ;;  %v814_v58 = vrot.slane %v4330_v49, 2 }
  0x6c   : > { %v1719_v21 = vsel %vm570_vm0, %v1717_v63, %v1718_v0  ;;  %v1420_v63 = vrot.slane %v4330_v49, 4 }
  0x75   : > { %3778 = vmatmul.msk.bf16.gmra.mxu3 %vm521_vm2, %v339_v35  ;;  %v1410_v35 = vrot.slane %v4280_v13, 4 }
  0x76   : > { %3770 = vmatmul.msk.bf16.gmra.mxu1 %vm521_vm2, %v331_v36  ;;  %v1411_v36 = vrot.slane %v4283_v14, 4 }
  0x78   : > { %3762 = vmatmul.msk.bf16.gmra.mxu2 %vm521_vm2, %v517_v39  ;;  %v1716_v39 = vsel %vm570_vm0, %v1713_v22, %v1715_v23  ;;  %v1412_v45 = vsel %vm1409_vm5, %v1410_v35, %v1411_v36  ;;  %v1414_v13 = vsel %vm1409_vm5, %v1411_v36, %v1413_v37  ;;  %v1721_v22 = vsel %vm570_vm0, %v1718_v0, %v1720_v1 }
  0x79   : > { %v1824_v43 = vpack.c.bf16 %v1716_v39, %v1714_v38  ;;  %v1522_v14 = vpack.c.bf16 %v1414_v13, %v1412_v45  ;;  %v1825_v34 = vpack.c.bf16 %v1721_v22, %v1719_v21  ;;  %v1421_v1 = vrot.slane %v4333_v50, 4 }
  0x7a   : > { %3754 = vmatmul.msk.bf16.gmra.mxu0 %vm521_vm2, %v509_v40  ;;  %v806_v40 = vsel %vm803_vm4, %v804_v24, %v805_v25 }
  0x7b   : > { %v916_v46 = vpack.c.bf16 %v808_v41, %v806_v40  ;;  %v1422_v22 = vsel %vm1409_vm5, %v1420_v63, %v1421_v1 }
  0x85   : > { %3779 = vmatmul.msk.bf16.gmra.mxu3 %vm521_vm2, %v340_v3  ;;  %v809_v3 = vrot.slane %v4305_v29, 2 }
  0x86   : > { %3771 = vmatmul.msk.bf16.gmra.mxu1 %vm521_vm2, %v332_v4  ;;  %v810_v4 = vrot.slane %v4308_v30, 2  ;;  %v1419_v30 = vsel %vm1409_vm5, %v1416_v16, %v1418_v17 }
  0x88   : > { %3763 = vmatmul.msk.bf16.gmra.mxu2 %vm521_vm2, %v518_v10  ;;  %v1116_v10 = vsel %vm1106_vm3, %v1113_v59, %v1115_v60  ;;  %v811_v25 = vsel %vm803_vm4, %v809_v3, %v810_v4  ;;  %v813_v26 = vsel %vm803_vm4, %v810_v4, %v812_v8  ;;  %v815_v59 = vrot.slane %v4333_v50, 2 }
  0x89   : > { %v1220_v27 = vpack.c.bf16 %v1116_v10, %v1114_v9  ;;  %v917_v37 = vpack.c.bf16 %v813_v26, %v811_v25  ;;  %v817_v60 = vrot.slane %v4336_v51, 2  ;;  %v1423_v3 = vrot.slane %v4336_v51, 4 }
  0x8a   : > { %3755 = vmatmul.msk.bf16.gmra.mxu0 %vm521_vm2, %v510_v11  ;;  %v1415_v11 = vrot.slane %v4305_v29, 4 }
  0x8c   : > { %v1417_v36 = vsel %vm1409_vm5, %v1415_v11, %v1416_v16  ;;  %v816_v11 = vsel %vm803_vm4, %v814_v58, %v815_v59  ;;  %v1426_v58 = vrot.slane %v4358_v6, 4 }
  0x8d   : > { %v1523_v38 = vpack.c.bf16 %v1419_v30, %v1417_v36  ;;  %v1125_v36 = vrot.slane %v4361_v7, 3 }
  0x93   : > { %v723_v44 = vpop.f32.mrf.mxu1 }
  0x95   : > { %3798 = vmatmul.msk.bf16.vlgmr.msrb.gmra.mxu3 %vm521_vm2, %v1219_v42  ;;  %v1117_v42 = vrot.slane %v4330_v49, 3 }
  0x96   : > { %3832 = vmatmul.msk.bf16.vlgmr.msrb.gmra.mxu1 %vm521_vm2, %v1824_v43  ;;  %v1118_v43 = vrot.slane %v4333_v50, 3 }
  0x97   : > { %v583_v15 = vpop.f32.mrf.mxu0 }
  0x98   : > { %3781 = vmatmul.msk.bf16.vlgmr.msrb.gmra.mxu2 %vm521_vm2, %v916_v46  ;;  %v763_v53 = vpop.f32.mrf.mxu3  ;;  %v4515_v57 = vadd.f32 %v723_v44, %v583_v15  ;;  %v1120_v44 = vrot.slane %v4336_v51, 3  ;;  %v1722_v46 = vrot.slane %v4330_v49, 5  ;;  %v1725_v15 = vrot.slane %v4336_v51, 5 }
  0x9a   : > { %3815 = vmatmul.msk.bf16.vlgmr.msrb.gmra.mxu0 %vm521_vm2, %v1522_v14  ;;  %v1723_v14 = vrot.slane %v4333_v50, 5  ;;  %v1424_v50 = vsel %vm1409_vm5, %v1421_v1, %v1423_v3 }
  0x9b   : > { %v623_v61 = vpop.f32.mrf.mxu2  ;;  %v725_v62 = vpop.f32.mrf.mxu1  ;;  %v1524_v25 = vpack.c.bf16 %v1424_v50, %v1422_v22  ;;  %v1128_v22 = vrot.slane %v4383_v32, 3  ;;  %v1130_v50 = vrot.slane %v4386_v33, 3 }
  0x9c   : > { %v4524_v2 = vadd.f32 %v763_v53, %v623_v61  ;;  %v1119_v61 = vsel %vm1106_vm3, %v1117_v42, %v1118_v43  ;;  %v1724_v4 = vsel %vm570_vm0, %v1722_v46, %v1723_v14  ;;  %v1726_v8 = vsel %vm570_vm0, %v1723_v14, %v1725_v15 }
  0x9d   : > { %v1826_v17 = vpack.c.bf16 %v1726_v8, %v1724_v4  ;;  %v1425_v14 = vrot.slane %v4355_v5, 4 }
  0x9f   : > { %v585_v12 = vpop.f32.mrf.mxu0 }
  0xa0   : > { %v765_v23 = vpop.f32.mrf.mxu3  ;;  %v4536_v24 = vadd.f32 %v725_v62, %v585_v12  ;;  %v1121_v62 = vsel %vm1106_vm3, %v1118_v43, %v1120_v44  ;;  %v818_v12 = vsel %vm803_vm4, %v815_v59, %v817_v60  ;;  %v819_v43 = vrot.slane %v4355_v5, 2 }
  0xa1   : > { %v1221_v16 = vpack.c.bf16 %v1121_v62, %v1119_v61  ;;  %v820_v44 = vrot.slane %v4358_v6, 2  ;;  %v1428_v59 = vrot.slane %v4361_v7, 4 }
  0xa3   : > { %v625_v35 = vpop.f32.mrf.mxu2  ;;  %v728_v29 = vpop.f32.mrf.mxu1 }
  0xa4   : > { %v4542_v31 = vadd.f32 %v765_v23, %v625_v35  ;;  %v918_v23 = vpack.c.bf16 %v818_v12, %v816_v11  ;;  %v1122_v35 = vrot.slane %v4355_v5, 3 }
  0xa5   : > { %3799 = vmatmul.msk.bf16.gmra.mxu3 %vm521_vm2, %v1220_v27 }
  0xa6   : > { %3833 = vmatmul.msk.bf16.gmra.mxu1 %vm521_vm2, %v1825_v34 }
  0xa7   : > { %v588_v39 = vpop.f32.mrf.mxu0 }
  0xa8   : > { %3782 = vmatmul.msk.bf16.gmra.mxu2 %vm521_vm2, %v917_v37  ;;  %v768_v40 = vpop.f32.mrf.mxu3  ;;  %v4547_v41 = vadd.f32 %v728_v29, %v588_v39  ;;  %v1123_v29 = vrot.slane %v4358_v6, 3  ;;  %v1728_v39 = vrot.slane %v4358_v6, 5  ;;  %v1429_v6 = vsel %vm1409_vm5, %v1426_v58, %v1428_v59 }
  0xaa   : > { %3816 = vmatmul.msk.bf16.gmra.mxu0 %vm521_vm2, %v1523_v38  ;;  %v1727_v38 = vrot.slane %v4355_v5, 5  ;;  %v1126_v46 = vsel %vm1106_vm3, %v1123_v29, %v1125_v36  ;;  %v824_v36 = vrot.slane %v4380_v28, 2 }
  0xab   : > { %v628_v45 = vpop.f32.mrf.mxu2  ;;  %v730_v13 = vpop.f32.mrf.mxu1 }
  0xac   : > { %v4556_v53 = vadd.f32 %v768_v40, %v628_v45  ;;  %v1730_v40 = vrot.slane %v4361_v7, 5  ;;  %v822_v45 = vrot.slane %v4361_v7, 2  ;;  %v1729_v60 = vsel %vm570_vm0, %v1727_v38, %v1728_v39 }
  0xae   : > { %v1731_v61 = vsel %vm570_vm0, %v1728_v39, %v1730_v40  ;;  %v823_v1 = vsel %vm803_vm4, %v820_v44, %v822_v45  ;;  %v1131_v39 = vsel %vm1106_vm3, %v1128_v22, %v1130_v50  ;;  %v1430_v40 = vrot.slane %v4380_v28, 4 }
  0xaf   : > { %v590_v0 = vpop.f32.mrf.mxu0  ;;  %v1827_v4 = vpack.c.bf16 %v1731_v61, %v1729_v60  ;;  %v1433_v45 = vrot.slane %v4386_v33, 4 }
  0xb0   : > { %v770_v9 = vpop.f32.mrf.mxu3  ;;  %v4568_v10 = vadd.f32 %v730_v13, %v590_v0  ;;  %v1124_v13 = vsel %vm1106_vm3, %v1122_v35, %v1123_v29  ;;  %v821_v0 = vsel %vm803_vm4, %v819_v43, %v820_v44  ;;  %v1735_v35 = vrot.slane %v4386_v33, 5 }
  0xb1   : > { %v1222_v3 = vpack.c.bf16 %v1126_v46, %v1124_v13  ;;  %v919_v11 = vpack.c.bf16 %v823_v1, %v821_v0  ;;  %v1431_v44 = vrot.slane %v4383_v32, 4 }
  0xb3   : > { %v630_v21 = vpop.f32.mrf.mxu2  ;;  %v733_v49 = vpop.f32.mrf.mxu1  ;;  %v1432_v0 = vsel %vm1409_vm5, %v1430_v40, %v1431_v44 }
  0xb4   : > { %v4574_v51 = vadd.f32 %v770_v9, %v630_v21  ;;  %v1427_v9 = vsel %vm1409_vm5, %v1425_v14, %v1426_v58 }
  0xb5   : > { %3800 = vmatmul.msk.bf16.gmra.mxu3 %vm521_vm2, %v1221_v16  ;;  %v1525_v12 = vpack.c.bf16 %v1429_v6, %v1427_v9  ;;  %v1132_v9 = vrot.slane %v4405_v54, 3  ;;  %v1133_v6 = vrot.slane %v4408_v55, 3 }
  0xb6   : > { %3834 = vmatmul.msk.bf16.gmra.mxu1 %vm521_vm2, %v1826_v17 }
  0xb7   : > { %v593_v26 = vpop.f32.mrf.mxu0 }
  0xb8   : > { %3783 = vmatmul.msk.bf16.gmra.mxu2 %vm521_vm2, %v918_v23  ;;  %v773_v27 = vpop.f32.mrf.mxu3  ;;  %v4579_v34 = vadd.f32 %v733_v49, %v593_v26  ;;  %v1127_v49 = vrot.slane %v4380_v28, 3  ;;  %v1732_v26 = vrot.slane %v4380_v28, 5 }
  0xba   : > { %3817 = vmatmul.msk.bf16.gmra.mxu0 %vm521_vm2, %v1524_v25  ;;  %v1129_v38 = vsel %vm1106_vm3, %v1127_v49, %v1128_v22  ;;  %v1738_v49 = vrot.slane %v4408_v55, 5  ;;  %v1740_v22 = vrot.slane %v4411_v56, 5 }
  0xbb   : > { %v633_v30 = vpop.f32.mrf.mxu2  ;;  %v735_v37 = vpop.f32.mrf.mxu1  ;;  %v1223_v60 = vpack.c.bf16 %v1131_v39, %v1129_v38  ;;  %v1438_v38 = vrot.slane %v4411_v56, 4 }
  0xbc   : > { %v4588_v42 = vadd.f32 %v773_v27, %v633_v30  ;;  %v1733_v27 = vrot.slane %v4383_v32, 5  ;;  %v825_v30 = vrot.slane %v4383_v32, 2  ;;  %v1434_v32 = vsel %vm1409_vm5, %v1431_v44, %v1433_v45 }
  0xbd   : > { %v1741_v40 = vsel %vm570_vm0, %v1738_v49, %v1740_v22 }
  0xbe   : > { %v1734_v13 = vsel %vm570_vm0, %v1732_v26, %v1733_v27  ;;  %v1736_v46 = vsel %vm570_vm0, %v1733_v27, %v1735_v35  ;;  %v826_v58 = vsel %vm803_vm4, %v824_v36, %v825_v30  ;;  %v832_v26 = vrot.slane %v4411_v56, 2 }
  0xbf   : > { %v595_v15 = vpop.f32.mrf.mxu0  ;;  %v1828_v61 = vpack.c.bf16 %v1736_v46, %v1734_v13  ;;  %v1134_v27 = vsel %vm1106_vm3, %v1132_v9, %v1133_v6  ;;  %v1435_v36 = vrot.slane %v4405_v54, 4  ;;  %v1742_v9 = vrot.slane %v4434_v18, 5 }
  0xc0   : > { %v775_v62 = vpop.f32.mrf.mxu3  ;;  %v4600_v63 = vadd.f32 %v735_v37, %v595_v15  ;;  %v827_v37 = vrot.slane %v4386_v33, 2 }
  0xc2   : > { %v828_v59 = vsel %vm803_vm4, %v825_v30, %v827_v37  ;;  %v1436_v37 = vrot.slane %v4408_v55, 4 }
  0xc3   : > { %v635_v8 = vpop.f32.mrf.mxu2  ;;  %v738_v5 = vpop.f32.mrf.mxu1  ;;  %v920_v1 = vpack.c.bf16 %v828_v59, %v826_v58 }
  0xc4   : > { %v4606_v7 = vadd.f32 %v775_v62, %v635_v8  ;;  %v1437_v59 = vsel %vm1409_vm5, %v1435_v36, %v1436_v37 }
  0xc5   : > { %3801 = vmatmul.msk.bf16.gmra.mxu3 %vm521_vm2, %v1222_v3  ;;  %v1526_v3 = vpack.c.bf16 %v1434_v32, %v1432_v0  ;;  %v1137_v32 = vrot.slane %v4434_v18, 3 }
  0xc6   : > { %3835 = vmatmul.msk.bf16.gmra.mxu1 %vm521_vm2, %v1827_v4 }
  0xc7   : > { %v598_v16 = vpop.f32.mrf.mxu0 }
  0xc8   : > { %3784 = vmatmul.msk.bf16.gmra.mxu2 %vm521_vm2, %v919_v11  ;;  %v778_v17 = vpop.f32.mrf.mxu3  ;;  %v4611_v21 = vadd.f32 %v738_v5, %v598_v16  ;;  %v1135_v11 = vrot.slane %v4411_v56, 3 }
  0xca   : > { %3818 = vmatmul.msk.bf16.gmra.mxu0 %vm521_vm2, %v1525_v12  ;;  %v1136_v35 = vsel %vm1106_vm3, %v1133_v6, %v1135_v11  ;;  %v1743_v6 = vrot.slane %v4437_v19, 5  ;;  %v1745_v11 = vrot.slane %v4440_v20, 5 }
  0xcb   : > { %v638_v23 = vpop.f32.mrf.mxu2  ;;  %v740_v25 = vpop.f32.mrf.mxu1  ;;  %v1224_v46 = vpack.c.bf16 %v1136_v35, %v1134_v27  ;;  %v1441_v27 = vrot.slane %v4437_v19, 4  ;;  %v1443_v35 = vrot.slane %v4440_v20, 4 }
  0xcc   : > { %v4620_v29 = vadd.f32 %v778_v17, %v638_v23  ;;  %v1737_v17 = vrot.slane %v4405_v54, 5  ;;  %v829_v23 = vrot.slane %v4405_v54, 2  ;;  %v1744_v36 = vsel %vm570_vm0, %v1742_v9, %v1743_v6  ;;  %v3865_v9 = vld [vmem:[%s5953_s3 + $0x4] sm:$0x7] }
  0xce   : > { %v1739_v39 = vsel %vm570_vm0, %v1737_v17, %v1738_v49  ;;  %v835_v17 = vrot.slane %v4437_v19, 2  ;;  %v837_v49 = vrot.slane %v4440_v20, 2 }
  0xcf   : > { %v600_v43 = vpop.f32.mrf.mxu0 }
  0xd0   : > { %v780_v14 = vpop.f32.mrf.mxu3  ;;  %v4632_v15 = vadd.f32 %v740_v25, %v600_v43  ;;  %v830_v25 = vrot.slane %v4408_v55, 2  ;;  %v1439_v55 = vsel %vm1409_vm5, %v1436_v37, %v1438_v38 }
  0xd2   : > { %v831_v45 = vsel %vm803_vm4, %v829_v23, %v830_v25  ;;  %v833_v13 = vsel %vm803_vm4, %v830_v25, %v832_v26  ;;  %v1440_v25 = vrot.slane %v4434_v18, 4 }
  0xd3   : > { %v640_v62 = vpop.f32.mrf.mxu2  ;;  %v743_v28 = vpop.f32.mrf.mxu1 }
  0xd4   : > { %v4638_v33 = vadd.f32 %v780_v14, %v640_v62  ;;  %v1829_v14 = vpack.c.bf16 %v1741_v40, %v1739_v39  ;;  %v838_v40 = vsel %vm803_vm4, %v835_v17, %v837_v49 }
  0xd5   : > { %3802 = vmatmul.msk.bf16.gmra.mxu3 %vm521_vm2, %v1223_v60  ;;  %v921_v60 = vpack.c.bf16 %v833_v13, %v831_v45 }
  0xd6   : > { %3836 = vmatmul.msk.bf16.gmra.mxu1 %vm521_vm2, %v1828_v61  ;;  %v1527_v61 = vpack.c.bf16 %v1439_v55, %v1437_v59 }
  0xd7   : > { %v603_v4 = vpop.f32.mrf.mxu0 }
  0xd8   : > { %3785 = vmatmul.msk.bf16.gmra.mxu2 %vm521_vm2, %v920_v1  ;;  %v783_v8 = vpop.f32.mrf.mxu3  ;;  %v4643_v5 = vadd.f32 %v743_v28, %v603_v4  ;;  %v1138_v1 = vrot.slane %v4437_v19, 3  ;;  %v1444_v19 = vsel %vm1409_vm5, %v1441_v27, %v1443_v35 }
  0xda   : > { %3819 = vmatmul.msk.bf16.gmra.mxu0 %vm521_vm2, %v1526_v3  ;;  %v1140_v3 = vrot.slane %v4440_v20, 3  ;;  %v1139_v22 = vsel %vm1106_vm3, %v1137_v32, %v1138_v1 }
  0xdb   : > { %v643_v12 = vpop.f32.mrf.mxu2  ;;  %v745_v16 = vpop.f32.mrf.mxu1 }
  0xdc   : > { %v4652_v50 = vadd.f32 %v783_v8, %v643_v12  ;;  %v1141_v23 = vsel %vm1106_vm3, %v1138_v1, %v1140_v3  ;;  %v1747_v1 = vrot.slane %v4463_v47, 5  ;;  %v1748_v3 = vrot.slane %v4466_v48, 5 }
  0xde   : > { %v1749_v35 = vsel %vm570_vm0, %v1747_v1, %v1748_v3  ;;  %v4127_v1 = vld [vmem:[%s4274_s6 + $0xc8] sm:$0xff] }
  0xdf   : > { %v605_v30 = vpop.f32.mrf.mxu0 }
  0xe0   : > { %v785_v43 = vpop.f32.mrf.mxu3  ;;  %v4664_v44 = vadd.f32 %v745_v16, %v605_v30  ;;  %v834_v16 = vrot.slane %v4434_v18, 2  ;;  %v1746_v30 = vsel %vm570_vm0, %v1743_v6, %v1745_v11  ;;  %v839_v6 = vrot.slane %v4463_v47, 2 }
  0xe1   : > { %v1830_v45 = vpack.c.bf16 %v1746_v30, %v1744_v36  ;;  %v840_v11 = vrot.slane %v4466_v48, 2 }
  0xe2   : > { %v836_v39 = vsel %vm803_vm4, %v834_v16, %v835_v17  ;;  %v842_v16 = vrot.slane %v4469_v52, 2  ;;  %v2671_v17 = vsel %vm570_vm0, %v3865_v9, 0 }
  0xe3   : > { %v645_v58 = vpop.f32.mrf.mxu2  ;;  %v748_v54 = vpop.f32.mrf.mxu1  ;;  %2680 = vmatpush.bf16.msra.mxu3 %v2671_v17  ;;  %v1753_v17 = vrot.slane %v4127_v1, 5 }
  0xe4   : > { %v4670_v56 = vadd.f32 %v785_v43, %v645_v58  ;;  %v1225_v43 = vpack.c.bf16 %v1141_v23, %v1139_v22  ;;  %v1445_v23 = vrot.slane %v4463_v47, 4 }
  0xe5   : > { %3803 = vmatmul.msk.bf16.gmra.mxu3 %vm521_vm2, %v1224_v46  ;;  %v1442_v46 = vsel %vm1409_vm5, %v1440_v25, %v1441_v27  ;;  %v1448_v27 = vrot.slane %v4469_v52, 4 }
  0xe6   : > { %3837 = vmatmul.msk.bf16.gmra.mxu1 %vm521_vm2, %v1829_v14  ;;  %v922_v14 = vpack.c.bf16 %v838_v40, %v836_v39  ;;  %v1528_v58 = vpack.c.bf16 %v1444_v19, %v1442_v46  ;;  %v841_v39 = vsel %vm803_vm4, %v839_v6, %v840_v11  ;;  %v843_v40 = vsel %vm803_vm4, %v840_v11, %v842_v16  ;;  %v2539_v19 = vld [vmem:[%s5953_s3] sm:$0x7] }
  0xe7   : > { %v608_v62 = vpop.f32.mrf.mxu0  ;;  %v923_v46 = vpack.c.bf16 %v843_v40, %v841_v39  ;;  %v1451_v39 = vrot.slane %v4127_v1, 4 }
  0xe8   : > { %3786 = vmatmul.msk.bf16.gmra.mxu2 %vm521_vm2, %v921_v60  ;;  %v788_v28 = vpop.f32.mrf.mxu3  ;;  %v4675_v0 = vadd.f32 %v748_v54, %v608_v62  ;;  %v1142_v60 = vrot.slane %v4463_v47, 3  ;;  %v1145_v62 = vrot.slane %v4469_v52, 3 }
  0xea   : > { %3820 = vmatmul.msk.bf16.gmra.mxu0 %vm521_vm2, %v1527_v61  ;;  %v1143_v61 = vrot.slane %v4466_v48, 3 }
  0xeb   : > { %v648_v4 = vpop.f32.mrf.mxu2  ;;  %v750_v8 = vpop.f32.mrf.mxu1 }
  0xec   : > { %v4684_v12 = vadd.f32 %v788_v28, %v648_v4  ;;  %v1750_v4 = vrot.slane %v4469_v52, 5  ;;  %v1144_v49 = vsel %vm1106_vm3, %v1142_v60, %v1143_v61  ;;  %v1146_v22 = vsel %vm1106_vm3, %v1143_v61, %v1145_v62 }
  0xee   : > { %v1751_v36 = vsel %vm570_vm0, %v1748_v3, %v1750_v4  ;;  %v1148_v3 = vrot.slane %v4127_v1, 3  ;;  %v4128_v4 = vld [vmem:[%s4274_s6 + $0xd0] sm:$0x3f] }
  0xef   : > { %v610_v26 = vpop.f32.mrf.mxu0  ;;  %v1150_v9 = vrot.slane %v4128_v4, 3  ;;  %v1453_v40 = vrot.slane %v4128_v4, 4 }
  0xf0   : > { %v790_v37 = vpop.f32.mrf.mxu3  ;;  %v4696_v38 = vadd.f32 %v750_v8, %v610_v26  ;;  %v1446_v26 = vrot.slane %v4466_v48, 4 }
  0xf2   : > { %v1449_v48 = vsel %vm1409_vm5, %v1446_v26, %v1448_v27 }
  0xf3   : > { %v650_v13 = vpop.f32.mrf.mxu2  ;;  %v753_v18 = vpop.f32.mrf.mxu1 }
  0xf4   : > { %v4702_v20 = vadd.f32 %v790_v37, %v650_v13 }
  0xf5   : > { %3804 = vmatmul.msk.bf16.gmra.mxu3 %vm521_vm2, %v1225_v43  ;;  %v1226_v43 = vpack.c.bf16 %v1146_v22, %v1144_v49  ;;  %v1755_v49 = vrot.slane %v4128_v4, 5 }
  0xf6   : > { %3838 = vmatmul.msk.bf16.gmra.mxu1 %vm521_vm2, %v1830_v45  ;;  %v1831_v45 = vpack.c.bf16 %v1751_v36, %v1749_v35  ;;  %v1151_v35 = vsel %vm1106_vm3, %v1148_v3, %v1150_v9  ;;  %v4130_v9 = vld [vmem:[%s4274_s6 + $0xe0] sm:$0xff] }
  0xf7   : > { %v613_v54 = vpop.f32.mrf.mxu0 }
  0xf8   : > { %3787 = vmatmul.msk.bf16.gmra.mxu2 %vm521_vm2, %v922_v14  ;;  %v793_v59 = vpop.f32.mrf.mxu3  ;;  %v4707_v55 = vadd.f32 %v753_v18, %v613_v54  ;;  %v1447_v18 = vsel %vm1409_vm5, %v1445_v23, %v1446_v26  ;;  %v2771_v14 = vsel %vm570_vm0, %v2539_v19, 0  ;;  %v3966_v54 = vld [vmem:[%s5953_s3 + $0x8] sm:$0x7]  ;;  %v847_v26 = vrot.slane %v4128_v4, 2 }
  0xf9   : > { %2780 = vmatpush.bf16.msra.mxu0 %v2771_v14  ;;  %v2873_v60 = vsel %vm570_vm0, %v3966_v54, 0 }
  0xfa   : > { %3821 = vmatmul.msk.bf16.gmra.mxu0 %vm521_vm2, %v1528_v58  ;;  %v1529_v58 = vpack.c.bf16 %v1449_v48, %v1447_v18  ;;  %2882 = vmatpush.bf16.msra.mxu1 %v2873_v60 }
  0xfb   : > { %v653_v28 = vpop.f32.mrf.mxu2  ;;  %v755_v32 = vpop.f32.mrf.mxu1 }
  0xfc   : > { %v4716_v8 = vadd.f32 %v793_v59, %v653_v28  ;;  %v4126_v28 = vld [vmem:[%s4274_s6 + $0xc0] sm:$0xff] }
  0xfd   : > { %v1752_v16 = vrot.slane %v4126_v28, 5  ;;  %v844_v23 = vrot.slane %v4126_v28, 2  ;;  %v1450_v36 = vrot.slane %v4126_v28, 4 }
  0xff   : > { %v615_v25 = vpop.f32.mrf.mxu0  ;;  %v1452_v54 = vsel %vm1409_vm5, %v1450_v36, %v1451_v39  ;;  %v850_v36 = vrot.slane %v4130_v9, 2 }
 0x100   : > { %v795_v30 = vpop.f32.mrf.mxu3  ;;  %v4732_v37 = vadd.f32 %v755_v32, %v615_v25  ;;  %v1147_v32 = vrot.slane %v4126_v28, 3  ;;  %v845_v25 = vrot.slane %v4127_v1, 2 }
 0x102   : > { %v1149_v27 = vsel %vm1106_vm3, %v1147_v32, %v1148_v3  ;;  %v846_v18 = vsel %vm803_vm4, %v844_v23, %v845_v25  ;;  %v848_v48 = vsel %vm803_vm4, %v845_v25, %v847_v26  ;;  %v4129_v3 = vld [vmem:[%s4274_s6 + $0xd8] sm:$0xff]  ;;  %v1758_v25 = vrot.slane %v4130_v9, 5 }
 0x103   : > { %v655_v47 = vpop.f32.mrf.mxu2  ;;  %v758_v13 = vpop.f32.mrf.mxu1  ;;  %v1152_v4 = vrot.slane %v4129_v3, 3  ;;  %v1757_v23 = vrot.slane %v4129_v3, 5 }
 0x104   : > { %v4738_v52 = vadd.f32 %v795_v30, %v655_v47 }
 0x105   : > { %3805 = vmatmul.msk.bf16.gmra.mxu3 %vm521_vm2, %v1226_v43  ;;  %v1754_v43 = vsel %vm570_vm0, %v1752_v16, %v1753_v17 }
 0x106   : > { %3839 = vmatmul.msk.bf16.gmra.mxu1 %vm521_vm2, %v1831_v45  ;;  %v1756_v45 = vsel %vm570_vm0, %v1753_v17, %v1755_v49 }
 0x107   : > { %v618_v59 = vpop.f32.mrf.mxu0  ;;  %v1832_v19 = vpack.c.bf16 %v1756_v45, %v1754_v43  ;;  %v1455_v45 = vrot.slane %v4129_v3, 4 }
 0x108   : > { %3788 = vmatmul.msk.bf16.gmra.mxu2 %vm521_vm2, %v923_v46  ;;  %v798_v61 = vpop.f32.mrf.mxu3  ;;  %v4751_v62 = vadd.f32 %v758_v13, %v618_v59  ;;  %v1227_v46 = vpack.c.bf16 %v1151_v35, %v1149_v27  ;;  %v1454_v59 = vsel %vm1409_vm5, %v1451_v39, %v1453_v40  ;;  %v849_v35 = vrot.slane %v4129_v3, 2 }
 0x109   : > { %v1530_v28 = vpack.c.bf16 %v1454_v59, %v1452_v54 }
 0x10a   : > { %3822 = vmatmul.msk.bf16.gmra.mxu0 %vm521_vm2, %v1529_v58 }
 0x10b   : > { %v658_v6 = vpop.f32.mrf.mxu2  ;;  %v760_v11 = vpop.f32.mrf.mxu1 }
 0x10c   : > { %v4757_v22 = vadd.f32 %v798_v61, %v658_v6  ;;  %v924_v61 = vpack.c.bf16 %v848_v48, %v846_v18  ;;  %v1153_v6 = vrot.slane %v4130_v9, 3  ;;  %v1456_v18 = vrot.slane %v4130_v9, 4 }
 0x10e   : > { %v1154_v40 = vsel %vm1106_vm3, %v1152_v4, %v1153_v6  ;;  %v1457_v9 = vsel %vm1409_vm5, %v1455_v45, %v1456_v18 }
 0x10f   : > { %v620_v30 = vpop.f32.mrf.mxu0 }
 0x110   : > { %v800_v47 = vpop.f32.mrf.mxu3  ;;  %v4763_v13 = vadd.f32 %v760_v11, %v620_v30  ;;  %v4131_v11 = vld [vmem:[%s4274_s6 + $0xe8] sm:$0x3f] }
 0x111   : > { %v1155_v16 = vrot.slane %v4131_v11, 3  ;;  %v1760_v26 = vrot.slane %v4131_v11, 5  ;;  %v852_v30 = vrot.slane %v4131_v11, 2  ;;  %v1458_v48 = vrot.slane %v4131_v11, 4 }
 0x113   : > { %v660_v14 = vpop.f32.mrf.mxu2  ;;  %v1902_v58 = vpop.f32.mrf.mxu1  ;;  %v1156_v43 = vsel %vm1106_vm3, %v1153_v6, %v1155_v16  ;;  %v853_v59 = vsel %vm803_vm4, %v850_v36, %v852_v30  ;;  %v1459_v6 = vsel %vm1409_vm5, %v1456_v18, %v1458_v48  ;;  %v4134_v30 = vld [vmem:[%s4274_s6 + $0x100] sm:$0x3f] }
 0x114   : > { %v4769_v60 = vadd.f32 %v800_v47, %v660_v14  ;;  %v1765_v48 = vrot.slane %v4134_v30, 5 }
 0x115   : > { %3806 = vmatmul.msk.bf16.gmra.mxu3 %vm521_vm2, %v1227_v46  ;;  %v1759_v46 = vsel %vm570_vm0, %v1757_v23, %v1758_v25 }
 0x116   : > { %3840 = vmatmul.msk.bf16.gmra.mxu1 %vm521_vm2, %v1832_v19  ;;  %v1761_v19 = vsel %vm570_vm0, %v1758_v25, %v1760_v26 }
 0x117   : > { %v1600_v32 = vpop.f32.mrf.mxu0 }
 0x118   : > { %3789 = vmatmul.msk.bf16.gmra.mxu2 %vm521_vm2, %v924_v61  ;;  %v1297_v1 = vpop.f32.mrf.mxu3  ;;  %v1228_v61 = vpack.c.bf16 %v1156_v43, %v1154_v40 }
 0x11a   : > { %3823 = vmatmul.msk.bf16.gmra.mxu0 %vm521_vm2, %v1530_v28 }
 0x11b   : > { %v994_v17 = vpop.f32.mrf.mxu2  ;;  %v1904_v49 = vpop.f32.mrf.mxu1 }
 0x11c   : > { %v1074_v27 = vadd.f32 %v994_v17, %v4515_v57  ;;  %v851_v57 = vsel %vm803_vm4, %v849_v35, %v850_v36  ;;  %v1531_v17 = vpack.c.bf16 %v1459_v6, %v1457_v9 }
 0x11e   : > { %v1377_v39 = vadd.f32 %v1297_v1, %v1074_v27  ;;  %v1833_v1 = vpack.c.bf16 %v1761_v19, %v1759_v46  ;;  %v4132_v27 = vld [vmem:[%s4274_s6 + $0xf0] sm:$0xff] }
 0x11f   : > { %v1602_v47 = vpop.f32.mrf.mxu0  ;;  %v1157_v35 = vrot.slane %v4132_v27, 3  ;;  %v1762_v45 = vrot.slane %v4132_v27, 5  ;;  %v854_v46 = vrot.slane %v4132_v27, 2 }
 0x120   : > { %v1680_v14 = vadd.f32 %v1600_v32, %v1377_v39  ;;  %v1299_v54 = vpop.f32.mrf.mxu3  ;;  %v925_v32 = vpack.c.bf16 %v853_v59, %v851_v57  ;;  %v1160_v39 = vrot.slane %v4134_v30, 3  ;;  %v1460_v59 = vrot.slane %v4132_v27, 4 }
 0x122   : > { %v4785_v28 = vadd.f32 %v1902_v58, %v1680_v14  ;;  %v857_v14 = vrot.slane %v4134_v30, 2 }
 0x123   : > { %v996_v4 = vpop.f32.mrf.mxu2  ;;  %v1907_v3 = vpop.f32.mrf.mxu1 }
 0x124   : > { %v1075_v11 = vadd.f32 %v996_v4, %v4536_v24  ;;  %v4133_v24 = vld [vmem:[%s4274_s6 + $0xf8] sm:$0xff]  ;;  %v1463_v4 = vrot.slane %v4134_v30, 4 }
 0x125   : > { %3807 = vmatmul.msk.bf16.gmra.mxu3 %vm521_vm2, %v1228_v61  ;;  %v1158_v36 = vrot.slane %v4133_v24, 3  ;;  %v1763_v18 = vrot.slane %v4133_v24, 5  ;;  %v855_v19 = vrot.slane %v4133_v24, 2 }
 0x126   : > { %v1378_v16 = vadd.f32 %v1299_v54, %v1075_v11  ;;  %3841 = vmatmul.msk.bf16.gmra.mxu1 %vm521_vm2, %v1833_v1  ;;  %v1461_v1 = vrot.slane %v4133_v24, 4 }
 0x127   : > { %v1605_v58 = vpop.f32.mrf.mxu0  ;;  %v1159_v54 = vsel %vm1106_vm3, %v1157_v35, %v1158_v36  ;;  %v1161_v57 = vsel %vm1106_vm3, %v1158_v36, %v1160_v39  ;;  %v1764_v9 = vsel %vm570_vm0, %v1762_v45, %v1763_v18  ;;  %v1766_v6 = vsel %vm570_vm0, %v1763_v18, %v1765_v48 }
 0x128   : > { %v1681_v23 = vadd.f32 %v1602_v47, %v1378_v16  ;;  %3790 = vmatmul.msk.bf16.gmra.mxu2 %vm521_vm2, %v925_v32  ;;  %v1302_v25 = vpop.f32.mrf.mxu3  ;;  %v858_v16 = vsel %vm803_vm4, %v855_v19, %v857_v14  ;;  %v1462_v24 = vsel %vm1409_vm5, %v1460_v59, %v1461_v1  ;;  %v1464_v36 = vsel %vm1409_vm5, %v1461_v1, %v1463_v4  ;;  %v4826_v14 = vld [vmem:[%s4274_s6 + $0x118] sm:$0x3f] }
 0x12a   : > { %v4793_v26 = vadd.f32 %v1904_v49, %v1681_v23  ;;  %3824 = vmatmul.msk.bf16.gmra.mxu0 %vm521_vm2, %v1531_v17  ;;  %v1229_v17 = vpack.c.bf16 %v1161_v57, %v1159_v54 }
 0x12b   : > { %v999_v40 = vpop.f32.mrf.mxu2  ;;  %v1909_v43 = vpop.f32.mrf.mxu1 }
 0x12c   : > { %v1076_v47 = vadd.f32 %v999_v40, %v4547_v41  ;;  %v856_v41 = vsel %vm803_vm4, %v854_v46, %v855_v19  ;;  %v1532_v40 = vpack.c.bf16 %v1464_v36, %v1462_v24  ;;  %v4822_v46 = vld [vmem:[%s4274_s6 + $0x110] sm:$0xff] }
 0x12d   : > { %v1163_v19 = vrot.slane %v4822_v46, 3 }
 0x12e   : > { %v1379_v49 = vadd.f32 %v1302_v25, %v1076_v47  ;;  %v1834_v25 = vpack.c.bf16 %v1766_v6, %v1764_v9  ;;  %v4818_v47 = vld [vmem:[%s4274_s6 + $0x108] sm:$0xff]  ;;  %v860_v9 = vrot.slane %v4822_v46, 2  ;;  %v862_v6 = vrot.slane %v4826_v14, 2 }
 0x12f   : > { %v1607_v61 = vpop.f32.mrf.mxu0  ;;  %v1767_v59 = vrot.slane %v4818_v47, 5  ;;  %v859_v4 = vrot.slane %v4818_v47, 2 }
 0x130   : > { %v1682_v11 = vadd.f32 %v1605_v58, %v1379_v49  ;;  %v1304_v32 = vpop.f32.mrf.mxu3  ;;  %v926_v58 = vpack.c.bf16 %v858_v16, %v856_v41  ;;  %v1165_v49 = vrot.slane %v4826_v14, 3  ;;  %v1465_v16 = vrot.slane %v4818_v47, 4 }
 0x132   : > { %v4806_v23 = vadd.f32 %v1907_v3, %v1682_v11  ;;  %v1166_v41 = vsel %vm1106_vm3, %v1163_v19, %v1165_v49 }
 0x133   : > { %v1001_v35 = vpop.f32.mrf.mxu2  ;;  %v1912_v27 = vpop.f32.mrf.mxu1 }
 0x134   : > { %v1077_v30 = vadd.f32 %v1001_v35, %v4568_v10  ;;  %v1162_v10 = vrot.slane %v4818_v47, 3  ;;  %v1468_v35 = vrot.slane %v4826_v14, 4 }
 0x135   : > { %3808 = vmatmul.msk.bf16.gmra.mxu3 %vm521_vm2, %v1229_v17 }
 0x136   : > { %v1380_v39 = vadd.f32 %v1304_v32, %v1077_v30  ;;  %3842 = vmatmul.msk.bf16.gmra.mxu1 %vm521_vm2, %v1834_v25  ;;  %v1164_v32 = vsel %vm1106_vm3, %v1162_v10, %v1163_v19  ;;  %v1466_v25 = vrot.slane %v4822_v46, 4 }
 0x137   : > { %v1610_v3 = vpop.f32.mrf.mxu0 }
 0x138   : > { %v1683_v45 = vadd.f32 %v1607_v61, %v1380_v39  ;;  %3791 = vmatmul.msk.bf16.gmra.mxu2 %vm521_vm2, %v926_v58  ;;  %v1307_v18 = vpop.f32.mrf.mxu3  ;;  %v1770_v61 = vrot.slane %v4826_v14, 5  ;;  %v861_v58 = vsel %vm803_vm4, %v859_v4, %v860_v9  ;;  %v863_v39 = vsel %vm803_vm4, %v860_v9, %v862_v6  ;;  %v4857_v6 = vld [vmem:[%s4274_s6 + $0x120] sm:$0xff] }
 0x139   : > { %v1467_v49 = vsel %vm1409_vm5, %v1465_v16, %v1466_v25 }
 0x13a   : > { %v4814_v48 = vadd.f32 %v1909_v43, %v1683_v45  ;;  %3825 = vmatmul.msk.bf16.gmra.mxu0 %vm521_vm2, %v1532_v40  ;;  %v1768_v43 = vrot.slane %v4822_v46, 5  ;;  %v1230_v40 = vpack.c.bf16 %v1166_v41, %v1164_v32  ;;  %v4865_v41 = vld [vmem:[%s4274_s6 + $0x130] sm:$0x3f] }
 0x13b   : > { %v1004_v54 = vpop.f32.mrf.mxu2  ;;  %v1914_v57 = vpop.f32.mrf.mxu1  ;;  %v1170_v16 = vrot.slane %v4865_v41, 3 }
 0x13c   : > { %v1078_v1 = vadd.f32 %v1004_v54, %v4579_v34  ;;  %v1769_v34 = vsel %vm570_vm0, %v1767_v59, %v1768_v43  ;;  %v1771_v24 = vsel %vm570_vm0, %v1768_v43, %v1770_v61  ;;  %v1469_v54 = vsel %vm1409_vm5, %v1466_v25, %v1468_v35 }
 0x13d   : > { %v1533_v61 = vpack.c.bf16 %v1469_v54, %v1467_v49  ;;  %v1772_v35 = vrot.slane %v4857_v6, 5 }
 0x13e   : > { %v1381_v11 = vadd.f32 %v1307_v18, %v1078_v1  ;;  %v1835_v18 = vpack.c.bf16 %v1771_v24, %v1769_v34  ;;  %v1775_v34 = vrot.slane %v4865_v41, 5 }
 0x13f   : > { %v1612_v17 = vpop.f32.mrf.mxu0 }
 0x140   : > { %v1684_v36 = vadd.f32 %v1610_v3, %v1381_v11  ;;  %v1309_v30 = vpop.f32.mrf.mxu3  ;;  %v927_v3 = vpack.c.bf16 %v863_v39, %v861_v58  ;;  %v4861_v11 = vld [vmem:[%s4274_s6 + $0x128] sm:$0xff]  ;;  %v867_v58 = vrot.slane %v4865_v41, 2 }
 0x141   : > { %5965 = vst [vmem:[#allocation3_spill] sm:$0xff] %v4861_v11  ;;  %v1168_v32 = vrot.slane %v4861_v11, 3  ;;  %v1471_v54 = vrot.slane %v4861_v11, 4 }
 0x142   : > { %v4845_v45 = vadd.f32 %v1912_v27, %v1684_v36  ;;  %v864_v36 = vrot.slane %v4857_v6, 2 }
 0x143   : > { %v1006_v10 = vpop.f32.mrf.mxu2  ;;  %v1917_v19 = vpop.f32.mrf.mxu1 }
 0x144   : > { %v1079_v59 = vadd.f32 %v1006_v10, %v4600_v63  ;;  %v1167_v63 = vrot.slane %v4857_v6, 3  ;;  %v1470_v10 = vrot.slane %v4857_v6, 4 }
 0x145   : > { %3809 = vmatmul.msk.bf16.gmra.mxu3 %vm521_vm2, %v1230_v40 }
 0x146   : > { %v1382_v43 = vadd.f32 %v1309_v30, %v1079_v59  ;;  %3843 = vmatmul.msk.bf16.gmra.mxu1 %vm521_vm2, %v1835_v18  ;;  %v865_v30 = vrot.slane %v4861_v11, 2  ;;  %v1169_v40 = vsel %vm1106_vm3, %v1167_v63, %v1168_v32  ;;  %v1171_v18 = vsel %vm1106_vm3, %v1168_v32, %v1170_v16 }
 0x147   : > { %v1615_v27 = vpop.f32.mrf.mxu0  ;;  %v1473_v59 = vrot.slane %v4865_v41, 4  ;;  %v1231_v63 = vpack.c.bf16 %v1171_v18, %v1169_v40  ;;  %v4896_v40 = vld [vmem:[%s4274_s6 + $0x138] sm:$0xff]  ;;  %v4900_v18 = vld [vmem:[%s4274_s6 + $0x140] sm:$0xff] }
 0x148   : > { %v1685_v1 = vadd.f32 %v1612_v17, %v1382_v43  ;;  %3792 = vmatmul.msk.bf16.gmra.mxu2 %vm521_vm2, %v927_v3  ;;  %v1312_v4 = vpop.f32.mrf.mxu3  ;;  %5966 = vst [vmem:[#allocation4_spill] sm:$0xff] %v4896_v40 }
 0x149   : > { %5967 = vst [vmem:[#allocation5_spill] sm:$0xff] %v4900_v18 }
 0x14a   : > { %v4853_v9 = vadd.f32 %v1914_v57, %v1685_v1  ;;  %3826 = vmatmul.msk.bf16.gmra.mxu0 %vm521_vm2, %v1533_v61  ;;  %v1773_v57 = vrot.slane %v4861_v11, 5  ;;  %v866_v1 = vsel %vm803_vm4, %v864_v36, %v865_v30  ;;  %v1472_v11 = vsel %vm1409_vm5, %v1470_v10, %v1471_v54 }
 0x14b   : > { %v1009_v17 = vpop.f32.mrf.mxu2  ;;  %v1919_v25 = vpop.f32.mrf.mxu1  ;;  %v1173_v10 = vrot.slane %v4900_v18, 3 }
 0x14c   : > { %v1080_v24 = vadd.f32 %v1009_v17, %v4611_v21  ;;  %v1774_v21 = vsel %vm570_vm0, %v1772_v35, %v1773_v57  ;;  %v1776_v3 = vsel %vm570_vm0, %v1773_v57, %v1775_v34  ;;  %v1474_v35 = vsel %vm1409_vm5, %v1471_v54, %v1473_v59 }
 0x14d   : > { %v1836_v32 = vpack.c.bf16 %v1776_v3, %v1774_v21  ;;  %v1534_v36 = vpack.c.bf16 %v1474_v35, %v1472_v11  ;;  %v4904_v11 = vld [vmem:[%s4274_s6 + $0x148] sm:$0x3f]  ;;  %v1778_v21 = vrot.slane %v4900_v18, 5  ;;  %v1475_v35 = vrot.slane %v4896_v40, 4 }
 0x14e   : > { %v1383_v39 = vadd.f32 %v1312_v4, %v1080_v24  ;;  %v868_v4 = vsel %vm803_vm4, %v865_v30, %v867_v58  ;;  %5968 = vst [vmem:[#allocation6_spill] sm:$0xff] %v4904_v11  ;;  %v1175_v54 = vrot.slane %v4904_v11, 3  ;;  %v1780_v3 = vrot.slane %v4904_v11, 5 }
 0x14f   : > { %v1617_v49 = vpop.f32.mrf.mxu0 }
 0x150   : > { %v1686_v43 = vadd.f32 %v1615_v27, %v1383_v39  ;;  %v1314_v61 = vpop.f32.mrf.mxu3  ;;  %v928_v27 = vpack.c.bf16 %v868_v4, %v866_v1  ;;  %v870_v1 = vrot.slane %v4900_v18, 2  ;;  %v872_v4 = vrot.slane %v4904_v11, 2 }
 0x152   : > { %v4884_v17 = vadd.f32 %v1917_v19, %v1686_v43 }
 0x153   : > { %v1011_v16 = vpop.f32.mrf.mxu2  ;;  %v1922_v24 = vpop.f32.mrf.mxu1 }
 0x154   : > { %v1081_v57 = vadd.f32 %v1011_v16, %v4632_v15  ;;  %v1172_v15 = vrot.slane %v4896_v40, 3  ;;  %v1176_v16 = vsel %vm1106_vm3, %v1173_v10, %v1175_v54 }
 0x155   : > { %3810 = vmatmul.msk.bf16.gmra.mxu3 %vm521_vm2, %v1231_v63 }
 0x156   : > { %v1384_v34 = vadd.f32 %v1314_v61, %v1081_v57  ;;  %3844 = vmatmul.msk.bf16.gmra.mxu1 %vm521_vm2, %v1836_v32  ;;  %v869_v61 = vrot.slane %v4896_v40, 2  ;;  %v1174_v32 = vsel %vm1106_vm3, %v1172_v15, %v1173_v10  ;;  %v873_v15 = vsel %vm803_vm4, %v870_v1, %v872_v4  ;;  %v4941_v4 = vld [vmem:[%s4274_s6 + $0x150] sm:$0xff] }
 0x157   : > { %v1620_v19 = vpop.f32.mrf.mxu0  ;;  %v1232_v10 = vpack.c.bf16 %v1176_v16, %v1174_v32  ;;  %5971 = vst [vmem:[#allocation9_spill] sm:$0xff] %v4941_v4  ;;  %v4945_v32 = vld [vmem:[%s4274_s6 + $0x158] sm:$0xff] }
 0x158   : > { %v1687_v30 = vadd.f32 %v1617_v49, %v1384_v34  ;;  %3793 = vmatmul.msk.bf16.gmra.mxu2 %vm521_vm2, %v928_v27  ;;  %v1317_v58 = vpop.f32.mrf.mxu3  ;;  %v1476_v27 = vrot.slane %v4900_v18, 4  ;;  %v1478_v34 = vrot.slane %v4904_v11, 4  ;;  %5972 = vst [vmem:[#allocation10_spill] sm:$0xff] %v4945_v32 }
 0x15a   : > { %v4892_v39 = vadd.f32 %v1919_v25, %v1687_v30  ;;  %3827 = vmatmul.msk.bf16.gmra.mxu0 %vm521_vm2, %v1534_v36  ;;  %v1777_v25 = vrot.slane %v4896_v40, 5  ;;  %v1781_v36 = vsel %vm570_vm0, %v1778_v21, %v1780_v3 }
 0x15b   : > { %v1014_v49 = vpop.f32.mrf.mxu2  ;;  %v4907_v59 = vpop.f32.mrf.mxu1 }
 0x15c   : > { %5969 = vst [vmem:[#allocation7_spill] sm:$0xff] %v4907_v59  ;;  %v1082_v43 = vadd.f32 %v1014_v49, %v4643_v5  ;;  %v1779_v5 = vsel %vm570_vm0, %v1777_v25, %v1778_v21  ;;  %v1477_v25 = vsel %vm1409_vm5, %v1475_v35, %v1476_v27  ;;  %v1479_v21 = vsel %vm1409_vm5, %v1476_v27, %v1478_v34 }
 0x15d   : > { %v1782_v34 = vrot.slane %v4941_v4, 5 }
 0x15e   : > { %v1385_v63 = vadd.f32 %v1317_v58, %v1082_v43  ;;  %v871_v58 = vsel %vm803_vm4, %v869_v61, %v870_v1  ;;  %v1837_v43 = vpack.c.bf16 %v1781_v36, %v1779_v5  ;;  %v1535_v61 = vpack.c.bf16 %v1479_v21, %v1477_v25 }
 0x15f   : > { %v4919_v57 = vpop.f32.mrf.mxu0  ;;  %v929_v3 = vpack.c.bf16 %v873_v15, %v871_v58  ;;  %v1783_v5 = vrot.slane %v4945_v32, 5  ;;  %v874_v58 = vrot.slane %v4941_v4, 2  ;;  %v875_v15 = vrot.slane %v4945_v32, 2 }
 0x160   : > { %5970 = vst [vmem:[#allocation8_spill] sm:$0xff] %v4919_v57  ;;  %v1688_v30 = vadd.f32 %v1620_v19, %v1385_v63  ;;  %v4925_v49 = vpop.f32.mrf.mxu3  ;;  %v1177_v63 = vrot.slane %v4941_v4, 3 }
 0x162   : > { %v4929_v54 = vadd.f32 %v1922_v24, %v1688_v30 }
 0x163   : > { %v1016_v59 = vpop.f32.mrf.mxu2  ;;  %v1927_v57 = vpop.f32.mrf.mxu1 }
 0x164   : > { %v4934_v19 = vadd.f32 %v1016_v59, %v4664_v44  ;;  %v1178_v44 = vrot.slane %v4945_v32, 3  ;;  %v4949_v59 = vld [vmem:[%s4274_s6 + $0x160] sm:$0x3f] }
 0x165   : > { %3811 = vmatmul.msk.bf16.gmra.mxu3 %vm521_vm2, %v1232_v10  ;;  %5973 = vst [vmem:[#allocation11_spill] sm:$0xff] %v4949_v59  ;;  %v1180_v16 = vrot.slane %v4949_v59, 3  ;;  %v1785_v36 = vrot.slane %v4949_v59, 5  ;;  %v877_v10 = vrot.slane %v4949_v59, 2  ;;  %v1483_v11 = vrot.slane %v4949_v59, 4 }
 0x166   : > { %3845 = vmatmul.msk.bf16.gmra.mxu1 %vm521_vm2, %v1837_v43  ;;  %v1179_v25 = vsel %vm1106_vm3, %v1177_v63, %v1178_v44 }
 0x167   : > { %v1625_v24 = vpop.f32.mrf.mxu0  ;;  %v1181_v21 = vsel %vm1106_vm3, %v1178_v44, %v1180_v16  ;;  %v878_v63 = vsel %vm803_vm4, %v875_v15, %v877_v10 }
 0x168   : > { %3794 = vmatmul.msk.bf16.gmra.mxu2 %vm521_vm2, %v929_v3  ;;  %v1322_v1 = vpop.f32.mrf.mxu3  ;;  %v1480_v3 = vrot.slane %v4941_v4, 4  ;;  %v1233_v44 = vpack.c.bf16 %v1181_v21, %v1179_v25 }
 0x16a   : > { %3828 = vmatmul.msk.bf16.gmra.mxu0 %vm521_vm2, %v1535_v61 }
 0x16b   : > { %v1019_v35 = vpop.f32.mrf.mxu2  ;;  %v4952_v27 = vpop.f32.mrf.mxu1 }
 0x16c   : > { %5974 = vst [vmem:[#allocation12_spill] sm:$0xff] %v4952_v27  ;;  %v1084_v30 = vadd.f32 %v1019_v35, %v4675_v0  ;;  %v1481_v27 = vrot.slane %v4945_v32, 4  ;;  %v1784_v0 = vsel %vm570_vm0, %v1782_v34, %v1783_v5  ;;  %v1786_v35 = vsel %vm570_vm0, %v1783_v5, %v1785_v36 }
 0x16e   : > { %v1387_v43 = vadd.f32 %v1322_v1, %v1084_v30  ;;  %v876_v1 = vsel %vm803_vm4, %v874_v58, %v875_v15  ;;  %v1838_v30 = vpack.c.bf16 %v1786_v35, %v1784_v0  ;;  %v1482_v34 = vsel %vm1409_vm5, %v1480_v3, %v1481_v27  ;;  %v4986_v15 = vld [vmem:[%s4274_s6 + $0x168] sm:$0xff] }
 0x16f   : > { %v4964_v61 = vpop.f32.mrf.mxu0  ;;  %v1484_v5 = vsel %vm1409_vm5, %v1481_v27, %v1483_v11  ;;  %v930_v36 = vpack.c.bf16 %v878_v63, %v876_v1  ;;  %v1182_v10 = vrot.slane %v4986_v15, 3  ;;  %v4990_v11 = vld [vmem:[%s4274_s6 + $0x170] sm:$0xff]  ;;  %v4994_v27 = vld [vmem:[%s4274_s6 + $0x178] sm:$0x3f]  ;;  %v1787_v3 = vrot.slane %v4986_v15, 5 }
 0x170   : > { %5975 = vst [vmem:[#allocation13_spill] sm:$0xff] %v4964_v61  ;;  %v1690_v18 = vadd.f32 %v1625_v24, %v1387_v43  ;;  %v4970_v40 = vpop.f32.mrf.mxu3  ;;  %v1536_v58 = vpack.c.bf16 %v1484_v5, %v1482_v34  ;;  %v1185_v43 = vrot.slane %v4994_v27, 3  ;;  %v1790_v0 = vrot.slane %v4994_v27, 5 }
 0x171   : > { %5977 = vst [vmem:[#allocation15_spill] sm:$0xff] %v4990_v11  ;;  %v879_v1 = vrot.slane %v4986_v15, 2  ;;  %v880_v63 = vrot.slane %v4990_v11, 2  ;;  %v1488_v59 = vrot.slane %v4994_v27, 4 }
 0x172   : > { %v4974_v16 = vadd.f32 %v1927_v57, %v1690_v18  ;;  %5978 = vst [vmem:[#allocation16_spill] sm:$0xff] %v4994_v27 }
 0x173   : > { %v1021_v61 = vpop.f32.mrf.mxu2  ;;  %v1932_v32 = vpop.f32.mrf.mxu1 }
 0x174   : > { %5976 = vst [vmem:[#allocation14_spill] sm:$0xff] %v4974_v16  ;;  %v4979_v24 = vadd.f32 %v1021_v61, %v4696_v38  ;;  %v1183_v38 = vrot.slane %v4990_v11, 3  ;;  %v1788_v61 = vrot.slane %v4990_v11, 5 }
 0x175   : > { %3812 = vmatmul.msk.bf16.gmra.mxu3 %vm521_vm2, %v1233_v44  ;;  %v882_v44 = vrot.slane %v4994_v27, 2 }
 0x176   : > { %3846 = vmatmul.msk.bf16.gmra.mxu1 %vm521_vm2, %v1838_v30  ;;  %v1184_v34 = vsel %vm1106_vm3, %v1182_v10, %v1183_v38  ;;  %v1186_v5 = vsel %vm1106_vm3, %v1183_v38, %v1185_v43 }
 0x177   : > { %v1630_v18 = vpop.f32.mrf.mxu0  ;;  %v883_v10 = vsel %vm803_vm4, %v880_v63, %v882_v44  ;;  %v1234_v38 = vpack.c.bf16 %v1186_v5, %v1184_v34  ;;  %v4151_v44 = vld [vmem:[%s4274_s6 + $0x8] sm:$0xff]  ;;  %v4152_v34 = vld [vmem:[%s4274_s6 + $0x10] sm:$0x3f] }
 0x178   : > { %3795 = vmatmul.msk.bf16.gmra.mxu2 %vm521_vm2, %v930_v36  ;;  %v1327_v57 = vpop.f32.mrf.mxu3  ;;  %v1485_v36 = vrot.slane %v4986_v15, 4  ;;  %v2018_v5 = vrot.slane %v4152_v34, 6 }
 0x17a   : > { %3829 = vmatmul.msk.bf16.gmra.mxu0 %vm521_vm2, %v1536_v58 }
 0x17b   : > { %v1024_v25 = vpop.f32.mrf.mxu2  ;;  %v4997_v21 = vpop.f32.mrf.mxu1 }
 0x17c   : > { %5979 = vst [vmem:[#allocation17_spill] sm:$0xff] %v4997_v21  ;;  %v1086_v35 = vadd.f32 %v1024_v25, %v4707_v55  ;;  %v1486_v21 = vrot.slane %v4990_v11, 4  ;;  %v1789_v55 = vsel %vm570_vm0, %v1787_v3, %v1788_v61  ;;  %v1791_v25 = vsel %vm570_vm0, %v1788_v61, %v1790_v0 }
 0x17e   : > { %v1389_v30 = vadd.f32 %v1327_v57, %v1086_v35  ;;  %v881_v57 = vsel %vm803_vm4, %v879_v1, %v880_v63  ;;  %v1839_v35 = vpack.c.bf16 %v1791_v25, %v1789_v55  ;;  %v1487_v27 = vsel %vm1409_vm5, %v1485_v36, %v1486_v21 }
 0x17f   : > { %v5009_v58 = vpop.f32.mrf.mxu0  ;;  %v1489_v3 = vsel %vm1409_vm5, %v1486_v21, %v1488_v59  ;;  %v931_v61 = vpack.c.bf16 %v883_v10, %v881_v57 }
 0x180   : > { %5980 = vst [vmem:[#allocation18_spill] sm:$0xff] %v5009_v58  ;;  %v1692_v4 = vadd.f32 %v1630_v18, %v1389_v30  ;;  %v5015_v16 = vpop.f32.mrf.mxu3  ;;  %v1537_v0 = vpack.c.bf16 %v1489_v3, %v1487_v27  ;;  %v2016_v30 = vrot.slane %v4151_v44, 6  ;;  %v4155_v44 = vld [vmem:[%s4274_s6 + $0x28] sm:$0x3f] }
 0x182   : > { %v5019_v43 = vadd.f32 %v1932_v32, %v1692_v4  ;;  %v2019_v57 = vsel %vm2014_vm6, %v2016_v30, %v2018_v5 }
 0x183   : > { %v1026_v58 = vpop.f32.mrf.mxu2  ;;  %v1937_v11 = vpop.f32.mrf.mxu1 }
 0x184   : > { %v5024_v18 = vadd.f32 %v1026_v58, %v4732_v37  ;;  %v4150_v37 = vld [vmem:[%s4274_s6] sm:$0xff] }
 0x185   : > { %3813 = vmatmul.msk.bf16.gmra.mxu3 %vm521_vm2, %v1234_v38  ;;  %v2015_v21 = vrot.slane %v4150_v37, 6 }
 0x186   : > { %3847 = vmatmul.msk.bf16.gmra.mxu1 %vm521_vm2, %v1839_v35 }
 0x187   : > { %v1635_v4 = vpop.f32.mrf.mxu0  ;;  %v2017_v25 = vsel %vm2014_vm6, %v2015_v21, %v2016_v30  ;;  %v4154_v21 = vld [vmem:[%s4274_s6 + $0x20] sm:$0xff]  ;;  %v2023_v30 = vrot.slane %v4155_v44, 6  ;;  %v4157_v44 = vld [vmem:[%s4274_s6 + $0x38] sm:$0xff] }
 0x188   : > { %3796 = vmatmul.msk.bf16.gmra.mxu2 %vm521_vm2, %v931_v61  ;;  %v1332_v32 = vpop.f32.mrf.mxu3  ;;  %v2127_v3 = vpack.c.bf16 %v2019_v57, %v2017_v25 }
 0x18a   : > { %3830 = vmatmul.msk.bf16.gmra.mxu0 %vm521_vm2, %v1537_v0 }
 0x18b   : > { %v1029_v1 = vpop.f32.mrf.mxu2  ;;  %v5030_v63 = vpop.f32.mrf.mxu1 }
 0x18c   : > { %v1088_v59 = vadd.f32 %v1029_v1, %v4751_v62 }
 0x18e   : > { %v1391_v27 = vadd.f32 %v1332_v32, %v1088_v59  ;;  %v4153_v59 = vld [vmem:[%s4274_s6 + $0x18] sm:$0xff] }
 0x18f   : > { %v5036_v36 = vpop.f32.mrf.mxu0  ;;  %v2020_v37 = vrot.slane %v4153_v59, 6 }
 0x190   : > { %v1694_v58 = vadd.f32 %v1635_v4, %v1391_v27  ;;  %v5038_v55 = vpop.f32.mrf.mxu3 }
 0x192   : > { %v5042_v62 = vadd.f32 %v1937_v11, %v1694_v58  ;;  %v2021_v11 = vrot.slane %v4154_v21, 6  ;;  %v4156_v21 = vld [vmem:[%s4274_s6 + $0x30] sm:$0xff] }
 0x193   : > { %v1031_v10 = vpop.f32.mrf.mxu2  ;;  %v1942_v38 = vpop.f32.mrf.mxu1 }
 0x194   : > { %v5045_v35 = vadd.f32 %v1031_v10, %v4763_v13  ;;  %v2022_v58 = vsel %vm2014_vm6, %v2020_v37, %v2021_v11  ;;  %v2024_v25 = vsel %vm2014_vm6, %v2021_v11, %v2023_v30  ;;  %v2025_v11 = vrot.slane %v4156_v21, 6  ;;  %v4158_v30 = vld [vmem:[%s4274_s6 + $0x40] sm:$0x3f] }
 0x197   : > { %v1640_v61 = vpop.f32.mrf.mxu0 }
 0x198   : > { %3849 = vmatmul.msk.bf16.vlgmr.msra.gmra.mxu2 %vm521_vm2, %v2127_v3  ;;  %v1337_v0 = vpop.f32.mrf.mxu3 }
 0x19b   : > { %v1034_v4 = vpop.f32.mrf.mxu2  ;;  %v5048_v32 = vpop.f32.mrf.mxu1 }
 0x19c   : > { %5981 = vst [vmem:[#allocation19_spill] sm:$0xff] %v5048_v32  ;;  %v1090_v1 = vadd.f32 %v1034_v4, %v4524_v2 }
 0x19e   : > { %v1393_v34 = vadd.f32 %v1337_v0, %v1090_v1  ;;  %v2128_v0 = vpack.c.bf16 %v2024_v25, %v2022_v58 }
 0x19f   : > { %v5054_v5 = vpop.f32.mrf.mxu0 }
 0x1a0   : > { %v1696_v13 = vadd.f32 %v1640_v61, %v1393_v34  ;;  %v5056_v27 = vpop.f32.mrf.mxu3  ;;  %v2028_v34 = vrot.slane %v4158_v30, 6 }
 0x1a2   : > { %v5060_v2 = vadd.f32 %v1942_v38, %v1696_v13  ;;  %v2026_v38 = vrot.slane %v4157_v44, 6 }
 0x1a3   : > { %v1036_v57 = vpop.f32.mrf.mxu2  ;;  %v1947_v10 = vpop.f32.mrf.mxu1 }
 0x1a4   : > { %v5063_v3 = vadd.f32 %v1036_v57, %v4542_v31  ;;  %v2027_v25 = vsel %vm2014_vm6, %v2025_v11, %v2026_v38  ;;  %v2029_v57 = vsel %vm2014_vm6, %v2026_v38, %v2028_v34  ;;  %v4160_v34 = vld [vmem:[%s4274_s6 + $0x50] sm:$0xff] }
 0x1a7   : > { %v1645_v4 = vpop.f32.mrf.mxu0 }
 0x1a8   : > { %3850 = vmatmul.msk.bf16.gmra.mxu2 %vm521_vm2, %v2128_v0  ;;  %v1342_v61 = vpop.f32.mrf.mxu3 }
 0x1ab   : > { %v1039_v1 = vpop.f32.mrf.mxu2  ;;  %v5066_v59 = vpop.f32.mrf.mxu1 }
 0x1ac   : > { %5982 = vst [vmem:[#allocation20_spill] sm:$0xff] %v5066_v59  ;;  %v1092_v37 = vadd.f32 %v1039_v1, %v4556_v53 }
 0x1ae   : > { %v1395_v13 = vadd.f32 %v1342_v61, %v1092_v37  ;;  %v2129_v61 = vpack.c.bf16 %v2029_v57, %v2027_v25 }
 0x1af   : > { %v5072_v32 = vpop.f32.mrf.mxu0 }
 0x1b0   : > { %5983 = vst [vmem:[#allocation21_spill] sm:$0xff] %v5072_v32  ;;  %v1698_v31 = vadd.f32 %v1645_v4, %v1395_v13  ;;  %v5074_v58 = vpop.f32.mrf.mxu3  ;;  %v4159_v13 = vld [vmem:[%s4274_s6 + $0x48] sm:$0xff] }
 0x1b1   : > { %v2030_v38 = vrot.slane %v4159_v13, 6 }
 0x1b2   : > { %v5078_v53 = vadd.f32 %v1947_v10, %v1698_v31  ;;  %v2031_v10 = vrot.slane %v4160_v34, 6  ;;  %v4161_v31 = vld [vmem:[%s4274_s6 + $0x58] sm:$0x3f] }
 0x1b3   : > { %v1041_v0 = vpop.f32.mrf.mxu2  ;;  %v1952_v1 = vpop.f32.mrf.mxu1  ;;  %v2033_v59 = vrot.slane %v4161_v31, 6  ;;  %v4162_v31 = vld [vmem:[%s4274_s6 + $0x60] sm:$0xff] }
 0x1b4   : > { %5984 = vst [vmem:[#allocation22_spill] sm:$0xff] %v5078_v53  ;;  %v5081_v21 = vadd.f32 %v1041_v0, %v4574_v51  ;;  %v2032_v57 = vsel %vm2014_vm6, %v2030_v38, %v2031_v10 }
 0x1b5   : > { %v2034_v0 = vsel %vm2014_vm6, %v2031_v10, %v2033_v59  ;;  %v2035_v59 = vrot.slane %v4162_v31, 6  ;;  %v4163_v10 = vld [vmem:[%s4274_s6 + $0x68] sm:$0xff] }
 0x1b7   : > { %v1650_v37 = vpop.f32.mrf.mxu0 }
 0x1b8   : > { %3851 = vmatmul.msk.bf16.gmra.mxu2 %vm521_vm2, %v2129_v61  ;;  %v1347_v4 = vpop.f32.mrf.mxu3 }
 0x1bb   : > { %v1044_v44 = vpop.f32.mrf.mxu2  ;;  %v5084_v30 = vpop.f32.mrf.mxu1 }
 0x1bc   : > { %5985 = vst [vmem:[#allocation23_spill] sm:$0xff] %v5084_v30  ;;  %v1094_v11 = vadd.f32 %v1044_v44, %v4588_v42 }
 0x1be   : > { %v1397_v32 = vadd.f32 %v1347_v4, %v1094_v11  ;;  %v2130_v4 = vpack.c.bf16 %v2034_v0, %v2032_v57 }
 0x1bf   : > { %v5090_v53 = vpop.f32.mrf.mxu0 }
 0x1c0   : > { %5986 = vst [vmem:[#allocation24_spill] sm:$0xff] %v5090_v53  ;;  %v1700_v51 = vadd.f32 %v1650_v37, %v1397_v32  ;;  %v5092_v25 = vpop.f32.mrf.mxu3 }
 0x1c2   : > { %v5096_v42 = vadd.f32 %v1952_v1, %v1700_v51  ;;  %v2036_v1 = vrot.slane %v4163_v10, 6  ;;  %v4164_v51 = vld [vmem:[%s4274_s6 + $0x70] sm:$0x3f]  ;;  %v4207_v10 = vmov 0  }
 0x1c3   : > { %v1046_v61 = vpop.f32.mrf.mxu2  ;;  %v1957_v44 = vpop.f32.mrf.mxu1  ;;  %v2038_v30 = vrot.slane %v4164_v51, 6  ;;  %2386 = vst.msk [vmem:[#allocation2] sm:$0xf] %vm2385_vm7, %v4207_v10 }
 0x1c4   : > { %5987 = vst [vmem:[#allocation25_spill] sm:$0xff] %v5096_v42  ;;  %v5099_v13 = vadd.f32 %v1046_v61, %v4606_v7  ;;  %v2037_v0 = vsel %vm2014_vm6, %v2035_v59, %v2036_v1 }
 0x1c5   : > { %v2039_v61 = vsel %vm2014_vm6, %v2036_v1, %v2038_v30  ;;  %v4165_v30 = vld [vmem:[%s4274_s6 + $0x78] sm:$0xff]  ;;  %v4166_v1 = vld [vmem:[%s4274_s6 + $0x80] sm:$0xff]  ;;  %2387 = vst.msk [vmem:[#allocation2 + $0x4] sm:$0xf] %vm2385_vm7, %v4207_v10 }
 0x1c6   : > { %v2041_v51 = vrot.slane %v4166_v1, 6  ;;  %2388 = vst.msk [vmem:[#allocation2 + $0x8] sm:$0xf] %vm2385_vm7, %v4207_v10 }
 0x1c7   : > { %v1655_v11 = vpop.f32.mrf.mxu0  ;;  %2389 = vst.msk [vmem:[#allocation2 + $0xc] sm:$0xf] %vm2385_vm7, %v4207_v10 }
 0x1c8   : > { %3852 = vmatmul.msk.bf16.gmra.mxu2 %vm521_vm2, %v2130_v4  ;;  %v1352_v32 = vpop.f32.mrf.mxu3  ;;  %2390 = vst.msk [vmem:[#allocation2 + $0x10] sm:$0xf] %vm2385_vm7, %v4207_v10 }
 0x1c9   : > { %2391 = vst.msk [vmem:[#allocation2 + $0x14] sm:$0xf] %vm2385_vm7, %v4207_v10 }
 0x1ca   : > { %2392 = vst.msk [vmem:[#allocation2 + $0x18] sm:$0xf] %vm2385_vm7, %v4207_v10 }
 0x1cb   : > { %v1049_v37 = vpop.f32.mrf.mxu2  ;;  %v5102_v34 = vpop.f32.mrf.mxu1  ;;  %2393 = vst.msk [vmem:[#allocation2 + $0x1c] sm:$0xf] %vm2385_vm7, %v4207_v10 }
 0x1cc   : > { %v1096_v38 = vadd.f32 %v1049_v37, %v4620_v29  ;;  %2394 = vst.msk [vmem:[#allocation2 + $0x20] sm:$0xf] %vm2385_vm7, %v4207_v10 }
 0x1cd   : > { %2395 = vst.msk [vmem:[#allocation2 + $0x24] sm:$0xf] %vm2385_vm7, %v4207_v10 }
 0x1ce   : > { %v1399_v53 = vadd.f32 %v1352_v32, %v1096_v38  ;;  %v2131_v32 = vpack.c.bf16 %v2039_v61, %v2037_v0  ;;  %2396 = vst.msk [vmem:[#allocation2 + $0x28] sm:$0xf] %vm2385_vm7, %v4207_v10 }
 0x1cf   : > { %v5108_v42 = vpop.f32.mrf.mxu0  ;;  %2397 = vst.msk [vmem:[#allocation2 + $0x2c] sm:$0xf] %vm2385_vm7, %v4207_v10 }
 0x1d0   : > { %v1702_v7 = vadd.f32 %v1655_v11, %v1399_v53  ;;  %v5110_v57 = vpop.f32.mrf.mxu3  ;;  %2398 = vst.msk [vmem:[#allocation2 + $0x30] sm:$0xf] %vm2385_vm7, %v4207_v10 }
 0x1d1   : > { %2399 = vst.msk [vmem:[#allocation2 + $0x34] sm:$0xf] %vm2385_vm7, %v4207_v10 }
 0x1d2   : > { %v5114_v4 = vadd.f32 %v1957_v44, %v1702_v7  ;;  %v2040_v44 = vrot.slane %v4165_v30, 6  ;;  %v4167_v7 = vld [vmem:[%s4274_s6 + $0x88] sm:$0x3f]  ;;  %2400 = vst.msk [vmem:[#allocation2 + $0x38] sm:$0xf] %vm2385_vm7, %v4207_v10 }
 0x1d3   : > { %v1051_v29 = vpop.f32.mrf.mxu2  ;;  %v1962_v37 = vpop.f32.mrf.mxu1  ;;  %2401 = vst.msk [vmem:[#allocation2 + $0x3c] sm:$0xf] %vm2385_vm7, %v4207_v10 }
 0x1d4   : > { %v5117_v31 = vadd.f32 %v1051_v29, %v4638_v33  ;;  %v2043_v33 = vrot.slane %v4167_v7, 6  ;;  %v4074_v7 = vld [vmem:[#allocation2] sm:$0xff]  ;;  %2402 = vst.msk [vmem:[#allocation2 + $0x40] sm:$0xf] %vm2385_vm7, %v4207_v10 }
 0x1d5   : > { %3950 = vmatmul.msk.bf16.vlgmr.msra.gmra.mxu0 %vm521_vm2, %v4074_v7  ;;  %2403 = vst.msk [vmem:[#allocation2 + $0x44] sm:$0xf] %vm2385_vm7, %v4207_v10 }
 0x1d6   : > { %v2044_v30 = vsel %vm2014_vm6, %v2041_v51, %v2043_v33  ;;  %2404 = vst.msk [vmem:[#allocation2 + $0x48] sm:$0xf] %vm2385_vm7, %v4207_v10 }
 0x1d7   : > { %v1660_v38 = vpop.f32.mrf.mxu0  ;;  %2405 = vst.msk [vmem:[#allocation2 + $0x4c] sm:$0xf] %vm2385_vm7, %v4207_v10 }
 0x1d8   : > { %3853 = vmatmul.msk.bf16.gmra.mxu2 %vm521_vm2, %v2131_v32  ;;  %v1357_v53 = vpop.f32.mrf.mxu3  ;;  %2406 = vst.msk [vmem:[#allocation2 + $0x50] sm:$0xf] %vm2385_vm7, %v4207_v10 }
 0x1d9   : > { %2407 = vst.msk [vmem:[#allocation2 + $0x54] sm:$0xf] %vm2385_vm7, %v4207_v10 }
 0x1da   : > { %2408 = vst.msk [vmem:[#allocation2 + $0x58] sm:$0xf] %vm2385_vm7, %v4207_v10 }
 0x1db   : > { %v1054_v11 = vpop.f32.mrf.mxu2  ;;  %v5126_v29 = vpop.f32.mrf.mxu1  ;;  %2409 = vst.msk [vmem:[#allocation2 + $0x5c] sm:$0xf] %vm2385_vm7, %v4207_v10 }
 0x1dc   : > { %v1098_v59 = vadd.f32 %v1054_v11, %v4652_v50  ;;  %5988 = vst [vmem:[#allocation26_spill] sm:$0xff] %v5126_v29  ;;  %v2042_v11 = vsel %vm2014_vm6, %v2040_v44, %v2041_v51 }
 0x1dd   : > { %v2132_v1 = vpack.c.bf16 %v2044_v30, %v2042_v11  ;;  %v4169_v11 = vld [vmem:[%s4274_s6 + $0x98] sm:$0xff]  ;;  %2410 = vst.msk [vmem:[#allocation2 + $0x60] sm:$0xf] %vm2385_vm7, %v4207_v10 }
 0x1de   : > { %v1401_v0 = vadd.f32 %v1357_v53, %v1098_v59  ;;  %v2046_v30 = vrot.slane %v4169_v11, 6  ;;  %2411 = vst.msk [vmem:[#allocation2 + $0x64] sm:$0xf] %vm2385_vm7, %v4207_v10 }
 0x1df   : > { %v5132_v50 = vpop.f32.mrf.mxu0  ;;  %2412 = vst.msk [vmem:[#allocation2 + $0x68] sm:$0xf] %vm2385_vm7, %v4207_v10 }
 0x1e0   : > { %v1704_v61 = vadd.f32 %v1660_v38, %v1401_v0  ;;  %v5136_v32 = vpop.f32.mrf.mxu3  ;;  %v4168_v0 = vld [vmem:[%s4274_s6 + $0x90] sm:$0xff]  ;;  %2413 = vst.msk [vmem:[#allocation2 + $0x6c] sm:$0xf] %vm2385_vm7, %v4207_v10 }
 0x1e1   : > { %2414 = vst.msk [vmem:[#allocation2 + $0x70] sm:$0xf] %vm2385_vm7, %v4207_v10 }
 0x1e2   : > { %v5144_v53 = vadd.f32 %v1962_v37, %v1704_v61  ;;  %v2045_v61 = vrot.slane %v4168_v0, 6  ;;  %2415 = vst.msk [vmem:[#allocation2 + $0x74] sm:$0xf] %vm2385_vm7, %v4207_v10 }
 0x1e3   : > { %v1056_v59 = vpop.f32.mrf.mxu2  ;;  %v1967_v44 = vpop.f32.mrf.mxu1  ;;  %2416 = vst.msk [vmem:[#allocation2 + $0x78] sm:$0xf] %vm2385_vm7, %v4207_v10 }
 0x1e4   : > { %v5151_v38 = vadd.f32 %v1056_v59, %v4670_v56  ;;  %v4170_v59 = vld [vmem:[%s4274_s6 + $0xa0] sm:$0x3f]  ;;  %v2047_v0 = vsel %vm2014_vm6, %v2045_v61, %v2046_v30  ;;  %2417 = vst.msk [vmem:[#allocation2 + $0x7c] sm:$0xf] %vm2385_vm7, %v4207_v10 }
 0x1e5   : > { %2418 = vst.msk [vmem:[#allocation2 + $0x80] sm:$0xf] %vm2385_vm7, %v4207_v10 }
 0x1e6   : > { %2419 = vst.msk [vmem:[#allocation2 + $0x84] sm:$0xf] %vm2385_vm7, %v4207_v10 }
 0x1e7   : > { %v1665_v37 = vpop.f32.mrf.mxu0  ;;  %2420 = vst.msk [vmem:[#allocation2 + $0x88] sm:$0xf] %vm2385_vm7, %v4207_v10 }
 0x1e8   : > { %3854 = vmatmul.msk.bf16.gmra.mxu2 %vm521_vm2, %v2132_v1  ;;  %v1362_v56 = vpop.f32.mrf.mxu3  ;;  %v2048_v1 = vrot.slane %v4170_v59, 6  ;;  %2421 = vst.msk [vmem:[#allocation2 + $0x8c] sm:$0xf] %vm2385_vm7, %v4207_v10 }
 0x1e9   : > { %2422 = vst.msk [vmem:[#allocation2 + $0x90] sm:$0xf] %vm2385_vm7, %v4207_v10 }
 0x1ea   : > { %v2049_v11 = vsel %vm2014_vm6, %v2046_v30, %v2048_v1  ;;  %v4076_v1 = vld [vmem:[#allocation2 + $0x10] sm:$0xff]  ;;  %2423 = vst.msk [vmem:[#allocation2 + $0x94] sm:$0xf] %vm2385_vm7, %v4207_v10 }
 0x1eb   : > { %v1059_v51 = vpop.f32.mrf.mxu2  ;;  %v5191_v59 = vpop.f32.mrf.mxu1  ;;  %v2133_v30 = vpack.c.bf16 %v2049_v11, %v2047_v0  ;;  %3971 = vmatmul.msk.bf16.vlgmr.msra.gmra.mxu1 %vm521_vm2, %v4076_v1  ;;  %2424 = vst.msk [vmem:[#allocation2 + $0x98] sm:$0xf] %vm2385_vm7, %v4207_v10 }
 0x1ec   : > { %v1100_v33 = vadd.f32 %v1059_v51, %v4684_v12  ;;  %5991 = vst [vmem:[#allocation29_spill] sm:$0xff] %v5191_v59  ;;  %v4172_v59 = vld [vmem:[%s4274_s6 + $0xb0] sm:$0xff] }
 0x1ed   : > { %2425 = vst.msk [vmem:[#allocation2 + $0x9c] sm:$0xf] %vm2385_vm7, %v4207_v10 }
 0x1ee   : > { %v1403_v7 = vadd.f32 %v1362_v56, %v1100_v33  ;;  %v4075_v56 = vld [vmem:[#allocation2 + $0x8] sm:$0xff]  ;;  %2426 = vst.msk [vmem:[#allocation2 + $0xa0] sm:$0xf] %vm2385_vm7, %v4207_v10 }
 0x1ef   : > { %v5181_v29 = vpop.f32.mrf.mxu0  ;;  %3930 = vmatmul.msk.bf16.vlgmr.msra.gmra.mxu3 %vm521_vm2, %v4075_v56  ;;  %3951 = vmatmul.msk.bf16.gmra.mxu0 %vm521_vm2, %v4075_v56  ;;  %2427 = vst.msk [vmem:[#allocation2 + $0xa4] sm:$0xf] %vm2385_vm7, %v4207_v10 }
 0x1f0   : > { %5989 = vst [vmem:[#allocation27_spill] sm:$0xff] %v5181_v29  ;;  %v1706_v12 = vadd.f32 %v1665_v37, %v1403_v7  ;;  %v5185_v51 = vpop.f32.mrf.mxu3  ;;  %v3987_v7 = vld [vmem:[%s5953_s3 + $0xc] sm:$0x7]  ;;  %v2051_v29 = vrot.slane %v4172_v59, 6 }
 0x1f1   : > { %5990 = vst [vmem:[#allocation28_spill] sm:$0xff] %v5185_v51  ;;  %v3007_v11 = vsel %vm570_vm0, %v3987_v7, 0 }
 0x1f2   : > { %v5195_v33 = vadd.f32 %v1967_v44, %v1706_v12  ;;  %3016 = vmatpush.bf16.msrb.mxu2 %v3007_v11  ;;  %2428 = vst.msk [vmem:[#allocation2 + $0xa8] sm:$0xf] %vm2385_vm7, %v4207_v10 }
 0x1f3   : > { %v1061_v37 = vpop.f32.mrf.mxu2  ;;  %v1972_v0 = vpop.f32.mrf.mxu1  ;;  %2429 = vst.msk [vmem:[#allocation2 + $0xac] sm:$0xf] %vm2385_vm7, %v4207_v10  ;;  %v4176_v10 = vld [vmem:[%s4274_s6 + $0xd0] sm:$0x3f] }
 0x1f4   : > { %5992 = vst [vmem:[#allocation30_spill] sm:$0xff] %v5195_v33  ;;  %v5203_v61 = vadd.f32 %v1061_v37, %v4702_v20  ;;  %v4171_v37 = vld [vmem:[%s4274_s6 + $0xa8] sm:$0xff]  ;;  %v4173_v33 = vld [vmem:[%s4274_s6 + $0xb8] sm:$0x3f] }
 0x1f5   : > { %v2053_v51 = vrot.slane %v4173_v33, 6 }
 0x1f6   : > { %5993 = vst [vmem:[#allocation31_spill] sm:$0xff] %v5203_v61 }
 0x1f7   : > { %v1670_v20 = vpop.f32.mrf.mxu0  ;;  %v2054_v33 = vsel %vm2014_vm6, %v2051_v29, %v2053_v51  ;;  %v4008_v51 = vld [vmem:[%s5953_s3 + $0x10] sm:$0x7] }
 0x1f8   : > { %3855 = vmatmul.msk.bf16.gmra.mxu2 %vm521_vm2, %v2133_v30  ;;  %v1367_v44 = vpop.f32.mrf.mxu3  ;;  %v2050_v30 = vrot.slane %v4171_v37, 6  ;;  %v3141_v11 = vsel %vm570_vm0, %v4008_v51, 0 }
 0x1f9   : > { %3150 = vmatpush.bf16.msrb.mxu3 %v3141_v11  ;;  %v2058_v11 = vrot.slane %v4176_v10, 6 }
 0x1fa   : > { %v2052_v59 = vsel %vm2014_vm6, %v2050_v30, %v2051_v29  ;;  %v4174_v30 = vld [vmem:[%s4274_s6 + $0xc0] sm:$0xff] }
 0x1fb   : > { %v1064_v12 = vpop.f32.mrf.mxu2  ;;  %v2134_v29 = vpack.c.bf16 %v2054_v33, %v2052_v59  ;;  %v4029_v59 = vld [vmem:[%s5953_s3 + $0x14] sm:$0x7]  ;;  %v4050_v33 = vld [vmem:[%s5953_s3 + $0x18] sm:$0x7] }
 0x1fc   : > { %v1102_v56 = vadd.f32 %v1064_v12, %v4716_v8 }
 0x1fe   : > { %v1405_v61 = vadd.f32 %v1367_v44, %v1102_v56 }
 0x1ff   : > { %3931 = vmatmul.msk.bf16.gmra.mxu3 %vm521_vm2, %v4076_v1  ;;  %3952 = vmatmul.msk.bf16.gmra.mxu0 %vm521_vm2, %v4076_v1 }
 0x200   : > { %v1708_v8 = vadd.f32 %v1670_v20, %v1405_v61  ;;  %v5242_v7 = vpop.f32.mrf.mxu3  ;;  %v5254_v61 = vpop.f32.mrf.mxu0 }
 0x201   : > { %5994 = vst [vmem:[#allocation32_spill] sm:$0xff] %v5242_v7 }
 0x202   : > { %v5248_v44 = vadd.f32 %v1972_v0, %v1708_v8  ;;  %5996 = vst [vmem:[#allocation34_spill] sm:$0xff] %v5254_v61  ;;  %v5267_v0 = vpop.f32.mrf.mxu1  ;;  %v2055_v8 = vrot.slane %v4174_v30, 6 }
 0x203   : > { %v1066_v12 = vpop.f32.mrf.mxu2  ;;  %5997 = vst [vmem:[#allocation35_spill] sm:$0xff] %v5267_v0  ;;  %v3409_v0 = vsel %vm570_vm0, %v4050_v33, 0 }
 0x204   : > { %5995 = vst [vmem:[#allocation33_spill] sm:$0xff] %v5248_v44  ;;  %v5258_v20 = vadd.f32 %v1066_v12, %v4738_v52  ;;  %v4175_v12 = vld [vmem:[%s4274_s6 + $0xc8] sm:$0xff]  ;;  %3418 = vmatpush.bf16.msrb.mxu1 %v3409_v0  ;;  %v5299_v0 = vld [vmem:[%s5952_s2] ss:$0 sm:$0xff] }
 0x205   : > { %v2056_v51 = vrot.slane %v4175_v12, 6 }
 0x207   : > { %v2057_v61 = vsel %vm2014_vm6, %v2055_v8, %v2056_v51  ;;  %v2059_v44 = vsel %vm2014_vm6, %v2056_v51, %v2058_v11  ;;  %v4177_v8 = vld [vmem:[%s4274_s6 + $0xd8] sm:$0xff]  ;;  %v4179_v11 = vld [vmem:[%s4274_s6 + $0xe8] sm:$0x3f] }
 0x208   : > { %3856 = vmatmul.msk.bf16.gmra.mxu2 %vm521_vm2, %v2134_v29  ;;  %v1372_v56 = vpop.f32.mrf.mxu3  ;;  %v1675_v1 = vpop.f32.mrf.mxu0  ;;  %v3275_v29 = vsel %vm570_vm0, %v4029_v59, 0  ;;  %v2135_v59 = vpack.c.bf16 %v2059_v44, %v2057_v61  ;;  %v2060_v33 = vrot.slane %v4177_v8, 6 }
 0x209   : > { %3284 = vmatpush.bf16.msrb.mxu0 %v3275_v29  ;;  %v2063_v29 = vrot.slane %v4179_v11, 6  ;;  %v4181_v11 = vld [vmem:[%s4274_s6 + $0xf8] sm:$0xff] }
 0x20b   : > { %v1069_v52 = vpop.f32.mrf.mxu2 }
 0x20c   : > { %v1104_v37 = vadd.f32 %v1069_v52, %v4757_v22  ;;  %v1977_v52 = vpop.f32.mrf.mxu1 }
 0x20e   : > { %v1407_v22 = vadd.f32 %v1372_v56, %v1104_v37 }
 0x210   : > { %v1710_v30 = vadd.f32 %v1675_v1, %v1407_v22  ;;  %v4178_v1 = vld [vmem:[%s4274_s6 + $0xe0] sm:$0xff] }
 0x211   : > { %v2061_v51 = vrot.slane %v4178_v1, 6  ;;  %v4180_v1 = vld [vmem:[%s4274_s6 + $0xf0] sm:$0xff] }
 0x212   : > { %v5290_v7 = vadd.f32 %v1977_v52, %v1710_v30 }
 0x213   : > { %v1071_v12 = vpop.f32.mrf.mxu2  ;;  %v2062_v61 = vsel %vm2014_vm6, %v2060_v33, %v2061_v51  ;;  %v2064_v22 = vsel %vm2014_vm6, %v2061_v51, %v2063_v29  ;;  %v2065_v51 = vrot.slane %v4180_v1, 6  ;;  %v2066_v29 = vrot.slane %v4181_v11, 6 }
 0x214   : > { %v5293_v10 = vadd.f32 %v1071_v12, %v4769_v60  ;;  %v2136_v12 = vpack.c.bf16 %v2064_v22, %v2062_v61  ;;  %v2070_v1 = vrot.slane %v4818_v47, 6  ;;  %v2073_v11 = vrot.slane %v4826_v14, 6 }
 0x215   : > { %v2067_v22 = vsel %vm2014_vm6, %v2065_v51, %v2066_v29  ;;  %v2071_v51 = vrot.slane %v4822_v46, 6 }
 0x218   : > { %3857 = vmatmul.msk.bf16.gmra.mxu2 %vm521_vm2, %v2135_v59 }
 0x21b   : > { %v2205_v56 = vpop.f32.mrf.mxu2 }
 0x21c   : > { %v2285_v37 = vadd.f32 %v2205_v56, %v4785_v28 }
 0x21e   : > { %v2321_v60 = vadd.f32 %v5299_v0, %v2285_v37 }
 0x220   : > { %v2353_v44 = vmax.f32 %v2321_v60, 0.0  ;;  %v4182_v60 = vld [vmem:[%s4274_s6 + $0x100] sm:$0x3f] }
 0x222   : > { %v2430_v52 = vpack.c.bf16 %v2353_v44, %v2353_v44  ;;  %v2068_v44 = vrot.slane %v4182_v60, 6 }
 0x223   : > { %v2207_v30 = vpop.f32.mrf.mxu2 }
 0x224   : > { %2463 = vst.msk [vmem:[#allocation2 + $0x18] sm:$0xf] %vm2385_vm7, %v2430_v52  ;;  %v2286_v28 = vadd.f32 %v2207_v30, %v4793_v26  ;;  %v2069_v52 = vsel %vm2014_vm6, %v2066_v29, %v2068_v44  ;;  %v2072_v44 = vsel %vm2014_vm6, %v2070_v1, %v2071_v51 }
 0x226   : > { %v2322_v59 = vadd.f32 %v5299_v0, %v2286_v28 }
 0x228   : > { %v2354_v56 = vmax.f32 %v2322_v59, 0.0  ;;  %3858 = vmatmul.msk.bf16.gmra.mxu2 %vm521_vm2, %v2136_v12  ;;  %v2137_v59 = vpack.c.bf16 %v2069_v52, %v2067_v22 }
 0x22a   : > { %v2431_v37 = vpack.c.bf16 %v2354_v56, %v2354_v56 }
 0x22b   : > { %v2210_v8 = vpop.f32.mrf.mxu2 }
 0x22c   : > { %2464 = vst.msk [vmem:[#allocation2 + $0x1c] sm:$0xf] %vm2385_vm7, %v2431_v37  ;;  %v2287_v33 = vadd.f32 %v2210_v8, %v4806_v23 }
 0x22e   : > { %v2323_v26 = vadd.f32 %v5299_v0, %v2287_v33 }
 0x230   : > { %v2355_v61 = vmax.f32 %v2323_v26, 0.0  ;;  %v2074_v26 = vsel %vm2014_vm6, %v2071_v51, %v2073_v11 }
 0x231   : > { %v2138_v47 = vpack.c.bf16 %v2074_v26, %v2072_v44  ;;  %v1386_v44 = vadd.f32 %v4925_v49, %v4934_v19  ;;  %v6003_v19 = vld [vmem:[#allocation7_spill] sm:$0xff] }
 0x232   : > { %v2432_v30 = vpack.c.bf16 %v2355_v61, %v2355_v61 }
 0x233   : > { %v2212_v28 = vpop.f32.mrf.mxu2  ;;  %v5320_v12 = vld [vmem:[#allocation2 + $0x18] sm:$0xff] }
 0x234   : > { %2465 = vst.msk [vmem:[#allocation2 + $0x20] sm:$0xf] %vm2385_vm7, %v2432_v30  ;;  %v2288_v23 = vadd.f32 %v2212_v28, %v4814_v48  ;;  %3932 = vmatmul.msk.bf16.gmra.mxu3 %vm521_vm2, %v5320_v12  ;;  %3953 = vmatmul.msk.bf16.gmra.mxu0 %vm521_vm2, %v5320_v12 }
 0x235   : > { %3972 = vmatmul.msk.bf16.gmra.mxu1 %vm521_vm2, %v5320_v12 }
 0x236   : > { %v2324_v56 = vadd.f32 %v5299_v0, %v2288_v23  ;;  %v2075_v23 = vrot.slane %v4857_v6, 6 }
 0x238   : > { %v2356_v37 = vmax.f32 %v2324_v56, 0.0  ;;  %3859 = vmatmul.msk.bf16.gmra.mxu2 %vm521_vm2, %v2137_v59  ;;  %v5998_v59 = vld [vmem:[#allocation3_spill] sm:$0xff] }
 0x239   : > { %v2076_v56 = vrot.slane %v5998_v59, 6 }
 0x23a   : > { %v2433_v8 = vpack.c.bf16 %v2356_v37, %v2356_v37  ;;  %v2078_v37 = vrot.slane %v4865_v41, 6 }
 0x23b   : > { %v2215_v33 = vpop.f32.mrf.mxu2 }
 0x23c   : > { %2466 = vst.msk [vmem:[#allocation2 + $0x24] sm:$0xf] %vm2385_vm7, %v2433_v8  ;;  %v2289_v48 = vadd.f32 %v2215_v33, %v4845_v45  ;;  %v2079_v1 = vsel %vm2014_vm6, %v2076_v56, %v2078_v37 }
 0x23e   : > { %v2325_v29 = vadd.f32 %v5299_v0, %v2289_v48  ;;  %v2077_v48 = vsel %vm2014_vm6, %v2075_v23, %v2076_v56 }
 0x23f   : > { %v2139_v6 = vpack.c.bf16 %v2079_v1, %v2077_v48 }
 0x240   : > { %v2357_v60 = vmax.f32 %v2325_v29, 0.0 }
 0x242   : > { %v2434_v61 = vpack.c.bf16 %v2357_v60, %v2357_v60 }
 0x243   : > { %v2217_v22 = vpop.f32.mrf.mxu2  ;;  %v5340_v52 = vld [vmem:[#allocation2 + $0x20] sm:$0xff] }
 0x244   : > { %2467 = vst.msk [vmem:[#allocation2 + $0x28] sm:$0xf] %vm2385_vm7, %v2434_v61  ;;  %v2290_v45 = vadd.f32 %v2217_v22, %v4853_v9  ;;  %3933 = vmatmul.msk.bf16.gmra.mxu3 %vm521_vm2, %v5340_v52  ;;  %3954 = vmatmul.msk.bf16.gmra.mxu0 %vm521_vm2, %v5340_v52  ;;  %v5999_v22 = vld [vmem:[#allocation4_spill] sm:$0xff] }
 0x245   : > { %3973 = vmatmul.msk.bf16.gmra.mxu1 %vm521_vm2, %v5340_v52 }
 0x246   : > { %v2326_v46 = vadd.f32 %v5299_v0, %v2290_v45  ;;  %v2080_v45 = vrot.slane %v5999_v22, 6 }
 0x248   : > { %v2358_v14 = vmax.f32 %v2326_v46, 0.0  ;;  %3860 = vmatmul.msk.bf16.gmra.mxu2 %vm521_vm2, %v2138_v47  ;;  %v6000_v47 = vld [vmem:[#allocation5_spill] sm:$0xff] }
 0x249   : > { %v2081_v46 = vrot.slane %v6000_v47, 6 }
 0x24a   : > { %v2435_v30 = vpack.c.bf16 %v2358_v14, %v2358_v14  ;;  %v6001_v14 = vld [vmem:[#allocation6_spill] sm:$0xff] }
 0x24b   : > { %v2220_v28 = vpop.f32.mrf.mxu2  ;;  %v2082_v56 = vsel %vm2014_vm6, %v2080_v45, %v2081_v46  ;;  %v6007_v45 = vld [vmem:[#allocation11_spill] sm:$0xff] }
 0x24c   : > { %2468 = vst.msk [vmem:[#allocation2 + $0x2c] sm:$0xf] %vm2385_vm7, %v2435_v30  ;;  %v2291_v9 = vadd.f32 %v2220_v28, %v4884_v17  ;;  %v2083_v30 = vrot.slane %v6001_v14, 6  ;;  %v6002_v28 = vld [vmem:[#allocation8_spill] sm:$0xff]  ;;  %v2088_v47 = vrot.slane %v6007_v45, 6 }
 0x24d   : > { %v6011_v45 = vld [vmem:[#allocation16_spill] sm:$0xff] }
 0x24e   : > { %v2327_v8 = vadd.f32 %v5299_v0, %v2291_v9  ;;  %v1689_v9 = vadd.f32 %v6002_v28, %v1386_v44  ;;  %v2084_v49 = vsel %vm2014_vm6, %v2081_v46, %v2083_v30  ;;  %v6008_v46 = vld [vmem:[#allocation13_spill] sm:$0xff]  ;;  %v5403_v30 = vpop.f32.mrf.mxu0 }
 0x24f   : > { %v2140_v1 = vpack.c.bf16 %v2084_v49, %v2082_v56 }
 0x250   : > { %v2359_v33 = vmax.f32 %v2327_v8, 0.0  ;;  %v1991_v37 = vadd.f32 %v6003_v19, %v1689_v9  ;;  %v5406_v9 = vpop.f32.mrf.mxu3 }
 0x252   : > { %v2436_v51 = vpack.c.bf16 %v2359_v33, %v2359_v33 }
 0x253   : > { %v2222_v11 = vpop.f32.mrf.mxu2  ;;  %v5360_v29 = vld [vmem:[#allocation2 + $0x28] sm:$0xff] }
 0x254   : > { %2469 = vst.msk [vmem:[#allocation2 + $0x30] sm:$0xf] %vm2385_vm7, %v2436_v51  ;;  %v2292_v17 = vadd.f32 %v2222_v11, %v4892_v39  ;;  %3934 = vmatmul.msk.bf16.gmra.mxu3 %vm521_vm2, %v5360_v29  ;;  %3955 = vmatmul.msk.bf16.gmra.mxu0 %vm521_vm2, %v5360_v29 }
 0x255   : > { %3974 = vmatmul.msk.bf16.gmra.mxu1 %vm521_vm2, %v5360_v29 }
 0x256   : > { %v2328_v41 = vadd.f32 %v5299_v0, %v2292_v17  ;;  %v1388_v17 = vadd.f32 %v4970_v40, %v4979_v24 }
 0x258   : > { %v2360_v60 = vmax.f32 %v2328_v41, 0.0  ;;  %3861 = vmatmul.msk.bf16.gmra.mxu2 %vm521_vm2, %v2139_v6  ;;  %v1691_v14 = vadd.f32 %v6008_v46, %v1388_v17 }
 0x25a   : > { %v2437_v26 = vpack.c.bf16 %v2360_v60, %v2360_v60  ;;  %v6004_v60 = vld [vmem:[#allocation14_spill] sm:$0xff] }
 0x25b   : > { %v2225_v39 = vpop.f32.mrf.mxu2 }
 0x25c   : > { %2470 = vst.msk [vmem:[#allocation2 + $0x34] sm:$0xf] %vm2385_vm7, %v2437_v26  ;;  %v2293_v61 = vadd.f32 %v2225_v39, %v4929_v54  ;;  %v6005_v26 = vld [vmem:[#allocation9_spill] sm:$0xff] }
 0x25d   : > { %v2085_v39 = vrot.slane %v6005_v26, 6 }
 0x25e   : > { %v2329_v23 = vadd.f32 %v5299_v0, %v2293_v61  ;;  %v6006_v61 = vld [vmem:[#allocation10_spill] sm:$0xff] }
 0x25f   : > { %v2086_v22 = vrot.slane %v6006_v61, 6  ;;  %v6010_v61 = vld [vmem:[#allocation15_spill] sm:$0xff] }
 0x260   : > { %v2361_v59 = vmax.f32 %v2329_v23, 0.0 }
 0x261   : > { %v2087_v24 = vsel %vm2014_vm6, %v2085_v39, %v2086_v22  ;;  %v2089_v23 = vsel %vm2014_vm6, %v2086_v22, %v2088_v47  ;;  %v2090_v39 = vrot.slane %v4986_v15, 6  ;;  %v2091_v22 = vrot.slane %v6010_v61, 6  ;;  %v6013_v15 = vld [vmem:[#allocation17_spill] sm:$0xff] }
 0x262   : > { %v2438_v8 = vpack.c.bf16 %v2361_v59, %v2361_v59  ;;  %v6009_v59 = vld [vmem:[#allocation12_spill] sm:$0xff]  ;;  %v2093_v47 = vrot.slane %v6011_v45, 6 }
 0x263   : > { %v2227_v33 = vpop.f32.mrf.mxu2  ;;  %v5384_v54 = vld [vmem:[#allocation2 + $0x30] sm:$0xff]  ;;  %v1993_v56 = vadd.f32 %v6009_v59, %v1691_v14  ;;  %v6012_v14 = vld [vmem:[#allocation18_spill] sm:$0xff] }
 0x264   : > { %2471 = vst.msk [vmem:[#allocation2 + $0x38] sm:$0xf] %vm2385_vm7, %v2438_v8  ;;  %v2294_v48 = vadd.f32 %v2227_v33, %v1991_v37  ;;  %3935 = vmatmul.msk.bf16.gmra.mxu3 %vm521_vm2, %v5384_v54  ;;  %3956 = vmatmul.msk.bf16.gmra.mxu0 %vm521_vm2, %v5384_v54  ;;  %v2141_v33 = vpack.c.bf16 %v2089_v23, %v2087_v24 }
 0x265   : > { %3975 = vmatmul.msk.bf16.gmra.mxu1 %vm521_vm2, %v5384_v54  ;;  %v2092_v23 = vsel %vm2014_vm6, %v2090_v39, %v2091_v22 }
 0x266   : > { %v2330_v51 = vadd.f32 %v5299_v0, %v2294_v48  ;;  %v5414_v48 = vpop.f32.mrf.mxu1 }
 0x268   : > { %v2362_v11 = vmax.f32 %v2330_v51, 0.0  ;;  %3862 = vmatmul.msk.bf16.gmra.mxu2 %vm521_vm2, %v2140_v1  ;;  %v2782_v51 = vpop.f32.mrf.mxu0 }
 0x26a   : > { %v2439_v6 = vpack.c.bf16 %v2362_v11, %v2362_v11 }
 0x26b   : > { %v2230_v41 = vpop.f32.mrf.mxu2 }
 0x26c   : > { %2472 = vst.msk [vmem:[#allocation2 + $0x3c] sm:$0xf] %vm2385_vm7, %v2439_v6  ;;  %v2295_v44 = vadd.f32 %v2230_v41, %v6004_v60  ;;  %v1390_v6 = vadd.f32 %v5015_v16, %v5024_v18 }
 0x26e   : > { %v2331_v28 = vadd.f32 %v5299_v0, %v2295_v44  ;;  %v2884_v46 = vpop.f32.mrf.mxu1 }
 0x270   : > { %v2363_v40 = vmax.f32 %v2331_v28, 0.0  ;;  %v1693_v28 = vadd.f32 %v6012_v14, %v1390_v6  ;;  %v5435_v18 = vpop.f32.mrf.mxu0 }
 0x272   : > { %v2440_v49 = vpack.c.bf16 %v2363_v40, %v2363_v40  ;;  %v2682_v11 = vpop.f32.mrf.mxu3 }
 0x273   : > { %v2232_v19 = vpop.f32.mrf.mxu2  ;;  %v5411_v37 = vld [vmem:[#allocation2 + $0x38] sm:$0xff]  ;;  %v2783_v26 = vadd.f32 %v2782_v51, %v2682_v11 }
 0x274   : > { %2473 = vst.msk [vmem:[#allocation2 + $0x40] sm:$0xf] %vm2385_vm7, %v2440_v49  ;;  %v2296_v8 = vadd.f32 %v2232_v19, %v1993_v56  ;;  %3936 = vmatmul.msk.bf16.gmra.mxu3 %vm521_vm2, %v5411_v37  ;;  %3957 = vmatmul.msk.bf16.gmra.mxu0 %vm521_vm2, %v5411_v37  ;;  %v1995_v56 = vadd.f32 %v6013_v15, %v1693_v28 }
 0x275   : > { %3976 = vmatmul.msk.bf16.gmra.mxu1 %vm521_vm2, %v5411_v37  ;;  %v5433_v24 = vadd.f32 %v2884_v46, %v2783_v26 }
 0x276   : > { %v2332_v1 = vadd.f32 %v5299_v0, %v2296_v8 }
 0x278   : > { %v2364_v17 = vmax.f32 %v2332_v1, 0.0  ;;  %3863 = vmatmul.msk.bf16.gmra.mxu2 %vm521_vm2, %v2141_v33 }
 0x27a   : > { %v2441_v41 = vpack.c.bf16 %v2364_v17, %v2364_v17  ;;  %v5439_v59 = vpop.f32.mrf.mxu3  ;;  %v1392_v17 = vadd.f32 %v5038_v55, %v5045_v35 }
 0x27b   : > { %v2235_v60 = vpop.f32.mrf.mxu2 }
 0x27c   : > { %2474 = vst.msk [vmem:[#allocation2 + $0x44] sm:$0xf] %vm2385_vm7, %v2441_v41  ;;  %v2297_v44 = vadd.f32 %v2235_v60, %v5019_v43  ;;  %v2094_v43 = vsel %vm2014_vm6, %v2091_v22, %v2093_v47  ;;  %v2787_v41 = vpop.f32.mrf.mxu0  ;;  %v1695_v61 = vadd.f32 %v5036_v36, %v1392_v17 }
 0x27d   : > { %v2142_v1 = vpack.c.bf16 %v2094_v43, %v2092_v23 }
 0x27e   : > { %v2333_v40 = vadd.f32 %v5299_v0, %v2297_v44  ;;  %v1997_v47 = vadd.f32 %v5030_v63, %v1695_v61 }
 0x280   : > { %v2365_v16 = vmax.f32 %v2333_v40, 0.0 }
 0x282   : > { %v2442_v49 = vpack.c.bf16 %v2365_v16, %v2365_v16  ;;  %v2687_v44 = vpop.f32.mrf.mxu3 }
 0x283   : > { %v2237_v19 = vpop.f32.mrf.mxu2  ;;  %v5442_v8 = vld [vmem:[#allocation2 + $0x40] sm:$0xff]  ;;  %v2788_v39 = vadd.f32 %v2787_v41, %v2687_v44 }
 0x284   : > { %2475 = vst.msk [vmem:[#allocation2 + $0x48] sm:$0xf] %vm2385_vm7, %v2442_v49  ;;  %v2298_v33 = vadd.f32 %v2237_v19, %v1995_v56  ;;  %3937 = vmatmul.msk.bf16.gmra.mxu3 %vm521_vm2, %v5442_v8  ;;  %3958 = vmatmul.msk.bf16.gmra.mxu0 %vm521_vm2, %v5442_v8  ;;  %v5463_v35 = vpop.f32.mrf.mxu0  ;;  %v6014_v19 = vld [vmem:[#allocation19_spill] sm:$0xff] }
 0x285   : > { %3977 = vmatmul.msk.bf16.gmra.mxu1 %vm521_vm2, %v5442_v8 }
 0x286   : > { %v2334_v51 = vadd.f32 %v5299_v0, %v2298_v33 }
 0x288   : > { %v2366_v11 = vmax.f32 %v2334_v51, 0.0  ;;  %3864 = vmatmul.msk.bf16.gmra.mxu2 %vm521_vm2, %v2142_v1 }
 0x28a   : > { %v2443_v6 = vpack.c.bf16 %v2366_v11, %v2366_v11  ;;  %v1396_v11 = vadd.f32 %v5074_v58, %v5081_v21 }
 0x28b   : > { %v2240_v60 = vpop.f32.mrf.mxu2 }
 0x28c   : > { %2476 = vst.msk [vmem:[#allocation2 + $0x4c] sm:$0xf] %vm2385_vm7, %v2443_v6  ;;  %v2299_v26 = vadd.f32 %v2240_v60, %v5042_v62  ;;  %v1394_v62 = vadd.f32 %v5056_v27, %v5063_v3  ;;  %v2792_v56 = vpop.f32.mrf.mxu0  ;;  %v5495_v6 = vpop.f32.mrf.mxu1  ;;  %v6015_v60 = vld [vmem:[#allocation22_spill] sm:$0xff] }
 0x28e   : > { %v2335_v22 = vadd.f32 %v5299_v0, %v2299_v26  ;;  %v1697_v43 = vadd.f32 %v5054_v5, %v1394_v62  ;;  %v6016_v26 = vld [vmem:[#allocation21_spill] sm:$0xff] }
 0x28f   : > { %v1699_v61 = vadd.f32 %v6016_v26, %v1396_v11 }
 0x290   : > { %v2367_v45 = vmax.f32 %v2335_v22, 0.0  ;;  %v1999_v33 = vadd.f32 %v6014_v19, %v1697_v43 }
 0x292   : > { %v2444_v46 = vpack.c.bf16 %v2367_v45, %v2367_v45 }
 0x293   : > { %v2242_v14 = vpop.f32.mrf.mxu2  ;;  %v5460_v28 = vld [vmem:[#allocation2 + $0x48] sm:$0xff] }
 0x294   : > { %2477 = vst.msk [vmem:[#allocation2 + $0x50] sm:$0xf] %vm2385_vm7, %v2444_v46  ;;  %v2300_v55 = vadd.f32 %v2242_v14, %v1997_v47  ;;  %3938 = vmatmul.msk.bf16.gmra.mxu3 %vm521_vm2, %v5460_v28  ;;  %3959 = vmatmul.msk.bf16.gmra.mxu0 %vm521_vm2, %v5460_v28  ;;  %v2794_v3 = vpop.f32.mrf.mxu0  ;;  %v5501_v47 = vpop.f32.mrf.mxu3  ;;  %v6017_v46 = vld [vmem:[#allocation20_spill] sm:$0xff] }
 0x295   : > { %3978 = vmatmul.msk.bf16.gmra.mxu1 %vm521_vm2, %v5460_v28  ;;  %v2001_v14 = vadd.f32 %v6017_v46, %v1699_v61 }
 0x296   : > { %v2336_v36 = vadd.f32 %v5299_v0, %v2300_v55 }
 0x298   : > { %v2368_v63 = vmax.f32 %v2336_v36, 0.0  ;;  %3992 = vmatmul.msk.bf16.vlgmr.msrb.gmra.mxu2 %vm521_vm2, %v5320_v12 }
 0x29a   : > { %v2445_v40 = vpack.c.bf16 %v2368_v63, %v2368_v63 }
 0x29b   : > { %v2245_v16 = vpop.f32.mrf.mxu2 }
 0x29c   : > { %2478 = vst.msk [vmem:[#allocation2 + $0x54] sm:$0xf] %vm2385_vm7, %v2445_v40  ;;  %v2301_v23 = vadd.f32 %v2245_v16, %v5060_v2 }
 0x29e   : > { %v2337_v15 = vadd.f32 %v5299_v0, %v2301_v23 }
 0x2a0   : > { %v2369_v49 = vmax.f32 %v2337_v15, 0.0 }
 0x2a2   : > { %v2446_v1 = vpack.c.bf16 %v2369_v49, %v2369_v49 }
 0x2a3   : > { %v2247_v51 = vpop.f32.mrf.mxu2  ;;  %v5481_v12 = vld [vmem:[#allocation2 + $0x50] sm:$0xff] }
 0x2a4   : > { %2479 = vst.msk [vmem:[#allocation2 + $0x58] sm:$0xf] %vm2385_vm7, %v2446_v1  ;;  %v2302_v27 = vadd.f32 %v2247_v51, %v1999_v33  ;;  %3939 = vmatmul.msk.bf16.gmra.mxu3 %vm521_vm2, %v5481_v12  ;;  %3960 = vmatmul.msk.bf16.gmra.mxu0 %vm521_vm2, %v5481_v12  ;;  %v6018_v51 = vld [vmem:[#allocation25_spill] sm:$0xff] }
 0x2a5   : > { %3979 = vmatmul.msk.bf16.gmra.mxu1 %vm521_vm2, %v5481_v12 }
 0x2a6   : > { %v2338_v5 = vadd.f32 %v5299_v0, %v2302_v27 }
 0x2a8   : > { %v2370_v2 = vmax.f32 %v2338_v5, 0.0  ;;  %3993 = vmatmul.msk.bf16.gmra.mxu2 %vm521_vm2, %v5340_v52  ;;  %v6019_v5 = vld [vmem:[#allocation24_spill] sm:$0xff] }
 0x2aa   : > { %v2447_v17 = vpack.c.bf16 %v2370_v2, %v2370_v2 }
 0x2ab   : > { %v2250_v41 = vpop.f32.mrf.mxu2 }
 0x2ac   : > { %2480 = vst.msk [vmem:[#allocation2 + $0x5c] sm:$0xf] %vm2385_vm7, %v2447_v17  ;;  %v2303_v44 = vadd.f32 %v2250_v41, %v6015_v60 }
 0x2ae   : > { %v2339_v22 = vadd.f32 %v5299_v0, %v2303_v44 }
 0x2b0   : > { %v2371_v45 = vmax.f32 %v2339_v22, 0.0 }
 0x2b1   : > { %v2797_v36 = vpop.f32.mrf.mxu0 }
 0x2b2   : > { %v2448_v55 = vpack.c.bf16 %v2371_v45, %v2371_v45  ;;  %v2889_v21 = vpop.f32.mrf.mxu1 }
 0x2b3   : > { %v2252_v58 = vpop.f32.mrf.mxu2  ;;  %v5504_v63 = vld [vmem:[#allocation2 + $0x58] sm:$0xff]  ;;  %v5507_v40 = vadd.f32 %v2889_v21, %v2788_v39  ;;  %v1398_v39 = vadd.f32 %v5092_v25, %v5099_v13  ;;  %v1400_v21 = vadd.f32 %v5110_v57, %v5117_v31 }
 0x2b4   : > { %2481 = vst.msk [vmem:[#allocation2 + $0x60] sm:$0xf] %vm2385_vm7, %v2448_v55  ;;  %v2304_v62 = vadd.f32 %v2252_v58, %v2001_v14  ;;  %3940 = vmatmul.msk.bf16.gmra.mxu3 %vm521_vm2, %v5504_v63  ;;  %3961 = vmatmul.msk.bf16.gmra.mxu0 %vm521_vm2, %v5504_v63 }
 0x2b5   : > { %3980 = vmatmul.msk.bf16.gmra.mxu1 %vm521_vm2, %v5504_v63  ;;  %v1701_v2 = vadd.f32 %v6019_v5, %v1398_v39 }
 0x2b6   : > { %v2340_v16 = vadd.f32 %v5299_v0, %v2304_v62 }
 0x2b7   : > { %v2692_v43 = vpop.f32.mrf.mxu3 }
 0x2b8   : > { %v2372_v23 = vmax.f32 %v2340_v16, 0.0  ;;  %3994 = vmatmul.msk.bf16.gmra.mxu2 %vm521_vm2, %v5360_v29  ;;  %v2793_v15 = vadd.f32 %v2792_v56, %v2692_v43  ;;  %v6020_v56 = vld [vmem:[#allocation23_spill] sm:$0xff] }
 0x2b9   : > { %v2799_v19 = vpop.f32.mrf.mxu0  ;;  %v2003_v44 = vadd.f32 %v6020_v56, %v1701_v2  ;;  %v1402_v56 = vadd.f32 %v5136_v32, %v5151_v38 }
 0x2ba   : > { %v2449_v49 = vpack.c.bf16 %v2372_v23, %v2372_v23  ;;  %v5520_v1 = vpop.f32.mrf.mxu1 }
 0x2bb   : > { %v2255_v33 = vpop.f32.mrf.mxu2 }
 0x2bc   : > { %2482 = vst.msk [vmem:[#allocation2 + $0x64] sm:$0xf] %vm2385_vm7, %v2449_v49  ;;  %v2305_v27 = vadd.f32 %v2255_v33, %v6018_v51  ;;  %v1703_v49 = vadd.f32 %v5108_v42, %v1400_v21 }
 0x2be   : > { %v2341_v11 = vadd.f32 %v5299_v0, %v2305_v27  ;;  %v2005_v5 = vadd.f32 %v5102_v34, %v1703_v49 }
 0x2bf   : > { %v2694_v41 = vpop.f32.mrf.mxu3 }
 0x2c0   : > { %v2373_v17 = vmax.f32 %v2341_v11, 0.0  ;;  %v2795_v60 = vadd.f32 %v2794_v3, %v2694_v41 }
 0x2c1   : > { %v2802_v25 = vpop.f32.mrf.mxu0 }
 0x2c2   : > { %v2450_v26 = vpack.c.bf16 %v2373_v17, %v2373_v17  ;;  %v2894_v61 = vpop.f32.mrf.mxu1 }
 0x2c3   : > { %v2257_v13 = vpop.f32.mrf.mxu2  ;;  %v5527_v22 = vld [vmem:[#allocation2 + $0x60] sm:$0xff]  ;;  %v5530_v46 = vadd.f32 %v2894_v61, %v2793_v15 }
 0x2c4   : > { %2483 = vst.msk [vmem:[#allocation2 + $0x68] sm:$0xf] %vm2385_vm7, %v2450_v26  ;;  %v2306_v45 = vadd.f32 %v2257_v13, %v2003_v44  ;;  %3941 = vmatmul.msk.bf16.gmra.mxu3 %vm521_vm2, %v5527_v22  ;;  %3962 = vmatmul.msk.bf16.gmra.mxu0 %vm521_vm2, %v5527_v22 }
 0x2c5   : > { %3981 = vmatmul.msk.bf16.gmra.mxu1 %vm521_vm2, %v5527_v22 }
 0x2c6   : > { %v2342_v3 = vadd.f32 %v5299_v0, %v2306_v45 }
 0x2c7   : > { %v2697_v55 = vpop.f32.mrf.mxu3 }
 0x2c8   : > { %v2374_v14 = vmax.f32 %v2342_v3, 0.0  ;;  %3995 = vmatmul.msk.bf16.gmra.mxu2 %vm521_vm2, %v5384_v54  ;;  %v2798_v58 = vadd.f32 %v2797_v36, %v2697_v55 }
 0x2c9   : > { %v2804_v16 = vpop.f32.mrf.mxu0 }
 0x2ca   : > { %v2451_v62 = vpack.c.bf16 %v2374_v14, %v2374_v14  ;;  %v2896_v43 = vpop.f32.mrf.mxu1  ;;  %v1705_v14 = vadd.f32 %v5132_v50, %v1402_v56  ;;  %v6025_v56 = vld [vmem:[#allocation27_spill] sm:$0xff] }
 0x2cb   : > { %v2260_v23 = vpop.f32.mrf.mxu2  ;;  %v5545_v39 = vadd.f32 %v2896_v43, %v2795_v60 }
 0x2cc   : > { %2484 = vst.msk [vmem:[#allocation2 + $0x6c] sm:$0xf] %vm2385_vm7, %v2451_v62  ;;  %v2307_v15 = vadd.f32 %v2260_v23, %v5114_v4  ;;  %v6021_v62 = vld [vmem:[#allocation26_spill] sm:$0xff] }
 0x2cd   : > { %v2007_v23 = vadd.f32 %v6021_v62, %v1705_v14  ;;  %v6026_v14 = vld [vmem:[#allocation29_spill] sm:$0xff] }
 0x2ce   : > { %v2343_v33 = vadd.f32 %v5299_v0, %v2307_v15 }
 0x2cf   : > { %v2699_v27 = vpop.f32.mrf.mxu3 }
 0x2d0   : > { %v2375_v51 = vmax.f32 %v2343_v33, 0.0  ;;  %v2800_v36 = vadd.f32 %v2799_v19, %v2699_v27 }
 0x2d1   : > { %v2807_v31 = vpop.f32.mrf.mxu0 }
 0x2d2   : > { %v2452_v57 = vpack.c.bf16 %v2375_v51, %v2375_v51  ;;  %v2899_v11 = vpop.f32.mrf.mxu1 }
 0x2d3   : > { %v2262_v2 = vpop.f32.mrf.mxu2  ;;  %v5550_v17 = vld [vmem:[#allocation2 + $0x68] sm:$0xff]  ;;  %v5553_v41 = vadd.f32 %v2899_v11, %v2798_v58 }
 0x2d4   : > { %2485 = vst.msk [vmem:[#allocation2 + $0x70] sm:$0xf] %vm2385_vm7, %v2452_v57  ;;  %v2308_v4 = vadd.f32 %v2262_v2, %v2005_v5  ;;  %3942 = vmatmul.msk.bf16.gmra.mxu3 %vm521_vm2, %v5550_v17  ;;  %3963 = vmatmul.msk.bf16.gmra.mxu0 %vm521_vm2, %v5550_v17  ;;  %v6023_v5 = vld [vmem:[#allocation28_spill] sm:$0xff] }
 0x2d5   : > { %3982 = vmatmul.msk.bf16.gmra.mxu1 %vm521_vm2, %v5550_v17 }
 0x2d6   : > { %v2344_v42 = vadd.f32 %v5299_v0, %v2308_v4 }
 0x2d7   : > { %v2702_v19 = vpop.f32.mrf.mxu3 }
 0x2d8   : > { %v2376_v34 = vmax.f32 %v2344_v42, 0.0  ;;  %3996 = vmatmul.msk.bf16.gmra.mxu2 %vm521_vm2, %v5411_v37  ;;  %v2803_v60 = vadd.f32 %v2802_v25, %v2702_v19 }
 0x2d9   : > { %v2809_v26 = vpop.f32.mrf.mxu0 }
 0x2da   : > { %v2453_v44 = vpack.c.bf16 %v2376_v34, %v2376_v34  ;;  %v2901_v61 = vpop.f32.mrf.mxu1  ;;  %v6024_v34 = vld [vmem:[#allocation30_spill] sm:$0xff] }
 0x2db   : > { %v2265_v13 = vpop.f32.mrf.mxu2  ;;  %v5568_v3 = vadd.f32 %v2901_v61, %v2800_v36  ;;  %v6022_v36 = vld [vmem:[#allocation31_spill] sm:$0xff] }
 0x2dc   : > { %2486 = vst.msk [vmem:[#allocation2 + $0x74] sm:$0xf] %vm2385_vm7, %v2453_v44  ;;  %v2309_v45 = vadd.f32 %v2265_v13, %v5144_v53  ;;  %v1404_v57 = vadd.f32 %v6023_v5, %v6022_v36 }
 0x2de   : > { %v2345_v55 = vadd.f32 %v5299_v0, %v2309_v45  ;;  %v1707_v44 = vadd.f32 %v6025_v56, %v1404_v57 }
 0x2df   : > { %v2704_v21 = vpop.f32.mrf.mxu3 }
 0x2e0   : > { %v2377_v58 = vmax.f32 %v2345_v55, 0.0  ;;  %v2805_v25 = vadd.f32 %v2804_v16, %v2704_v21  ;;  %v2009_v55 = vadd.f32 %v6026_v14, %v1707_v44 }
 0x2e1   : > { %v2812_v38 = vpop.f32.mrf.mxu0 }
 0x2e2   : > { %v2454_v32 = vpack.c.bf16 %v2377_v58, %v2377_v58  ;;  %v2904_v15 = vpop.f32.mrf.mxu1 }
 0x2e3   : > { %v2267_v43 = vpop.f32.mrf.mxu2  ;;  %v5573_v49 = vld [vmem:[#allocation2 + $0x70] sm:$0xff]  ;;  %v5576_v33 = vadd.f32 %v2904_v15, %v2803_v60 }
 0x2e4   : > { %2487 = vst.msk [vmem:[#allocation2 + $0x78] sm:$0xf] %vm2385_vm7, %v2454_v32  ;;  %v2310_v53 = vadd.f32 %v2267_v43, %v2007_v23  ;;  %3943 = vmatmul.msk.bf16.gmra.mxu3 %vm521_vm2, %v5573_v49  ;;  %3964 = vmatmul.msk.bf16.gmra.mxu0 %vm521_vm2, %v5573_v49 }
 0x2e5   : > { %3983 = vmatmul.msk.bf16.gmra.mxu1 %vm521_vm2, %v5573_v49 }
 0x2e6   : > { %v2346_v50 = vadd.f32 %v5299_v0, %v2310_v53 }
 0x2e7   : > { %v2707_v51 = vpop.f32.mrf.mxu3 }
 0x2e8   : > { %v2378_v16 = vmax.f32 %v2346_v50, 0.0  ;;  %3997 = vmatmul.msk.bf16.gmra.mxu2 %vm521_vm2, %v5442_v8  ;;  %v2808_v27 = vadd.f32 %v2807_v31, %v2707_v51 }
 0x2e9   : > { %v2814_v11 = vpop.f32.mrf.mxu0 }
 0x2ea   : > { %v2455_v2 = vpack.c.bf16 %v2378_v16, %v2378_v16  ;;  %v2906_v42 = vpop.f32.mrf.mxu1  ;;  %v6027_v16 = vld [vmem:[#allocation32_spill] sm:$0xff] }
 0x2eb   : > { %v2270_v4 = vpop.f32.mrf.mxu2  ;;  %v5591_v60 = vadd.f32 %v2906_v42, %v2805_v25  ;;  %v1406_v51 = vadd.f32 %v6027_v16, %v5258_v20 }
 0x2ec   : > { %2488 = vst.msk [vmem:[#allocation2 + $0x7c] sm:$0xf] %vm2385_vm7, %v2455_v2  ;;  %v2311_v19 = vadd.f32 %v2270_v4, %v6024_v34  ;;  %v6028_v2 = vld [vmem:[#allocation33_spill] sm:$0xff]  ;;  %v6029_v34 = vld [vmem:[#allocation34_spill] sm:$0xff] }
 0x2ee   : > { %v2347_v13 = vadd.f32 %v5299_v0, %v2311_v19  ;;  %v1709_v19 = vadd.f32 %v6029_v34, %v1406_v51 }
 0x2ef   : > { %v2709_v45 = vpop.f32.mrf.mxu3 }
 0x2f0   : > { %v2379_v61 = vmax.f32 %v2347_v13, 0.0  ;;  %v2810_v31 = vadd.f32 %v2809_v26, %v2709_v45 }
 0x2f1   : > { %v2817_v21 = vpop.f32.mrf.mxu0 }
 0x2f2   : > { %v2456_v58 = vpack.c.bf16 %v2379_v61, %v2379_v61  ;;  %v2909_v23 = vpop.f32.mrf.mxu1  ;;  %v6030_v61 = vld [vmem:[#allocation35_spill] sm:$0xff] }
 0x2f3   : > { %v2272_v62 = vpop.f32.mrf.mxu2  ;;  %v5596_v32 = vld [vmem:[#allocation2 + $0x78] sm:$0xff]  ;;  %v5599_v25 = vadd.f32 %v2909_v23, %v2808_v27  ;;  %v2011_v45 = vadd.f32 %v6030_v61, %v1709_v19 }
 0x2f4   : > { %2489 = vst.msk [vmem:[#allocation2 + $0x80] sm:$0xf] %vm2385_vm7, %v2456_v58  ;;  %v2312_v43 = vadd.f32 %v2272_v62, %v2009_v55  ;;  %3944 = vmatmul.msk.bf16.gmra.mxu3 %vm521_vm2, %v5596_v32  ;;  %3965 = vmatmul.msk.bf16.gmra.mxu0 %vm521_vm2, %v5596_v32 }
 0x2f5   : > { %3984 = vmatmul.msk.bf16.gmra.mxu1 %vm521_vm2, %v5596_v32 }
 0x2f6   : > { %v2348_v26 = vadd.f32 %v5299_v0, %v2312_v43 }
 0x2f7   : > { %v2712_v53 = vpop.f32.mrf.mxu3 }
 0x2f8   : > { %v2380_v15 = vmax.f32 %v2348_v26, 0.0  ;;  %3998 = vmatmul.msk.bf16.gmra.mxu2 %vm521_vm2, %v5460_v28  ;;  %v2813_v50 = vadd.f32 %v2812_v38, %v2712_v53  ;;  %v1408_v53 = vadd.f32 %v5406_v9, %v5293_v10 }
 0x2f9   : > { %v2819_v36 = vpop.f32.mrf.mxu0 }
 0x2fa   : > { %v2457_v27 = vpack.c.bf16 %v2380_v15, %v2380_v15  ;;  %v2911_v57 = vpop.f32.mrf.mxu1 }
 0x2fb   : > { %v2275_v5 = vpop.f32.mrf.mxu2  ;;  %v5614_v42 = vadd.f32 %v2911_v57, %v2810_v31 }
 0x2fc   : > { %2490 = vst.msk [vmem:[#allocation2 + $0x84] sm:$0xf] %vm2385_vm7, %v2457_v27  ;;  %v2313_v4 = vadd.f32 %v2275_v5, %v6028_v2  ;;  %v1711_v2 = vadd.f32 %v5403_v30, %v1408_v53 }
 0x2fe   : > { %v2349_v56 = vadd.f32 %v5299_v0, %v2313_v4 }
 0x2ff   : > { %v2714_v13 = vpop.f32.mrf.mxu3 }
 0x300   : > { %v2381_v44 = vmax.f32 %v2349_v56, 0.0  ;;  %v2815_v38 = vadd.f32 %v2814_v11, %v2714_v13  ;;  %v2013_v56 = vadd.f32 %v5414_v48, %v1711_v2 }
 0x301   : > { %v2822_v14 = vpop.f32.mrf.mxu0 }
 0x302   : > { %v2458_v20 = vpack.c.bf16 %v2381_v44, %v2381_v44  ;;  %v2914_v58 = vpop.f32.mrf.mxu1 }
 0x303   : > { %v2277_v55 = vpop.f32.mrf.mxu2  ;;  %v5619_v62 = vld [vmem:[#allocation2 + $0x80] sm:$0xff]  ;;  %v5622_v31 = vadd.f32 %v2914_v58, %v2813_v50 }
 0x304   : > { %2491 = vst.msk [vmem:[#allocation2 + $0x88] sm:$0xf] %vm2385_vm7, %v2458_v20  ;;  %v2314_v23 = vadd.f32 %v2277_v55, %v2011_v45  ;;  %3945 = vmatmul.msk.bf16.gmra.mxu3 %vm521_vm2, %v5619_v62  ;;  %4034 = vmatmul.msk.bf16.vlgmr.msrb.gmra.mxu0 %vm521_vm2, %v5360_v29 }
 0x305   : > { %3985 = vmatmul.msk.bf16.gmra.mxu1 %vm521_vm2, %v5619_v62 }
 0x306   : > { %v2350_v11 = vadd.f32 %v5299_v0, %v2314_v23 }
 0x307   : > { %v2717_v26 = vpop.f32.mrf.mxu3 }
 0x308   : > { %v2382_v43 = vmax.f32 %v2350_v11, 0.0  ;;  %3999 = vmatmul.msk.bf16.gmra.mxu2 %vm521_vm2, %v5481_v12  ;;  %v2818_v15 = vadd.f32 %v2817_v21, %v2717_v26 }
 0x309   : > { %v2824_v16 = vpop.f32.mrf.mxu0 }
 0x30a   : > { %v2459_v50 = vpack.c.bf16 %v2382_v43, %v2382_v43  ;;  %v2916_v27 = vpop.f32.mrf.mxu1 }
 0x30b   : > { %v2280_v51 = vpop.f32.mrf.mxu2  ;;  %v5637_v57 = vadd.f32 %v2916_v27, %v2815_v38 }
 0x30c   : > { %2492 = vst.msk [vmem:[#allocation2 + $0x8c] sm:$0xf] %vm2385_vm7, %v2459_v50  ;;  %v2315_v5 = vadd.f32 %v2280_v51, %v5290_v7 }
 0x30e   : > { %v2351_v4 = vadd.f32 %v5299_v0, %v2315_v5 }
 0x30f   : > { %v2719_v19 = vpop.f32.mrf.mxu3 }
 0x310   : > { %v2383_v34 = vmax.f32 %v2351_v4, 0.0  ;;  %v2820_v21 = vadd.f32 %v2819_v36, %v2719_v19 }
 0x311   : > { %v2827_v9 = vpop.f32.mrf.mxu0 }
 0x312   : > { %v2460_v10 = vpack.c.bf16 %v2383_v34, %v2383_v34  ;;  %v2919_v13 = vpop.f32.mrf.mxu1 }
 0x313   : > { %v2282_v44 = vpop.f32.mrf.mxu2  ;;  %v5642_v61 = vld [vmem:[#allocation2 + $0x88] sm:$0xff]  ;;  %v5645_v38 = vadd.f32 %v2919_v13, %v2818_v15 }
 0x314   : > { %2493 = vst.msk [vmem:[#allocation2 + $0x90] sm:$0xf] %vm2385_vm7, %v2460_v10  ;;  %v2316_v7 = vadd.f32 %v2282_v44, %v2013_v56  ;;  %4013 = vmatmul.msk.bf16.vlgmr.msrb.gmra.mxu3 %vm521_vm2, %v5340_v52  ;;  %4035 = vmatmul.msk.bf16.gmra.mxu0 %vm521_vm2, %v5384_v54 }
 0x315   : > { %3986 = vmatmul.msk.bf16.gmra.mxu1 %vm521_vm2, %v5642_v61 }
 0x316   : > { %v2352_v30 = vadd.f32 %v5299_v0, %v2316_v7 }
 0x317   : > { %v2722_v36 = vpop.f32.mrf.mxu3 }
 0x318   : > { %v2384_v48 = vmax.f32 %v2352_v30, 0.0  ;;  %4000 = vmatmul.msk.bf16.gmra.mxu2 %vm521_vm2, %v5504_v63  ;;  %v2823_v45 = vadd.f32 %v2822_v14, %v2722_v36 }
 0x319   : > { %v2829_v55 = vpop.f32.mrf.mxu0 }
 0x31a   : > { %v2461_v20 = vpack.c.bf16 %v2384_v48, %v2384_v48  ;;  %v2921_v58 = vpop.f32.mrf.mxu1 }
 0x31b   : > { %v3018_v23 = vpop.f32.mrf.mxu2  ;;  %v5657_v52 = vadd.f32 %v2921_v58, %v2820_v21 }
 0x31c   : > { %2494 = vst.msk [vmem:[#allocation2 + $0x94] sm:$0xf] %vm2385_vm7, %v2461_v20  ;;  %v5660_v11 = vadd.f32 %v3018_v23, %v5433_v24 }
 0x31f   : > { %v2724_v0 = vpop.f32.mrf.mxu3 }
 0x320   : > { %v2825_v43 = vadd.f32 %v2824_v16, %v2724_v0 }
 0x321   : > { %v2832_v26 = vpop.f32.mrf.mxu0 }
 0x322   : > { %v2924_v15 = vpop.f32.mrf.mxu1 }
 0x323   : > { %v5662_v53 = vpop.f32.mrf.mxu2  ;;  %v5664_v50 = vadd.f32 %v2924_v15, %v2823_v45 }
 0x324   : > { %4014 = vmatmul.msk.bf16.gmra.mxu3 %vm521_vm2, %v5360_v29  ;;  %4036 = vmatmul.msk.bf16.gmra.mxu0 %vm521_vm2, %v5411_v37  ;;  %v2790_v29 = vadd.f32 %v5463_v35, %v5501_v47 }
 0x325   : > { %4055 = vmatmul.msk.bf16.vlgmr.msrb.gmra.mxu1 %vm521_vm2, %v5384_v54 }
 0x326   : > { %v2967_v19 = vadd.f32 %v5520_v1, %v2790_v29 }
 0x327   : > { %v2727_v24 = vpop.f32.mrf.mxu3 }
 0x328   : > { %4001 = vmatmul.msk.bf16.gmra.mxu2 %vm521_vm2, %v5527_v22  ;;  %v2828_v14 = vadd.f32 %v2827_v9, %v2727_v24 }
 0x329   : > { %v2834_v16 = vpop.f32.mrf.mxu0 }
 0x32a   : > { %v2926_v51 = vpop.f32.mrf.mxu1 }
 0x32b   : > { %v3023_v27 = vpop.f32.mrf.mxu2  ;;  %v5674_v5 = vadd.f32 %v2926_v51, %v2825_v43 }
 0x32c   : > { %v5677_v2 = vadd.f32 %v3023_v27, %v5507_v40 }
 0x32f   : > { %v2729_v4 = vpop.f32.mrf.mxu3 }
 0x330   : > { %v2830_v34 = vadd.f32 %v2829_v55, %v2729_v4 }
 0x331   : > { %v2837_v21 = vpop.f32.mrf.mxu0 }
 0x332   : > { %v2929_v56 = vpop.f32.mrf.mxu1 }
 0x333   : > { %v3025_v10 = vpop.f32.mrf.mxu2  ;;  %v5682_v44 = vadd.f32 %v2929_v56, %v2828_v14 }
 0x334   : > { %v5684_v9 = vadd.f32 %v3025_v10, %v2967_v19  ;;  %4015 = vmatmul.msk.bf16.gmra.mxu3 %vm521_vm2, %v5384_v54  ;;  %4037 = vmatmul.msk.bf16.gmra.mxu0 %vm521_vm2, %v5442_v8 }
 0x335   : > { %4056 = vmatmul.msk.bf16.gmra.mxu1 %vm521_vm2, %v5411_v37 }
 0x337   : > { %v2732_v35 = vpop.f32.mrf.mxu3 }
 0x338   : > { %4002 = vmatmul.msk.bf16.gmra.mxu2 %vm521_vm2, %v5550_v17  ;;  %v2833_v47 = vadd.f32 %v2832_v26, %v2732_v35 }
 0x339   : > { %v2839_v40 = vpop.f32.mrf.mxu0 }
 0x33a   : > { %v2931_v1 = vpop.f32.mrf.mxu1 }
 0x33b   : > { %v3028_v13 = vpop.f32.mrf.mxu2  ;;  %v5694_v7 = vadd.f32 %v2931_v1, %v2830_v34 }
 0x33c   : > { %v5697_v30 = vadd.f32 %v3028_v13, %v5530_v46 }
 0x33f   : > { %v2734_v54 = vpop.f32.mrf.mxu3 }
 0x340   : > { %v2835_v48 = vadd.f32 %v2834_v16, %v2734_v54 }
 0x341   : > { %v2842_v36 = vpop.f32.mrf.mxu0 }
 0x342   : > { %v2934_v45 = vpop.f32.mrf.mxu1 }
 0x343   : > { %v3030_v20 = vpop.f32.mrf.mxu2  ;;  %v5699_v55 = vadd.f32 %v2934_v45, %v2833_v47 }
 0x344   : > { %v5702_v58 = vadd.f32 %v3030_v20, %v5545_v39  ;;  %4016 = vmatmul.msk.bf16.gmra.mxu3 %vm521_vm2, %v5411_v37  ;;  %4038 = vmatmul.msk.bf16.gmra.mxu0 %vm521_vm2, %v5460_v28 }
 0x345   : > { %4057 = vmatmul.msk.bf16.gmra.mxu1 %vm521_vm2, %v5442_v8 }
 0x347   : > { %v2737_v46 = vpop.f32.mrf.mxu3 }
 0x348   : > { %4003 = vmatmul.msk.bf16.gmra.mxu2 %vm521_vm2, %v5573_v49  ;;  %v2838_v23 = vadd.f32 %v2837_v21, %v2737_v46 }
 0x349   : > { %v2844_v0 = vpop.f32.mrf.mxu0 }
 0x34a   : > { %v2936_v43 = vpop.f32.mrf.mxu1 }
 0x34b   : > { %v3033_v26 = vpop.f32.mrf.mxu2  ;;  %v5712_v15 = vadd.f32 %v2936_v43, %v2835_v48 }
 0x34c   : > { %v5715_v39 = vadd.f32 %v3033_v26, %v5553_v41 }
 0x34f   : > { %v2739_v37 = vpop.f32.mrf.mxu3 }
 0x350   : > { %v2840_v24 = vadd.f32 %v2839_v40, %v2739_v37 }
 0x351   : > { %v2847_v14 = vpop.f32.mrf.mxu0 }
 0x352   : > { %v2939_v16 = vpop.f32.mrf.mxu1 }
 0x353   : > { %v3035_v51 = vpop.f32.mrf.mxu2  ;;  %v5717_v27 = vadd.f32 %v2939_v16, %v2838_v23 }
 0x354   : > { %v5720_v29 = vadd.f32 %v3035_v51, %v5568_v3  ;;  %4017 = vmatmul.msk.bf16.gmra.mxu3 %vm521_vm2, %v5442_v8  ;;  %4039 = vmatmul.msk.bf16.gmra.mxu0 %vm521_vm2, %v5481_v12  ;;  %v5764_v51 = vld [vmem:[#allocation2 + $0x90] sm:$0xff] }
 0x355   : > { %4058 = vmatmul.msk.bf16.gmra.mxu1 %vm521_vm2, %v5460_v28 }
 0x357   : > { %v2742_v41 = vpop.f32.mrf.mxu3 }
 0x358   : > { %4004 = vmatmul.msk.bf16.gmra.mxu2 %vm521_vm2, %v5596_v32  ;;  %v2843_v4 = vadd.f32 %v2842_v36, %v2742_v41 }
 0x359   : > { %v2849_v34 = vpop.f32.mrf.mxu0 }
 0x35a   : > { %v2941_v19 = vpop.f32.mrf.mxu1 }
 0x35b   : > { %v5730_v21 = vadd.f32 %v2941_v19, %v2840_v24 }
 0x35f   : > { %v2744_v3 = vpop.f32.mrf.mxu3 }
 0x360   : > { %v2845_v56 = vadd.f32 %v2844_v0, %v2744_v3 }
 0x361   : > { %v2852_v10 = vpop.f32.mrf.mxu0 }
 0x362   : > { %v2944_v35 = vpop.f32.mrf.mxu1 }
 0x363   : > { %v5732_v8 = vadd.f32 %v2944_v35, %v2843_v4 }
 0x364   : > { %4018 = vmatmul.msk.bf16.gmra.mxu3 %vm521_vm2, %v5460_v28  ;;  %4040 = vmatmul.msk.bf16.gmra.mxu0 %vm521_vm2, %v5504_v63 }
 0x365   : > { %4059 = vmatmul.msk.bf16.gmra.mxu1 %vm521_vm2, %v5481_v12 }
 0x367   : > { %v2747_v47 = vpop.f32.mrf.mxu3 }
 0x368   : > { %4005 = vmatmul.msk.bf16.gmra.mxu2 %vm521_vm2, %v5619_v62  ;;  %v2848_v40 = vadd.f32 %v2847_v14, %v2747_v47 }
 0x369   : > { %v2854_v1 = vpop.f32.mrf.mxu0 }
 0x36a   : > { %v2946_v13 = vpop.f32.mrf.mxu1 }
 0x36b   : > { %v5742_v54 = vadd.f32 %v2946_v13, %v2845_v56 }
 0x36f   : > { %v2749_v48 = vpop.f32.mrf.mxu3 }
 0x370   : > { %v2850_v36 = vadd.f32 %v2849_v34, %v2749_v48 }
 0x371   : > { %v2857_v45 = vpop.f32.mrf.mxu0 }
 0x372   : > { %v2949_v20 = vpop.f32.mrf.mxu1 }
 0x373   : > { %v5744_v28 = vadd.f32 %v2949_v20, %v2848_v40 }
 0x374   : > { %4019 = vmatmul.msk.bf16.gmra.mxu3 %vm521_vm2, %v5481_v12  ;;  %4041 = vmatmul.msk.bf16.gmra.mxu0 %vm521_vm2, %v5527_v22 }
 0x375   : > { %4060 = vmatmul.msk.bf16.gmra.mxu1 %vm521_vm2, %v5504_v63 }
 0x377   : > { %v2752_v46 = vpop.f32.mrf.mxu3 }
 0x378   : > { %4006 = vmatmul.msk.bf16.gmra.mxu2 %vm521_vm2, %v5642_v61  ;;  %v2853_v23 = vadd.f32 %v2852_v10, %v2752_v46 }
 0x379   : > { %v2859_v0 = vpop.f32.mrf.mxu0 }
 0x37a   : > { %v2951_v43 = vpop.f32.mrf.mxu1 }
 0x37b   : > { %v5754_v26 = vadd.f32 %v2951_v43, %v2850_v36  ;;  %v2785_v36 = vadd.f32 %v5435_v18, %v5439_v59 }
 0x37f   : > { %v2754_v37 = vpop.f32.mrf.mxu3 }
 0x380   : > { %v2855_v24 = vadd.f32 %v2854_v1, %v2754_v37 }
 0x381   : > { %v3286_v14 = vpop.f32.mrf.mxu0 }
 0x382   : > { %v2954_v16 = vpop.f32.mrf.mxu1 }
 0x383   : > { %v5756_v12 = vadd.f32 %v2954_v16, %v2853_v23 }
 0x384   : > { %4020 = vmatmul.msk.bf16.gmra.mxu3 %vm521_vm2, %v5504_v63  ;;  %4042 = vmatmul.msk.bf16.gmra.mxu0 %vm521_vm2, %v5550_v17 }
 0x385   : > { %4061 = vmatmul.msk.bf16.gmra.mxu1 %vm521_vm2, %v5527_v22 }
 0x387   : > { %v2757_v41 = vpop.f32.mrf.mxu3 }
 0x388   : > { %4007 = vmatmul.msk.bf16.gmra.mxu2 %vm521_vm2, %v5764_v51  ;;  %v2858_v4 = vadd.f32 %v2857_v45, %v2757_v41 }
 0x389   : > { %v3288_v34 = vpop.f32.mrf.mxu0 }
 0x38a   : > { %v2956_v19 = vpop.f32.mrf.mxu1 }
 0x38b   : > { %v5768_v3 = vadd.f32 %v2956_v19, %v2855_v24 }
 0x38f   : > { %v2759_v56 = vpop.f32.mrf.mxu3 }
 0x390   : > { %v2860_v10 = vadd.f32 %v2859_v0, %v2759_v56  ;;  %v5787_v0 = vld [vmem:[%s5954_s4] ss:$0 sm:$0xff] }
 0x391   : > { %v3291_v63 = vpop.f32.mrf.mxu0 }
 0x392   : > { %v2959_v35 = vpop.f32.mrf.mxu1 }
 0x393   : > { %v5770_v47 = vadd.f32 %v2959_v35, %v2858_v4 }
 0x394   : > { %4021 = vmatmul.msk.bf16.gmra.mxu3 %vm521_vm2, %v5527_v22  ;;  %4043 = vmatmul.msk.bf16.gmra.mxu0 %vm521_vm2, %v5573_v49  ;;  %v2965_v22 = vadd.f32 %v5495_v6, %v2785_v36 }
 0x395   : > { %4062 = vmatmul.msk.bf16.gmra.mxu1 %vm521_vm2, %v5550_v17 }
 0x396   : > { %v3099_v37 = vadd.f32 %v5662_v53, %v2965_v22  ;;  %v5803_v53 = vpop.f32.mrf.mxu2 }
 0x397   : > { %v3152_v40 = vpop.f32.mrf.mxu3 }
 0x398   : > { %v3232_v45 = vadd.f32 %v3152_v40, %v5660_v11 }
 0x399   : > { %v3293_v1 = vpop.f32.mrf.mxu0 }
 0x39a   : > { %v2961_v13 = vpop.f32.mrf.mxu1  ;;  %v3366_v23 = vadd.f32 %v3286_v14, %v3232_v45 }
 0x39b   : > { %v5778_v48 = vadd.f32 %v2961_v13, %v2860_v10 }
 0x39e   : > { %v5809_v36 = vpop.f32.mrf.mxu2 }
 0x39f   : > { %v3154_v20 = vpop.f32.mrf.mxu3 }
 0x3a0   : > { %v3233_v18 = vadd.f32 %v3154_v20, %v3099_v37 }
 0x3a1   : > { %v3296_v46 = vpop.f32.mrf.mxu0 }
 0x3a2   : > { %v3420_v43 = vpop.f32.mrf.mxu1  ;;  %v3367_v14 = vadd.f32 %v3288_v34, %v3233_v18 }
 0x3a3   : > { %v3500_v24 = vadd.f32 %v3420_v43, %v3366_v23 }
 0x3a4   : > { %4022 = vmatmul.msk.bf16.gmra.mxu3 %vm521_vm2, %v5550_v17  ;;  %4044 = vmatmul.msk.bf16.gmra.mxu0 %vm521_vm2, %v5596_v32 }
 0x3a5   : > { %v3536_v59 = vadd.f32 %v5787_v0, %v3500_v24  ;;  %4063 = vmatmul.msk.bf16.gmra.mxu1 %vm521_vm2, %v5573_v49 }
 0x3a6   : > { %v5820_v24 = vpop.f32.mrf.mxu2 }
 0x3a7   : > { %v3568_v6 = vmax.f32 %v3536_v59, 0.0  ;;  %v3157_v11 = vpop.f32.mrf.mxu3 }
 0x3a8   : > { %v3234_v4 = vadd.f32 %v3157_v11, %v5677_v2 }
 0x3a9   : > { %3600 = vst [vmem:[%s5801_s15] sm:$0xff] %v3568_v6  ;;  %v3298_v17 = vpop.f32.mrf.mxu0 }
 0x3aa   : > { %v3422_v16 = vpop.f32.mrf.mxu1  ;;  %v3368_v40 = vadd.f32 %v3291_v63, %v3234_v4 }
 0x3ab   : > { %v3501_v41 = vadd.f32 %v3422_v16, %v3367_v14 }
 0x3ad   : > { %v3537_v19 = vadd.f32 %v5787_v0, %v3501_v41 }
 0x3ae   : > { %v5833_v41 = vpop.f32.mrf.mxu2 }
 0x3af   : > { %v3569_v56 = vmax.f32 %v3537_v19, 0.0  ;;  %v3159_v10 = vpop.f32.mrf.mxu3 }
 0x3b0   : > { %v3235_v2 = vadd.f32 %v3159_v10, %v5684_v9 }
 0x3b1   : > { %3601 = vst [vmem:[%s5801_s15 + $0x8] sm:$0xff] %v3569_v56  ;;  %v3301_v35 = vpop.f32.mrf.mxu0 }
 0x3b2   : > { %v3425_v13 = vpop.f32.mrf.mxu1  ;;  %v3369_v23 = vadd.f32 %v3293_v1, %v3235_v2 }
 0x3b3   : > { %v3502_v45 = vadd.f32 %v3425_v13, %v3368_v40 }
 0x3b4   : > { %4023 = vmatmul.msk.bf16.gmra.mxu3 %vm521_vm2, %v5573_v49  ;;  %4045 = vmatmul.msk.bf16.gmra.mxu0 %vm521_vm2, %v5619_v62 }
 0x3b5   : > { %v3538_v34 = vadd.f32 %v5787_v0, %v3502_v45  ;;  %4064 = vmatmul.msk.bf16.gmra.mxu1 %vm521_vm2, %v5596_v32 }
 0x3b6   : > { %v5838_v2 = vpop.f32.mrf.mxu2 }
 0x3b7   : > { %v3570_v20 = vmax.f32 %v3538_v34, 0.0  ;;  %v3162_v63 = vpop.f32.mrf.mxu3 }
 0x3b8   : > { %v3236_v49 = vadd.f32 %v3162_v63, %v5697_v30 }
 0x3b9   : > { %3602 = vst [vmem:[%s5801_s15 + $0x10] sm:$0xff] %v3570_v20  ;;  %v3303_v22 = vpop.f32.mrf.mxu0 }
 0x3ba   : > { %v3427_v43 = vpop.f32.mrf.mxu1  ;;  %v3370_v11 = vadd.f32 %v3296_v46, %v3236_v49 }
 0x3bb   : > { %v3503_v37 = vadd.f32 %v3427_v43, %v3369_v23 }
 0x3bd   : > { %v3539_v18 = vadd.f32 %v5787_v0, %v3503_v37 }
 0x3bf   : > { %v3571_v9 = vmax.f32 %v3539_v18, 0.0  ;;  %v3164_v59 = vpop.f32.mrf.mxu3 }
 0x3c0   : > { %v3237_v1 = vadd.f32 %v3164_v59, %v5702_v58 }
 0x3c1   : > { %3603 = vst [vmem:[%s5801_s15 + $0x18] sm:$0xff] %v3571_v9  ;;  %v3306_v6 = vpop.f32.mrf.mxu0  ;;  %v3050_v9 = vpop.f32.mrf.mxu2 }
 0x3c2   : > { %v3430_v14 = vpop.f32.mrf.mxu1  ;;  %v3371_v56 = vadd.f32 %v3298_v17, %v3237_v1 }
 0x3c3   : > { %v3504_v16 = vadd.f32 %v3430_v14, %v3370_v11 }
 0x3c4   : > { %4024 = vmatmul.msk.bf16.gmra.mxu3 %vm521_vm2, %v5596_v32  ;;  %4046 = vmatmul.msk.bf16.gmra.mxu0 %vm521_vm2, %v5642_v61 }
 0x3c5   : > { %v3540_v30 = vadd.f32 %v5787_v0, %v3504_v16  ;;  %4065 = vmatmul.msk.bf16.gmra.mxu1 %vm521_vm2, %v5619_v62 }
 0x3c7   : > { %v3572_v4 = vmax.f32 %v3540_v30, 0.0  ;;  %v3167_v46 = vpop.f32.mrf.mxu3 }
 0x3c8   : > { %v3238_v40 = vadd.f32 %v3167_v46, %v5715_v39  ;;  %v4093_v46 = vld [vmem:[#allocation2 + $0x98] sm:$0xff] }
 0x3c9   : > { %3604 = vst [vmem:[%s5801_s15 + $0x20] sm:$0xff] %v3572_v4  ;;  %v3308_v19 = vpop.f32.mrf.mxu0 }
 0x3ca   : > { %v3432_v10 = vpop.f32.mrf.mxu1  ;;  %v3372_v20 = vadd.f32 %v3301_v35, %v3238_v40 }
 0x3cb   : > { %v3505_v32 = vadd.f32 %v3432_v10, %v3371_v56 }
 0x3cd   : > { %v3541_v13 = vadd.f32 %v5787_v0, %v3505_v32 }
 0x3cf   : > { %v3573_v58 = vmax.f32 %v3541_v13, 0.0  ;;  %v3169_v45 = vpop.f32.mrf.mxu3 }
 0x3d0   : > { %v3239_v39 = vadd.f32 %v3169_v45, %v5720_v29 }
 0x3d1   : > { %3605 = vst [vmem:[%s5801_s15 + $0x28] sm:$0xff] %v3573_v58  ;;  %v3311_v34 = vpop.f32.mrf.mxu0 }
 0x3d2   : > { %v3435_v63 = vpop.f32.mrf.mxu1  ;;  %v3373_v49 = vadd.f32 %v3303_v22, %v3239_v39  ;;  %v3107_v22 = vadd.f32 %v5809_v36, %v5591_v60  ;;  %v3108_v36 = vadd.f32 %v5820_v24, %v5599_v25 }
 0x3d3   : > { %v3506_v23 = vadd.f32 %v3435_v63, %v3372_v20 }
 0x3d4   : > { %4025 = vmatmul.msk.bf16.gmra.mxu3 %vm521_vm2, %v5619_v62  ;;  %4047 = vmatmul.msk.bf16.gmra.mxu0 %vm521_vm2, %v5764_v51  ;;  %v3106_v62 = vadd.f32 %v5803_v53, %v5576_v33  ;;  %v3053_v33 = vpop.f32.mrf.mxu2 }
 0x3d5   : > { %v3542_v17 = vadd.f32 %v5787_v0, %v3506_v23  ;;  %4066 = vmatmul.msk.bf16.gmra.mxu1 %vm521_vm2, %v5642_v61 }
 0x3d7   : > { %v3574_v43 = vmax.f32 %v3542_v17, 0.0  ;;  %v3172_v37 = vpop.f32.mrf.mxu3 }
 0x3d8   : > { %v3240_v11 = vadd.f32 %v3172_v37, %v3106_v62  ;;  %v4094_v37 = vld [vmem:[#allocation2 + $0xa0] sm:$0xff] }
 0x3d9   : > { %3606 = vst [vmem:[%s5801_s15 + $0x30] sm:$0xff] %v3574_v43  ;;  %v3313_v35 = vpop.f32.mrf.mxu0 }
 0x3da   : > { %v3437_v18 = vpop.f32.mrf.mxu1  ;;  %v3374_v30 = vadd.f32 %v3306_v6, %v3240_v11 }
 0x3db   : > { %v3507_v59 = vadd.f32 %v3437_v18, %v3373_v49 }
 0x3dc   : > { %v3055_v20 = vpop.f32.mrf.mxu2 }
 0x3dd   : > { %v3543_v29 = vadd.f32 %v5787_v0, %v3507_v59 }
 0x3df   : > { %v3575_v14 = vmax.f32 %v3543_v29, 0.0  ;;  %v3174_v16 = vpop.f32.mrf.mxu3 }
 0x3e0   : > { %v3241_v53 = vadd.f32 %v3174_v16, %v3107_v22 }
 0x3e1   : > { %3607 = vst [vmem:[%s5801_s15 + $0x38] sm:$0xff] %v3575_v14  ;;  %v3316_v1 = vpop.f32.mrf.mxu0 }
 0x3e2   : > { %v3440_v4 = vpop.f32.mrf.mxu1  ;;  %v3375_v13 = vadd.f32 %v3308_v19, %v3241_v53  ;;  %v3109_v19 = vadd.f32 %v5833_v41, %v5614_v42  ;;  %v3110_v42 = vadd.f32 %v5838_v2, %v5622_v31 }
 0x3e3   : > { %v3508_v56 = vadd.f32 %v3440_v4, %v3374_v30 }
 0x3e4   : > { %4026 = vmatmul.msk.bf16.gmra.mxu3 %vm521_vm2, %v5642_v61  ;;  %4048 = vmatmul.msk.bf16.gmra.mxu0 %vm521_vm2, %v4093_v46 }
 0x3e5   : > { %v3544_v10 = vadd.f32 %v5787_v0, %v3508_v56  ;;  %4067 = vmatmul.msk.bf16.gmra.mxu1 %vm521_vm2, %v5764_v51  ;;  %v3111_v56 = vadd.f32 %v3050_v9, %v5637_v57 }
 0x3e7   : > { %v3576_v6 = vmax.f32 %v3544_v10, 0.0  ;;  %v3177_v32 = vpop.f32.mrf.mxu3 }
 0x3e8   : > { %v3242_v58 = vadd.f32 %v3177_v32, %v3108_v36 }
 0x3e9   : > { %3608 = vst [vmem:[%s5801_s15 + $0x40] sm:$0xff] %v3576_v6  ;;  %v3318_v40 = vpop.f32.mrf.mxu0 }
 0x3ea   : > { %v3442_v60 = vpop.f32.mrf.mxu1  ;;  %v3376_v17 = vadd.f32 %v3311_v34, %v3242_v58  ;;  %v3058_v34 = vpop.f32.mrf.mxu2 }
 0x3eb   : > { %v3509_v61 = vadd.f32 %v3442_v60, %v3375_v13 }
 0x3ed   : > { %v3545_v45 = vadd.f32 %v5787_v0, %v3509_v61 }
 0x3ef   : > { %v3577_v63 = vmax.f32 %v3545_v45, 0.0  ;;  %v3179_v23 = vpop.f32.mrf.mxu3 }
 0x3f0   : > { %v3243_v25 = vadd.f32 %v3179_v23, %v3109_v19  ;;  %v4095_v23 = vld [vmem:[#allocation2 + $0xa8] sm:$0xff] }
 0x3f1   : > { %3609 = vst [vmem:[%s5801_s15 + $0x48] sm:$0xff] %v3577_v63  ;;  %v3321_v39 = vpop.f32.mrf.mxu0 }
 0x3f2   : > { %v3445_v43 = vpop.f32.mrf.mxu1  ;;  %v3377_v59 = vadd.f32 %v3313_v35, %v3243_v25  ;;  %v3060_v53 = vpop.f32.mrf.mxu2 }
 0x3f3   : > { %v3510_v49 = vadd.f32 %v3445_v43, %v3376_v17  ;;  %v3113_v43 = vadd.f32 %v3055_v20, %v5657_v52 }
 0x3f4   : > { %4027 = vmatmul.msk.bf16.gmra.mxu3 %vm521_vm2, %v5764_v51  ;;  %4049 = vmatmul.msk.bf16.gmra.mxu0 %vm521_vm2, %v4094_v37 }
 0x3f5   : > { %v3546_v24 = vadd.f32 %v5787_v0, %v3510_v49  ;;  %4068 = vmatmul.msk.bf16.gmra.mxu1 %vm521_vm2, %v4093_v46 }
 0x3f7   : > { %v3578_v18 = vmax.f32 %v3546_v24, 0.0  ;;  %v3182_v62 = vpop.f32.mrf.mxu3 }
 0x3f8   : > { %v3244_v51 = vadd.f32 %v3182_v62, %v3110_v42 }
 0x3f9   : > { %3610 = vst [vmem:[%s5801_s15 + $0x50] sm:$0xff] %v3578_v18  ;;  %v3323_v11 = vpop.f32.mrf.mxu0 }
 0x3fa   : > { %v3447_v29 = vpop.f32.mrf.mxu1  ;;  %v3378_v4 = vadd.f32 %v3316_v1, %v3244_v51  ;;  %v3112_v1 = vadd.f32 %v3053_v33, %v5645_v38  ;;  %v3063_v57 = vpop.f32.mrf.mxu2 }
 0x3fb   : > { %v3511_v41 = vadd.f32 %v3447_v29, %v3377_v59 }
 0x3fd   : > { %v3547_v14 = vadd.f32 %v5787_v0, %v3511_v41 }
 0x3ff   : > { %v3579_v16 = vmax.f32 %v3547_v14, 0.0  ;;  %v3184_v30 = vpop.f32.mrf.mxu3 }
 0x400   : > { %v3245_v6 = vadd.f32 %v3184_v30, %v3111_v56 }
 0x401   : > { %3611 = vst [vmem:[%s5801_s15 + $0x58] sm:$0xff] %v3579_v16  ;;  %v3326_v35 = vpop.f32.mrf.mxu0  ;;  %v3115_v16 = vadd.f32 %v3060_v53, %v5674_v5 }
 0x402   : > { %v3450_v22 = vpop.f32.mrf.mxu1  ;;  %v3379_v13 = vadd.f32 %v3318_v40, %v3245_v6  ;;  %v3065_v38 = vpop.f32.mrf.mxu2 }
 0x403   : > { %v3512_v10 = vadd.f32 %v3450_v22, %v3378_v4 }
 0x404   : > { %4028 = vmatmul.msk.bf16.gmra.mxu3 %vm521_vm2, %v4093_v46 }
 0x405   : > { %v3548_v31 = vadd.f32 %v5787_v0, %v3512_v10  ;;  %4069 = vmatmul.msk.bf16.gmra.mxu1 %vm521_vm2, %v4094_v37  ;;  %v3116_v10 = vadd.f32 %v3063_v57, %v5682_v44 }
 0x407   : > { %v3580_v2 = vmax.f32 %v3548_v31, 0.0  ;;  %v3187_v32 = vpop.f32.mrf.mxu3 }
 0x408   : > { %v3246_v9 = vadd.f32 %v3187_v32, %v3112_v1  ;;  %v3117_v1 = vadd.f32 %v3065_v38, %v5694_v7 }
 0x409   : > { %3612 = vst [vmem:[%s5801_s15 + $0x60] sm:$0xff] %v3580_v2  ;;  %v3328_v58 = vpop.f32.mrf.mxu0 }
 0x40a   : > { %v3452_v60 = vpop.f32.mrf.mxu1  ;;  %v3380_v63 = vadd.f32 %v3321_v39, %v3246_v9  ;;  %v3114_v39 = vadd.f32 %v3058_v34, %v5664_v50  ;;  %v3068_v42 = vpop.f32.mrf.mxu2 }
 0x40b   : > { %v3513_v36 = vadd.f32 %v3452_v60, %v3379_v13 }
 0x40d   : > { %v3549_v61 = vadd.f32 %v5787_v0, %v3513_v36 }
 0x40f   : > { %v3581_v46 = vmax.f32 %v3549_v61, 0.0  ;;  %v3189_v45 = vpop.f32.mrf.mxu3 }
 0x410   : > { %v3247_v40 = vadd.f32 %v3189_v45, %v3113_v43 }
 0x411   : > { %3613 = vst [vmem:[%s5801_s15 + $0x68] sm:$0xff] %v3581_v46  ;;  %v3331_v25 = vpop.f32.mrf.mxu0 }
 0x412   : > { %v3455_v17 = vpop.f32.mrf.mxu1  ;;  %v3381_v24 = vadd.f32 %v3323_v11, %v3247_v40  ;;  %v3070_v6 = vpop.f32.mrf.mxu2 }
 0x413   : > { %v3514_v37 = vadd.f32 %v3455_v17, %v3380_v63 }
 0x415   : > { %v3550_v19 = vadd.f32 %v5787_v0, %v3514_v37  ;;  %4070 = vmatmul.msk.bf16.gmra.mxu1 %vm521_vm2, %v4095_v23  ;;  %v3118_v23 = vadd.f32 %v3068_v42, %v5699_v55 }
 0x417   : > { %v3582_v33 = vmax.f32 %v3550_v19, 0.0  ;;  %v3192_v49 = vpop.f32.mrf.mxu3 }
 0x418   : > { %v3248_v59 = vadd.f32 %v3192_v49, %v3114_v39 }
 0x419   : > { %3614 = vst [vmem:[%s5801_s15 + $0x70] sm:$0xff] %v3582_v33  ;;  %v3333_v51 = vpop.f32.mrf.mxu0 }
 0x41a   : > { %v3457_v18 = vpop.f32.mrf.mxu1  ;;  %v3382_v41 = vadd.f32 %v3326_v35, %v3248_v59  ;;  %v3073_v9 = vpop.f32.mrf.mxu2 }
 0x41b   : > { %v3515_v62 = vadd.f32 %v3457_v18, %v3381_v24  ;;  %v3120_v42 = vadd.f32 %v3073_v9, %v5717_v27 }
 0x41d   : > { %v3551_v52 = vadd.f32 %v5787_v0, %v3515_v62 }
 0x41f   : > { %v3583_v20 = vmax.f32 %v3551_v52, 0.0  ;;  %v3194_v29 = vpop.f32.mrf.mxu3 }
 0x420   : > { %v3249_v11 = vadd.f32 %v3194_v29, %v3115_v16 }
 0x421   : > { %3615 = vst [vmem:[%s5801_s15 + $0x78] sm:$0xff] %v3583_v20  ;;  %v3336_v2 = vpop.f32.mrf.mxu0 }
 0x422   : > { %v3460_v14 = vpop.f32.mrf.mxu1  ;;  %v3383_v22 = vadd.f32 %v3328_v58, %v3249_v11  ;;  %v3075_v7 = vpop.f32.mrf.mxu2 }
 0x423   : > { %v3516_v30 = vadd.f32 %v3460_v14, %v3382_v41 }
 0x425   : > { %v3552_v4 = vadd.f32 %v5787_v0, %v3516_v30 }
 0x427   : > { %v3584_v50 = vmax.f32 %v3552_v4, 0.0  ;;  %v3197_v34 = vpop.f32.mrf.mxu3  ;;  %v3121_v4 = vadd.f32 %v3075_v7, %v5730_v21 }
 0x428   : > { %v3250_v35 = vadd.f32 %v3197_v34, %v3116_v10 }
 0x429   : > { %3616 = vst [vmem:[%s5801_s15 + $0x80] sm:$0xff] %v3584_v50  ;;  %v3338_v57 = vpop.f32.mrf.mxu0 }
 0x42a   : > { %v3462_v56 = vpop.f32.mrf.mxu1  ;;  %v3384_v13 = vadd.f32 %v3331_v25, %v3250_v35  ;;  %v3119_v25 = vadd.f32 %v3070_v6, %v5712_v15  ;;  %v3078_v59 = vpop.f32.mrf.mxu2 }
 0x42b   : > { %v3517_v31 = vadd.f32 %v3462_v56, %v3383_v22  ;;  %v3122_v35 = vadd.f32 %v3078_v59, %v5732_v8 }
 0x42d   : > { %v3553_v32 = vadd.f32 %v5787_v0, %v3517_v31 }
 0x42f   : > { %v3585_v5 = vmax.f32 %v3553_v32, 0.0  ;;  %v3199_v53 = vpop.f32.mrf.mxu3 }
 0x430   : > { %v3251_v61 = vadd.f32 %v3199_v53, %v3117_v1 }
 0x431   : > { %3617 = vst [vmem:[%s5801_s15 + $0x88] sm:$0xff] %v3585_v5  ;;  %v3341_v38 = vpop.f32.mrf.mxu0 }
 0x432   : > { %v3465_v60 = vpop.f32.mrf.mxu1  ;;  %v3385_v45 = vadd.f32 %v3333_v51, %v3251_v61  ;;  %v3080_v50 = vpop.f32.mrf.mxu2 }
 0x433   : > { %v3518_v36 = vadd.f32 %v3465_v60, %v3384_v13  ;;  %v3123_v61 = vadd.f32 %v3080_v50, %v5742_v54 }
 0x435   : > { %v3554_v44 = vadd.f32 %v5787_v0, %v3518_v36 }
 0x437   : > { %v3586_v58 = vmax.f32 %v3554_v44, 0.0  ;;  %v3202_v46 = vpop.f32.mrf.mxu3 }
 0x438   : > { %v3252_v43 = vadd.f32 %v3202_v46, %v3118_v23 }
 0x439   : > { %3618 = vst [vmem:[%s5801_s15 + $0x90] sm:$0xff] %v3586_v58  ;;  %v3343_v20 = vpop.f32.mrf.mxu0 }
 0x43a   : > { %v3467_v63 = vpop.f32.mrf.mxu1  ;;  %v3386_v33 = vadd.f32 %v3336_v2, %v3252_v43  ;;  %v3083_v5 = vpop.f32.mrf.mxu2 }
 0x43b   : > { %v3519_v17 = vadd.f32 %v3467_v63, %v3385_v45  ;;  %v3124_v43 = vadd.f32 %v3083_v5, %v5744_v28 }
 0x43d   : > { %v3555_v37 = vadd.f32 %v5787_v0, %v3519_v17 }
 0x43f   : > { %v3587_v40 = vmax.f32 %v3555_v37, 0.0  ;;  %v3204_v19 = vpop.f32.mrf.mxu3 }
 0x440   : > { %v3253_v18 = vadd.f32 %v3204_v19, %v3119_v25 }
 0x441   : > { %3619 = vst [vmem:[%s5801_s15 + $0x98] sm:$0xff] %v3587_v40  ;;  %v3346_v22 = vpop.f32.mrf.mxu0 }
 0x442   : > { %v3470_v49 = vpop.f32.mrf.mxu1  ;;  %v3387_v52 = vadd.f32 %v3338_v57, %v3253_v18  ;;  %v3085_v8 = vpop.f32.mrf.mxu2 }
 0x443   : > { %v3520_v24 = vadd.f32 %v3470_v49, %v3386_v33 }
 0x445   : > { %v3556_v39 = vadd.f32 %v5787_v0, %v3520_v24  ;;  %v3125_v24 = vadd.f32 %v3085_v8, %v5754_v26 }
 0x447   : > { %v3588_v55 = vmax.f32 %v3556_v39, 0.0  ;;  %v3207_v62 = vpop.f32.mrf.mxu3 }
 0x448   : > { %v3254_v51 = vadd.f32 %v3207_v62, %v3120_v42 }
 0x449   : > { %3620 = vst [vmem:[%s5801_s15 + $0xa0] sm:$0xff] %v3588_v55  ;;  %v3348_v13 = vpop.f32.mrf.mxu0 }
 0x44a   : > { %v3472_v29 = vpop.f32.mrf.mxu1  ;;  %v3388_v30 = vadd.f32 %v3341_v38, %v3254_v51  ;;  %v3088_v38 = vpop.f32.mrf.mxu2 }
 0x44b   : > { %v3521_v41 = vadd.f32 %v3472_v29, %v3387_v52  ;;  %v3126_v29 = vadd.f32 %v3088_v38, %v5756_v12 }
 0x44d   : > { %v3557_v14 = vadd.f32 %v5787_v0, %v3521_v41 }
 0x44f   : > { %v3589_v15 = vmax.f32 %v3557_v14, 0.0  ;;  %v3209_v16 = vpop.f32.mrf.mxu3 }
 0x450   : > { %v3255_v56 = vadd.f32 %v3209_v16, %v3121_v4 }
 0x451   : > { %3621 = vst [vmem:[%s5801_s15 + $0xa8] sm:$0xff] %v3589_v15  ;;  %v3351_v63 = vpop.f32.mrf.mxu0 }
 0x452   : > { %v3475_v11 = vpop.f32.mrf.mxu1  ;;  %v3389_v31 = vadd.f32 %v3343_v20, %v3255_v56  ;;  %v3090_v41 = vpop.f32.mrf.mxu2 }
 0x453   : > { %v3522_v34 = vadd.f32 %v3475_v11, %v3388_v30  ;;  %v3127_v11 = vadd.f32 %v3090_v41, %v5768_v3 }
 0x455   : > { %v3558_v10 = vadd.f32 %v5787_v0, %v3522_v34 }
 0x457   : > { %v3590_v27 = vmax.f32 %v3558_v10, 0.0  ;;  %v3212_v6 = vpop.f32.mrf.mxu3 }
 0x458   : > { %v3256_v53 = vadd.f32 %v3212_v6, %v3122_v35 }
 0x459   : > { %3622 = vst [vmem:[%s5801_s15 + $0xb0] sm:$0xff] %v3590_v27  ;;  %v3353_v49 = vpop.f32.mrf.mxu0 }
 0x45a   : > { %v3477_v2 = vpop.f32.mrf.mxu1  ;;  %v3390_v36 = vadd.f32 %v3346_v22, %v3256_v53  ;;  %v3093_v12 = vpop.f32.mrf.mxu2 }
 0x45b   : > { %v3523_v32 = vadd.f32 %v3477_v2, %v3389_v31  ;;  %v3128_v31 = vadd.f32 %v3093_v12, %v5770_v47 }
 0x45d   : > { %v3559_v21 = vadd.f32 %v5787_v0, %v3523_v32 }
 0x45f   : > { %v3591_v60 = vmax.f32 %v3559_v21, 0.0  ;;  %v3214_v1 = vpop.f32.mrf.mxu3 }
 0x460   : > { %v3257_v57 = vadd.f32 %v3214_v1, %v3123_v61 }
 0x461   : > { %3623 = vst [vmem:[%s5801_s15 + $0xb8] sm:$0xff] %v3591_v60  ;;  %v3356_v52 = vpop.f32.mrf.mxu0 }
 0x462   : > { %v3480_v9 = vpop.f32.mrf.mxu1  ;;  %v3391_v23 = vadd.f32 %v3348_v13, %v3257_v57  ;;  %v3095_v53 = vpop.f32.mrf.mxu2 }
 0x463   : > { %v3524_v44 = vadd.f32 %v3480_v9, %v3390_v36  ;;  %v3129_v1 = vadd.f32 %v3095_v53, %v5778_v48 }
 0x465   : > { %v3560_v58 = vadd.f32 %v5787_v0, %v3524_v44 }
 0x467   : > { %v3592_v46 = vmax.f32 %v3560_v58, 0.0  ;;  %v3217_v45 = vpop.f32.mrf.mxu3 }
 0x468   : > { %v3258_v7 = vadd.f32 %v3217_v45, %v3124_v43 }
 0x469   : > { %3624 = vst [vmem:[%s5801_s15 + $0xc0] sm:$0xff] %v3592_v46  ;;  %v3358_v50 = vpop.f32.mrf.mxu0 }
 0x46a   : > { %v3482_v17 = vpop.f32.mrf.mxu1  ;;  %v3392_v33 = vadd.f32 %v3351_v63, %v3258_v7 }
 0x46b   : > { %v3525_v37 = vadd.f32 %v3482_v17, %v3391_v23 }
 0x46d   : > { %v3561_v40 = vadd.f32 %v5787_v0, %v3525_v37 }
 0x46f   : > { %v3593_v54 = vmax.f32 %v3561_v40, 0.0  ;;  %v3219_v19 = vpop.f32.mrf.mxu3 }
 0x470   : > { %v3259_v39 = vadd.f32 %v3219_v19, %v3125_v24 }
 0x471   : > { %3625 = vst [vmem:[%s5801_s15 + $0xc8] sm:$0xff] %v3593_v54  ;;  %v3361_v3 = vpop.f32.mrf.mxu0 }
 0x472   : > { %v3485_v25 = vpop.f32.mrf.mxu1  ;;  %v3393_v59 = vadd.f32 %v3353_v49, %v3259_v39 }
 0x473   : > { %v3526_v18 = vadd.f32 %v3485_v25, %v3392_v33 }
 0x475   : > { %v3562_v55 = vadd.f32 %v5787_v0, %v3526_v18 }
 0x477   : > { %v3594_v28 = vmax.f32 %v3562_v55, 0.0  ;;  %v3222_v62 = vpop.f32.mrf.mxu3 }
 0x478   : > { %v3260_v51 = vadd.f32 %v3222_v62, %v3126_v29 }
 0x479   : > { %3626 = vst [vmem:[%s5801_s15 + $0xd0] sm:$0xff] %v3594_v28  ;;  %v3363_v44 = vpop.f32.mrf.mxu0 }
 0x47a   : > { %v3487_v20 = vpop.f32.mrf.mxu1  ;;  %v3394_v16 = vadd.f32 %v3356_v52, %v3260_v51 }
 0x47b   : > { %v3527_v42 = vadd.f32 %v3487_v20, %v3393_v59 }
 0x47d   : > { %v3563_v14 = vadd.f32 %v5787_v0, %v3527_v42 }
 0x47f   : > { %v3595_v26 = vmax.f32 %v3563_v14, 0.0  ;;  %v3224_v15 = vpop.f32.mrf.mxu3 }
 0x480   : > { %v3261_v34 = vadd.f32 %v3224_v15, %v3127_v11 }
 0x481   : > { %3627 = vst [vmem:[%s5801_s15 + $0xd8] sm:$0xff] %v3595_v26 }
 0x482   : > { %v3490_v30 = vpop.f32.mrf.mxu1  ;;  %v3395_v27 = vadd.f32 %v3358_v50, %v3261_v34 }
 0x483   : > { %v3528_v4 = vadd.f32 %v3490_v30, %v3394_v16 }
 0x485   : > { %v3564_v22 = vadd.f32 %v5787_v0, %v3528_v4 }
 0x487   : > { %v3596_v56 = vmax.f32 %v3564_v22, 0.0  ;;  %v3227_v10 = vpop.f32.mrf.mxu3 }
 0x488   : > { %v3262_v35 = vadd.f32 %v3227_v10, %v3128_v31 }
 0x489   : > { %3628 = vst [vmem:[%s5801_s15 + $0xe0] sm:$0xff] %v3596_v56 }
 0x48a   : > { %v3492_v6 = vpop.f32.mrf.mxu1  ;;  %v3396_v21 = vadd.f32 %v3361_v3, %v3262_v35 }
 0x48b   : > { %v3529_v2 = vadd.f32 %v3492_v6, %v3395_v27 }
 0x48d   : > { %v3565_v32 = vadd.f32 %v5787_v0, %v3529_v2 }
 0x48f   : > { %v3597_v5 = vmax.f32 %v3565_v32, 0.0  ;;  %v3229_v13 = vpop.f32.mrf.mxu3 }
 0x490   : > { %v3263_v9 = vadd.f32 %v3229_v13, %v3129_v1 }
 0x491   : > { %3629 = vst [vmem:[%s5801_s15 + $0xe8] sm:$0xff] %v3597_v5 }
 0x492   : > { %v3495_v60 = vpop.f32.mrf.mxu1  ;;  %v3397_v57 = vadd.f32 %v3363_v44, %v3263_v9 }
 0x493   : > { %v3530_v36 = vadd.f32 %v3495_v60, %v3396_v21 }
 0x495   : > { %v3566_v61 = vadd.f32 %v5787_v0, %v3530_v36 }
 0x497   : > { %v3598_v47 = vmax.f32 %v3566_v61, 0.0 }
 0x499   : > { %3630 = vst [vmem:[%s5801_s15 + $0xf0] sm:$0xff] %v3598_v47 }
 0x49a   : > { %v3497_v58 = vpop.f32.mrf.mxu1 }
 0x49b   : > { %v3531_v8 = vadd.f32 %v3497_v58, %v3397_v57 }
 0x49d   : > { %v3567_v46 = vadd.f32 %v5787_v0, %v3531_v8 }
 0x49f   : > { %v3599_v45 = vmax.f32 %v3567_v46, 0.0 }
 0x4a1   : > { %3631 = vst [vmem:[%s5801_s15 + $0xf8] sm:$0xff] %v3599_v45 }
 0x4a2 PF: > { %s15_s20 = sadd.s32 1, %s4205_s20   ;;  %s6031_s18 = smov %s4201_s19 }
 0x4a3   : > { %p12_p5 = scmp.ge.s32.totalorder %s15_s20, 4   ;;  %s6032_s19 = smov %s6034_s21 }
 0x4a5   :  { %14 = sbr.rel (!%p12_p5) target bundleno = 2 (0x2), region = 89 }

</bundles_post_ra>
